<compile_context>
chip_gen: v6e
topology: v6e:2x2x1
jax: 0.10.0
libtpu: 0.0.40
codegen_flags: <defaults>
</compile_context>

<pallas_src>
import functools

import jax
import jax.numpy as jnp
from jax.experimental import pallas as pl
from jax.experimental.pallas import tpu as pltpu


def _round_up(n, m):
    return ((n + m - 1) // m) * m


def _elu(v):
    # ELU(alpha=1); exp only sees clamped values so the discarded branch is finite.
    return jnp.where(v > 0.0, v, jnp.exp(jnp.minimum(v, 0.0)) - 1.0)


def _fused_cnn_kernel(x_ref, w1_ref, b1_ref, w2_ref, b2_ref, w3b_ref, b3_ref,
                      o_ref, hpad_ref, p2_ref, *, B, T, W2, Wo, WP, WP2):
    f32 = jnp.float32

    # ----------------- conv1 (1x22) + ELU + BatchNorm1 ----------------------
    # Lane-dense: rows = 16 output channels, cols = flattened B*T.
    z = jnp.dot(w1_ref[...], x_ref[...], preferred_element_type=f32)        # (16, B*T)
    y1 = _elu(z + b1_ref[...])
    inv_n1 = 1.0 / float(B * T)
    mu1 = jnp.sum(y1, axis=1, keepdims=True) * inv_n1                        # per channel
    d1 = y1 - mu1
    var1 = jnp.sum(d1 * d1, axis=1, keepdims=True) * inv_n1                  # biased, eps=0
    y1n = d1 * jax.lax.rsqrt(var1)
    # TODO(synk): F.dropout(p=0.3, training=True) is stochastic -> identity here.

    # ---------- padding1 = ZeroPad2d((16, 17, 0, 1)) into VMEM scratch ------
    # Zero only the pad margins; interior gets one bulk store (no per-batch loop).
    hpad_ref[:, :, 0:16] = jnp.zeros((B, 17, 16), f32)                       # left pad
    hpad_ref[:, :, 16 + T:WP] = jnp.zeros((B, 17, WP - 16 - T), f32)         # right pad
    hpad_ref[:, 16:17, 16:16 + T] = jnp.zeros((B, 1, T), f32)                # bottom row
    y1_bct = jnp.stack([y1n[:, b * T:(b + 1) * T] for b in range(B)], axis=0)  # (B,16,T)
    hpad_ref[:, 0:16, 16:16 + T] = y1_bct

    # ------------- conv2 (2x11): hoisted loads + VPU scalar MACs ------------
    accs = [jnp.zeros((B, 16, W2), f32) + b2_ref[co] for co in range(4)]
    for kh in range(2):
        slab = hpad_ref[:, kh:kh + 16, :]                                    # 1 aligned load
        for kw in range(11):
            patch = slab[:, :, kw:kw + W2]                                   # in-register shift
            for co in range(4):
                accs[co] = accs[co] + w2_ref[co * 22 + kh * 11 + kw] * patch

    # --------- ELU + BatchNorm2 + MaxPool2d(2, stride 4) row-pair max -------
    inv_n2 = 1.0 / float(B * 16 * W2)
    cmax_list = []
    for co in range(4):
        y2 = _elu(accs[co])
        mu2 = jnp.sum(y2) * inv_n2
        d2 = y2 - mu2
        var2 = jnp.sum(d2 * d2) * inv_n2
        y2n = d2 * jax.lax.rsqrt(var2)                                       # eps=0
        # TODO(synk): second F.dropout(p=0.3) likewise identity.
        rmax = jnp.concatenate(
            [jnp.maximum(y2n[:, 4 * oh:4 * oh + 1, :],
                         y2n[:, 4 * oh + 1:4 * oh + 2, :]) for oh in range(4)],
            axis=1)                                                          # (B, 4, W2)
        cmax_list.append(jnp.maximum(rmax[:, :, 0:W2 - 1], rmax[:, :, 1:W2]))  # (B,4,W2-1)

    # Stride-4 column decimation as ONE 2D one-hot matmul over all (b,co,oh) rows.
    cmax_all = jnp.concatenate(cmax_list, axis=1).reshape(B * 16, W2 - 1)    # rows b*16+co*4+oh
    wi = jax.lax.broadcasted_iota(jnp.int32, (W2 - 1, Wo), 0)
    oi = jax.lax.broadcasted_iota(jnp.int32, (W2 - 1, Wo), 1)
    sel = (wi == 4 * oi).astype(f32)                                         # (W2-1, Wo)
    pooled = jnp.dot(cmax_all, sel, preferred_element_type=f32).reshape(B, 16, Wo)

    # ------ padding2 = ZeroPad2d((2, 1, 4, 3)) as flattened (B, 4*11, WP2) --
    p2_ref[...] = jnp.zeros(p2_ref.shape, f32)
    for co in range(4):
        p2_ref[:, co * 11 + 4:co * 11 + 8, 2:2 + Wo] = pooled[:, co * 4:(co + 1) * 4, :]

    # ------------- conv3 (4 -> 1, 8x4) + ELU as one matmul per batch --------
    p2slab = p2_ref[...]                                                     # single load
    stacked = jnp.concatenate([p2slab[:, :, kw:kw + Wo] for kw in range(4)],
                              axis=1)                                        # (B, 176, Wo)
    w3b = w3b_ref[...]                                                       # (4, 176)
    outs = [jnp.dot(w3b, stacked[b], preferred_element_type=f32) for b in range(B)]
    out3 = jnp.concatenate(outs, axis=0) + b3_ref[0]                         # (B*4, Wo)
    o_ref[...] = _elu(out3)                                                  # squeeze(dim=1)


# ----------------------------------------------------------------------------
# Parameters (deterministic synthetic init; shapes from __init__)
# ----------------------------------------------------------------------------
def init_params(key):
    ks = jax.random.split(key, 6)
    return {
        "w1": jax.random.normal(ks[0], (16, 1, 1, 22), jnp.float32) * 0.1,
        "b1": jax.random.normal(ks[1], (16,), jnp.float32) * 0.1,
        "w2": jax.random.normal(ks[2], (4, 1, 2, 11), jnp.float32) * 0.1,
        "b2": jax.random.normal(ks[3], (4,), jnp.float32) * 0.1,
        "w3": jax.random.normal(ks[4], (1, 4, 8, 4), jnp.float32) * 0.1,
        "b3": jax.random.normal(ks[5], (1,), jnp.float32) * 0.1,
    }


# ----------------------------------------------------------------------------
# Forward pass (mirrors CNN_Embedding.forward) -- one pallas_call
# ----------------------------------------------------------------------------
def cnn_embedding_forward(params, x):
    B, c_in, T = x.shape
    assert c_in == 22, "conv1 kernel (1, 22) consumes exactly 22 input channels"
    W2 = T + 23                      # conv2 output width
    Wo = (W2 - 2) // 4 + 1           # MaxPool2d(2, stride=4) output width
    WP = _round_up(T + 33, 128)      # hpad lane dim, explicit 128 multiple
    WP2 = _round_up(Wo + 3, 128)     # p2 lane dim, explicit 128 multiple

    # conv1 acts pointwise over (b, t): present it lane-dense as (22, B*T).
    # NOTE: for production shapes pick B*T a multiple of 256 (v6e/v7x MXU width).
    x2d = jnp.transpose(x, (1, 0, 2)).reshape(22, B * T).astype(jnp.float32)
    w1 = params["w1"].reshape(16, 22).astype(jnp.float32)
    b1 = params["b1"].reshape(16, 1).astype(jnp.float32)
    w2 = params["w2"].reshape(-1).astype(jnp.float32)       # (88,)  co*22 + kh*11 + kw
    b2 = params["b2"].reshape(-1).astype(jnp.float32)       # (4,)
    b3 = params["b3"].reshape(-1).astype(jnp.float32)       # (1,)

    # conv3 weights pre-arranged (plain XLA, negligible) into the (4, 176)
    # matrix used by the in-kernel (4,176)@(176,Wo) matmul:
    #   K index = kw*44 + ic*11 + row,  value = w3[ic, row - oh3, kw] (0 outside support).
    w3 = params["w3"].reshape(4, 8, 4).astype(jnp.float32)   # (ic, kh, kw)
    oh = jnp.arange(4)[:, None]
    row = jnp.arange(11)[None, :]
    kh = row - oh                                            # (4, 11)
    valid = (kh >= 0) & (kh < 8)
    g = jnp.transpose(w3, (1, 0, 2))[jnp.clip(kh, 0, 7)]     # (oh, row, ic, kw)
    g = jnp.where(valid[:, :, None, None], g, 0.0)
    w3big = jnp.transpose(g, (0, 3, 2, 1)).reshape(4, 176)   # (oh3, kw*44+ic*11+row)

    kern = functools.partial(_fused_cnn_kernel, B=B, T=T, W2=W2, Wo=Wo, WP=WP, WP2=WP2)
    vmem = pltpu.MemorySpace.VMEM
    smem = pltpu.MemorySpace.SMEM
    out_flat = pl.pallas_call(
        kern,
        out_shape=jax.ShapeDtypeStruct((B * 4, Wo), jnp.float32),
        in_specs=[
            pl.BlockSpec(memory_space=vmem),   # x2d (22, B*T)
            pl.BlockSpec(memory_space=vmem),   # w1  (16, 22)
            pl.BlockSpec(memory_space=vmem),   # b1  (16, 1)
            pl.BlockSpec(memory_space=smem),   # w2 flat (scalar taps)
            pl.BlockSpec(memory_space=smem),   # b2
            pl.BlockSpec(memory_space=vmem),   # w3big (4, 176)
            pl.BlockSpec(memory_space=smem),   # b3
        ],
        out_specs=pl.BlockSpec(memory_space=vmem),
        scratch_shapes=[
            pltpu.VMEM((B, 17, WP), jnp.float32),    # ZeroPad2d((16,17,0,1)) image
            pltpu.VMEM((B, 44, WP2), jnp.float32),   # ZeroPad2d((2,1,4,3)) image, (ic,row) flattened
        ],
        compiler_params=pltpu.CompilerParams(vmem_limit_bytes=32 * 1024 * 1024),
    )(x2d, w1, b1, w2, b2, w3big, b3)
    out = out_flat.reshape(B, 4, Wo)
    return out, out.shape[-1]


# ----------------------------------------------------------------------------
if __name__ == "__main__":
    key = jax.random.PRNGKey(0)
    pkey, xkey = jax.random.split(key)
    params = init_params(pkey)

    B, T = 2, 16
    x = jax.random.normal(xkey, (B, 22, T), jnp.float32)              # (B, 22, T)

    fwd = jax.jit(lambda p, xx: cnn_embedding_forward(p, xx)[0])
    out = fwd(params, x)
    jax.block_until_ready(out)

    expected_wo = ((T + 23) - 2) // 4 + 1
    assert out.shape == (B, 4, expected_wo), out.shape
    assert cnn_embedding_forward(params, x)[1] == expected_wo
    assert bool(jnp.all(jnp.isfinite(out)))
    print("KERNEL_OK")
</pallas_src>

<mosaic_0001>
module attributes {stable_mosaic.version = 11 : i64} {
  func.func @_fused_cnn_kernel(%arg0: memref<22x32xf32, #tpu.memory_space<vmem>>, %arg1: memref<16x22xf32, #tpu.memory_space<vmem>>, %arg2: memref<16x1xf32, #tpu.memory_space<vmem>>, %arg3: memref<88xf32, #tpu.memory_space<smem>>, %arg4: memref<4xf32, #tpu.memory_space<smem>>, %arg5: memref<4x176xf32, #tpu.memory_space<vmem>>, %arg6: memref<1xf32, #tpu.memory_space<smem>>, %arg7: memref<8x10xf32, #tpu.memory_space<vmem>>, %arg8: memref<2x17x128xf32, #tpu.memory_space<vmem>>, %arg9: memref<2x44x128xf32, #tpu.memory_space<vmem>>) attributes {dimension_semantics = [], scalar_prefetch = 0 : i64, scratch_operands = 2 : i64, tpu.core_type = #tpu.core_type<tc>} {
    %c0 = arith.constant 0 : index
    %c0_0 = arith.constant 0 : index
    %0 = vector.load %arg1[%c0, %c0_0] : memref<16x22xf32, #tpu.memory_space<vmem>>, vector<16x22xf32>
    %c0_1 = arith.constant 0 : index
    %c0_2 = arith.constant 0 : index
    %1 = vector.load %arg0[%c0_1, %c0_2] : memref<22x32xf32, #tpu.memory_space<vmem>>, vector<22x32xf32>
    %cst = arith.constant dense<0.000000e+00> : vector<16x32xf32>
    %2 = tpu.matmul %0, %1, %cst {dimension_numbers = #tpu.dot_dimension_numbers<[1], [0], [0], [1], [0, 0, 1, 1], [], []>} : vector<16x22xf32>, vector<22x32xf32>, vector<16x32xf32> -> vector<16x32xf32>
    %c0_3 = arith.constant 0 : index
    %c0_4 = arith.constant 0 : index
    %3 = vector.load %arg2[%c0_3, %c0_4] : memref<16x1xf32, #tpu.memory_space<vmem>>, vector<16x1xf32>
    %4 = vector.broadcast %3 : vector<16x1xf32> to vector<16x32xf32>
    %5 = arith.addf %2, %4 : vector<16x32xf32>
    %cst_5 = arith.constant 0.000000e+00 : f32
    %6 = vector.broadcast %cst_5 : f32 to vector<16x32xf32>
    %7 = arith.cmpf ogt, %5, %6 : vector<16x32xf32>
    %cst_6 = arith.constant 0.000000e+00 : f32
    %8 = vector.broadcast %cst_6 : f32 to vector<16x32xf32>
    %9 = arith.minimumf %5, %8 : vector<16x32xf32>
    %10 = math.exp %9 : vector<16x32xf32>
    %cst_7 = arith.constant 1.000000e+00 : f32
    %11 = vector.broadcast %cst_7 : f32 to vector<16x32xf32>
    %12 = arith.subf %10, %11 : vector<16x32xf32>
    %13 = arith.select %7, %5, %12 : vector<16x32xi1>, vector<16x32xf32>
    %cst_8 = arith.constant dense<0.000000e+00> : vector<16xf32>
    %14 = vector.multi_reduction <add>, %13, %cst_8 [1] : vector<16x32xf32> to vector<16xf32>
    %15 = vector.shape_cast %14 : vector<16xf32> to vector<16x1xf32>
    %cst_9 = arith.constant 3.125000e-02 : f32
    %16 = vector.broadcast %cst_9 : f32 to vector<16x1xf32>
    %17 = arith.mulf %15, %16 : vector<16x1xf32>
    %18 = vector.broadcast %17 : vector<16x1xf32> to vector<16x32xf32>
    %19 = arith.subf %13, %18 : vector<16x32xf32>
    %20 = arith.mulf %19, %19 : vector<16x32xf32>
    %cst_10 = arith.constant dense<0.000000e+00> : vector<16xf32>
    %21 = vector.multi_reduction <add>, %20, %cst_10 [1] : vector<16x32xf32> to vector<16xf32>
    %22 = vector.shape_cast %21 : vector<16xf32> to vector<16x1xf32>
    %cst_11 = arith.constant 3.125000e-02 : f32
    %23 = vector.broadcast %cst_11 : f32 to vector<16x1xf32>
    %24 = arith.mulf %22, %23 : vector<16x1xf32>
    %25 = math.rsqrt %24 : vector<16x1xf32>
    %26 = vector.broadcast %25 : vector<16x1xf32> to vector<16x32xf32>
    %27 = arith.mulf %19, %26 : vector<16x32xf32>
    %cst_12 = arith.constant 0.000000e+00 : f32
    %28 = vector.broadcast %cst_12 : f32 to vector<2x17x16xf32>
    %c0_13 = arith.constant 0 : index
    %c0_14 = arith.constant 0 : index
    %c0_15 = arith.constant 0 : index
    %29 = vector.load %arg8[%c0_13, %c0_14, %c0_15] : memref<2x17x128xf32, #tpu.memory_space<vmem>>, vector<2x17x16xf32>
    tpu.vector_store %arg8[%c0_13, %c0_14, %c0_15], %28 {strides = array<i32>} : memref<2x17x128xf32, #tpu.memory_space<vmem>>, vector<2x17x16xf32>,
    %cst_16 = arith.constant 0.000000e+00 : f32
    %30 = vector.broadcast %cst_16 : f32 to vector<2x17x96xf32>
    %c0_17 = arith.constant 0 : index
    %c0_18 = arith.constant 0 : index
    %c32 = arith.constant 32 : index
    %31 = vector.load %arg8[%c0_17, %c0_18, %c32] : memref<2x17x128xf32, #tpu.memory_space<vmem>>, vector<2x17x96xf32>
    tpu.vector_store %arg8[%c0_17, %c0_18, %c32], %30 {strides = array<i32>} : memref<2x17x128xf32, #tpu.memory_space<vmem>>, vector<2x17x96xf32>,
    %cst_19 = arith.constant 0.000000e+00 : f32
    %32 = vector.broadcast %cst_19 : f32 to vector<2x1x16xf32>
    %c0_20 = arith.constant 0 : index
    %c16 = arith.constant 16 : index
    %c16_21 = arith.constant 16 : index
    %33 = vector.load %arg8[%c0_20, %c16, %c16_21] : memref<2x17x128xf32, #tpu.memory_space<vmem>>, vector<2x1x16xf32>
    tpu.vector_store %arg8[%c0_20, %c16, %c16_21], %32 {strides = array<i32>} : memref<2x17x128xf32, #tpu.memory_space<vmem>>, vector<2x1x16xf32>,
    %34 = vector.extract_strided_slice %27 {offsets = [0, 0], sizes = [16, 16], strides = [1, 1]} : vector<16x32xf32> to vector<16x16xf32>
    %35 = vector.extract_strided_slice %27 {offsets = [0, 16], sizes = [16, 16], strides = [1, 1]} : vector<16x32xf32> to vector<16x16xf32>
    %36 = vector.shape_cast %34 : vector<16x16xf32> to vector<1x16x16xf32>
    %37 = vector.shape_cast %35 : vector<16x16xf32> to vector<1x16x16xf32>
    %38 = tpu.concatenate %36, %37 in 0 : vector<1x16x16xf32>, vector<1x16x16xf32> -> vector<2x16x16xf32>
    %c0_22 = arith.constant 0 : index
    %c0_23 = arith.constant 0 : index
    %c16_24 = arith.constant 16 : index
    %39 = vector.load %arg8[%c0_22, %c0_23, %c16_24] : memref<2x17x128xf32, #tpu.memory_space<vmem>>, vector<2x16x16xf32>
    tpu.vector_store %arg8[%c0_22, %c0_23, %c16_24], %38 {strides = array<i32>} : memref<2x17x128xf32, #tpu.memory_space<vmem>>, vector<2x16x16xf32>,
    %cst_25 = arith.constant 0.000000e+00 : f32
    %40 = vector.broadcast %cst_25 : f32 to vector<2x16x39xf32>
    %c0_26 = arith.constant 0 : index
    %41 = memref.load %arg4[%c0_26] : memref<4xf32, #tpu.memory_space<smem>>
    %42 = vector.broadcast %41 : f32 to vector<2x16x39xf32>
    %43 = arith.addf %40, %42 : vector<2x16x39xf32>
    %cst_27 = arith.constant 0.000000e+00 : f32
    %44 = vector.broadcast %cst_27 : f32 to vector<2x16x39xf32>
    %c1 = arith.constant 1 : index
    %45 = memref.load %arg4[%c1] : memref<4xf32, #tpu.memory_space<smem>>
    %46 = vector.broadcast %45 : f32 to vector<2x16x39xf32>
    %47 = arith.addf %44, %46 : vector<2x16x39xf32>
    %cst_28 = arith.constant 0.000000e+00 : f32
    %48 = vector.broadcast %cst_28 : f32 to vector<2x16x39xf32>
    %c2 = arith.constant 2 : index
    %49 = memref.load %arg4[%c2] : memref<4xf32, #tpu.memory_space<smem>>
    %50 = vector.broadcast %49 : f32 to vector<2x16x39xf32>
    %51 = arith.addf %48, %50 : vector<2x16x39xf32>
    %cst_29 = arith.constant 0.000000e+00 : f32
    %52 = vector.broadcast %cst_29 : f32 to vector<2x16x39xf32>
    %c3 = arith.constant 3 : index
    %53 = memref.load %arg4[%c3] : memref<4xf32, #tpu.memory_space<smem>>
    %54 = vector.broadcast %53 : f32 to vector<2x16x39xf32>
    %55 = arith.addf %52, %54 : vector<2x16x39xf32>
    %c0_30 = arith.constant 0 : index
    %c0_31 = arith.constant 0 : index
    %c0_32 = arith.constant 0 : index
    %56 = vector.load %arg8[%c0_30, %c0_31, %c0_32] : memref<2x17x128xf32, #tpu.memory_space<vmem>>, vector<2x16x128xf32>
    %57 = vector.extract_strided_slice %56 {offsets = [0, 0, 0], sizes = [2, 16, 39], strides = [1, 1, 1]} : vector<2x16x128xf32> to vector<2x16x39xf32>
    %c0_33 = arith.constant 0 : index
    %58 = memref.load %arg3[%c0_33] : memref<88xf32, #tpu.memory_space<smem>>
    %59 = vector.broadcast %58 : f32 to vector<2x16x39xf32>
    %60 = arith.mulf %59, %57 : vector<2x16x39xf32>
    %61 = arith.addf %43, %60 : vector<2x16x39xf32>
    %c22 = arith.constant 22 : index
    %62 = memref.load %arg3[%c22] : memref<88xf32, #tpu.memory_space<smem>>
    %63 = vector.broadcast %62 : f32 to vector<2x16x39xf32>
    %64 = arith.mulf %63, %57 : vector<2x16x39xf32>
    %65 = arith.addf %47, %64 : vector<2x16x39xf32>
    %c44 = arith.constant 44 : index
    %66 = memref.load %arg3[%c44] : memref<88xf32, #tpu.memory_space<smem>>
    %67 = vector.broadcast %66 : f32 to vector<2x16x39xf32>
    %68 = arith.mulf %67, %57 : vector<2x16x39xf32>
    %69 = arith.addf %51, %68 : vector<2x16x39xf32>
    %c66 = arith.constant 66 : index
    %70 = memref.load %arg3[%c66] : memref<88xf32, #tpu.memory_space<smem>>
    %71 = vector.broadcast %70 : f32 to vector<2x16x39xf32>
    %72 = arith.mulf %71, %57 : vector<2x16x39xf32>
    %73 = arith.addf %55, %72 : vector<2x16x39xf32>
    %74 = vector.extract_strided_slice %56 {offsets = [0, 0, 1], sizes = [2, 16, 39], strides = [1, 1, 1]} : vector<2x16x128xf32> to vector<2x16x39xf32>
    %c1_34 = arith.constant 1 : index
    %75 = memref.load %arg3[%c1_34] : memref<88xf32, #tpu.memory_space<smem>>
    %76 = vector.broadcast %75 : f32 to vector<2x16x39xf32>
    %77 = arith.mulf %76, %74 : vector<2x16x39xf32>
    %78 = arith.addf %61, %77 : vector<2x16x39xf32>
    %c23 = arith.constant 23 : index
    %79 = memref.load %arg3[%c23] : memref<88xf32, #tpu.memory_space<smem>>
    %80 = vector.broadcast %79 : f32 to vector<2x16x39xf32>
    %81 = arith.mulf %80, %74 : vector<2x16x39xf32>
    %82 = arith.addf %65, %81 : vector<2x16x39xf32>
    %c45 = arith.constant 45 : index
    %83 = memref.load %arg3[%c45] : memref<88xf32, #tpu.memory_space<smem>>
    %84 = vector.broadcast %83 : f32 to vector<2x16x39xf32>
    %85 = arith.mulf %84, %74 : vector<2x16x39xf32>
    %86 = arith.addf %69, %85 : vector<2x16x39xf32>
    %c67 = arith.constant 67 : index
    %87 = memref.load %arg3[%c67] : memref<88xf32, #tpu.memory_space<smem>>
    %88 = vector.broadcast %87 : f32 to vector<2x16x39xf32>
    %89 = arith.mulf %88, %74 : vector<2x16x39xf32>
    %90 = arith.addf %73, %89 : vector<2x16x39xf32>
    %91 = vector.extract_strided_slice %56 {offsets = [0, 0, 2], sizes = [2, 16, 39], strides = [1, 1, 1]} : vector<2x16x128xf32> to vector<2x16x39xf32>
    %c2_35 = arith.constant 2 : index
    %92 = memref.load %arg3[%c2_35] : memref<88xf32, #tpu.memory_space<smem>>
    %93 = vector.broadcast %92 : f32 to vector<2x16x39xf32>
    %94 = arith.mulf %93, %91 : vector<2x16x39xf32>
    %95 = arith.addf %78, %94 : vector<2x16x39xf32>
    %c24 = arith.constant 24 : index
    %96 = memref.load %arg3[%c24] : memref<88xf32, #tpu.memory_space<smem>>
    %97 = vector.broadcast %96 : f32 to vector<2x16x39xf32>
    %98 = arith.mulf %97, %91 : vector<2x16x39xf32>
    %99 = arith.addf %82, %98 : vector<2x16x39xf32>
    %c46 = arith.constant 46 : index
    %100 = memref.load %arg3[%c46] : memref<88xf32, #tpu.memory_space<smem>>
    %101 = vector.broadcast %100 : f32 to vector<2x16x39xf32>
    %102 = arith.mulf %101, %91 : vector<2x16x39xf32>
    %103 = arith.addf %86, %102 : vector<2x16x39xf32>
    %c68 = arith.constant 68 : index
    %104 = memref.load %arg3[%c68] : memref<88xf32, #tpu.memory_space<smem>>
    %105 = vector.broadcast %104 : f32 to vector<2x16x39xf32>
    %106 = arith.mulf %105, %91 : vector<2x16x39xf32>
    %107 = arith.addf %90, %106 : vector<2x16x39xf32>
    %108 = vector.extract_strided_slice %56 {offsets = [0, 0, 3], sizes = [2, 16, 39], strides = [1, 1, 1]} : vector<2x16x128xf32> to vector<2x16x39xf32>
    %c3_36 = arith.constant 3 : index
    %109 = memref.load %arg3[%c3_36] : memref<88xf32, #tpu.memory_space<smem>>
    %110 = vector.broadcast %109 : f32 to vector<2x16x39xf32>
    %111 = arith.mulf %110, %108 : vector<2x16x39xf32>
    %112 = arith.addf %95, %111 : vector<2x16x39xf32>
    %c25 = arith.constant 25 : index
    %113 = memref.load %arg3[%c25] : memref<88xf32, #tpu.memory_space<smem>>
    %114 = vector.broadcast %113 : f32 to vector<2x16x39xf32>
    %115 = arith.mulf %114, %108 : vector<2x16x39xf32>
    %116 = arith.addf %99, %115 : vector<2x16x39xf32>
    %c47 = arith.constant 47 : index
    %117 = memref.load %arg3[%c47] : memref<88xf32, #tpu.memory_space<smem>>
    %118 = vector.broadcast %117 : f32 to vector<2x16x39xf32>
    %119 = arith.mulf %118, %108 : vector<2x16x39xf32>
    %120 = arith.addf %103, %119 : vector<2x16x39xf32>
    %c69 = arith.constant 69 : index
    %121 = memref.load %arg3[%c69] : memref<88xf32, #tpu.memory_space<smem>>
    %122 = vector.broadcast %121 : f32 to vector<2x16x39xf32>
    %123 = arith.mulf %122, %108 : vector<2x16x39xf32>
    %124 = arith.addf %107, %123 : vector<2x16x39xf32>
    %125 = vector.extract_strided_slice %56 {offsets = [0, 0, 4], sizes = [2, 16, 39], strides = [1, 1, 1]} : vector<2x16x128xf32> to vector<2x16x39xf32>
    %c4 = arith.constant 4 : index
    %126 = memref.load %arg3[%c4] : memref<88xf32, #tpu.memory_space<smem>>
    %127 = vector.broadcast %126 : f32 to vector<2x16x39xf32>
    %128 = arith.mulf %127, %125 : vector<2x16x39xf32>
    %129 = arith.addf %112, %128 : vector<2x16x39xf32>
    %c26 = arith.constant 26 : index
    %130 = memref.load %arg3[%c26] : memref<88xf32, #tpu.memory_space<smem>>
    %131 = vector.broadcast %130 : f32 to vector<2x16x39xf32>
    %132 = arith.mulf %131, %125 : vector<2x16x39xf32>
    %133 = arith.addf %116, %132 : vector<2x16x39xf32>
    %c48 = arith.constant 48 : index
    %134 = memref.load %arg3[%c48] : memref<88xf32, #tpu.memory_space<smem>>
    %135 = vector.broadcast %134 : f32 to vector<2x16x39xf32>
    %136 = arith.mulf %135, %125 : vector<2x16x39xf32>
    %137 = arith.addf %120, %136 : vector<2x16x39xf32>
    %c70 = arith.constant 70 : index
    %138 = memref.load %arg3[%c70] : memref<88xf32, #tpu.memory_space<smem>>
    %139 = vector.broadcast %138 : f32 to vector<2x16x39xf32>
    %140 = arith.mulf %139, %125 : vector<2x16x39xf32>
    %141 = arith.addf %124, %140 : vector<2x16x39xf32>
    %142 = vector.extract_strided_slice %56 {offsets = [0, 0, 5], sizes = [2, 16, 39], strides = [1, 1, 1]} : vector<2x16x128xf32> to vector<2x16x39xf32>
    %c5 = arith.constant 5 : index
    %143 = memref.load %arg3[%c5] : memref<88xf32, #tpu.memory_space<smem>>
    %144 = vector.broadcast %143 : f32 to vector<2x16x39xf32>
    %145 = arith.mulf %144, %142 : vector<2x16x39xf32>
    %146 = arith.addf %129, %145 : vector<2x16x39xf32>
    %c27 = arith.constant 27 : index
    %147 = memref.load %arg3[%c27] : memref<88xf32, #tpu.memory_space<smem>>
    %148 = vector.broadcast %147 : f32 to vector<2x16x39xf32>
    %149 = arith.mulf %148, %142 : vector<2x16x39xf32>
    %150 = arith.addf %133, %149 : vector<2x16x39xf32>
    %c49 = arith.constant 49 : index
    %151 = memref.load %arg3[%c49] : memref<88xf32, #tpu.memory_space<smem>>
    %152 = vector.broadcast %151 : f32 to vector<2x16x39xf32>
    %153 = arith.mulf %152, %142 : vector<2x16x39xf32>
    %154 = arith.addf %137, %153 : vector<2x16x39xf32>
    %c71 = arith.constant 71 : index
    %155 = memref.load %arg3[%c71] : memref<88xf32, #tpu.memory_space<smem>>
    %156 = vector.broadcast %155 : f32 to vector<2x16x39xf32>
    %157 = arith.mulf %156, %142 : vector<2x16x39xf32>
    %158 = arith.addf %141, %157 : vector<2x16x39xf32>
    %159 = vector.extract_strided_slice %56 {offsets = [0, 0, 6], sizes = [2, 16, 39], strides = [1, 1, 1]} : vector<2x16x128xf32> to vector<2x16x39xf32>
    %c6 = arith.constant 6 : index
    %160 = memref.load %arg3[%c6] : memref<88xf32, #tpu.memory_space<smem>>
    %161 = vector.broadcast %160 : f32 to vector<2x16x39xf32>
    %162 = arith.mulf %161, %159 : vector<2x16x39xf32>
    %163 = arith.addf %146, %162 : vector<2x16x39xf32>
    %c28 = arith.constant 28 : index
    %164 = memref.load %arg3[%c28] : memref<88xf32, #tpu.memory_space<smem>>
    %165 = vector.broadcast %164 : f32 to vector<2x16x39xf32>
    %166 = arith.mulf %165, %159 : vector<2x16x39xf32>
    %167 = arith.addf %150, %166 : vector<2x16x39xf32>
    %c50 = arith.constant 50 : index
    %168 = memref.load %arg3[%c50] : memref<88xf32, #tpu.memory_space<smem>>
    %169 = vector.broadcast %168 : f32 to vector<2x16x39xf32>
    %170 = arith.mulf %169, %159 : vector<2x16x39xf32>
    %171 = arith.addf %154, %170 : vector<2x16x39xf32>
    %c72 = arith.constant 72 : index
    %172 = memref.load %arg3[%c72] : memref<88xf32, #tpu.memory_space<smem>>
    %173 = vector.broadcast %172 : f32 to vector<2x16x39xf32>
    %174 = arith.mulf %173, %159 : vector<2x16x39xf32>
    %175 = arith.addf %158, %174 : vector<2x16x39xf32>
    %176 = vector.extract_strided_slice %56 {offsets = [0, 0, 7], sizes = [2, 16, 39], strides = [1, 1, 1]} : vector<2x16x128xf32> to vector<2x16x39xf32>
    %c7 = arith.constant 7 : index
    %177 = memref.load %arg3[%c7] : memref<88xf32, #tpu.memory_space<smem>>
    %178 = vector.broadcast %177 : f32 to vector<2x16x39xf32>
    %179 = arith.mulf %178, %176 : vector<2x16x39xf32>
    %180 = arith.addf %163, %179 : vector<2x16x39xf32>
    %c29 = arith.constant 29 : index
    %181 = memref.load %arg3[%c29] : memref<88xf32, #tpu.memory_space<smem>>
    %182 = vector.broadcast %181 : f32 to vector<2x16x39xf32>
    %183 = arith.mulf %182, %176 : vector<2x16x39xf32>
    %184 = arith.addf %167, %183 : vector<2x16x39xf32>
    %c51 = arith.constant 51 : index
    %185 = memref.load %arg3[%c51] : memref<88xf32, #tpu.memory_space<smem>>
    %186 = vector.broadcast %185 : f32 to vector<2x16x39xf32>
    %187 = arith.mulf %186, %176 : vector<2x16x39xf32>
    %188 = arith.addf %171, %187 : vector<2x16x39xf32>
    %c73 = arith.constant 73 : index
    %189 = memref.load %arg3[%c73] : memref<88xf32, #tpu.memory_space<smem>>
    %190 = vector.broadcast %189 : f32 to vector<2x16x39xf32>
    %191 = arith.mulf %190, %176 : vector<2x16x39xf32>
    %192 = arith.addf %175, %191 : vector<2x16x39xf32>
    %193 = vector.extract_strided_slice %56 {offsets = [0, 0, 8], sizes = [2, 16, 39], strides = [1, 1, 1]} : vector<2x16x128xf32> to vector<2x16x39xf32>
    %c8 = arith.constant 8 : index
    %194 = memref.load %arg3[%c8] : memref<88xf32, #tpu.memory_space<smem>>
    %195 = vector.broadcast %194 : f32 to vector<2x16x39xf32>
    %196 = arith.mulf %195, %193 : vector<2x16x39xf32>
    %197 = arith.addf %180, %196 : vector<2x16x39xf32>
    %c30 = arith.constant 30 : index
    %198 = memref.load %arg3[%c30] : memref<88xf32, #tpu.memory_space<smem>>
    %199 = vector.broadcast %198 : f32 to vector<2x16x39xf32>
    %200 = arith.mulf %199, %193 : vector<2x16x39xf32>
    %201 = arith.addf %184, %200 : vector<2x16x39xf32>
    %c52 = arith.constant 52 : index
    %202 = memref.load %arg3[%c52] : memref<88xf32, #tpu.memory_space<smem>>
    %203 = vector.broadcast %202 : f32 to vector<2x16x39xf32>
    %204 = arith.mulf %203, %193 : vector<2x16x39xf32>
    %205 = arith.addf %188, %204 : vector<2x16x39xf32>
    %c74 = arith.constant 74 : index
    %206 = memref.load %arg3[%c74] : memref<88xf32, #tpu.memory_space<smem>>
    %207 = vector.broadcast %206 : f32 to vector<2x16x39xf32>
    %208 = arith.mulf %207, %193 : vector<2x16x39xf32>
    %209 = arith.addf %192, %208 : vector<2x16x39xf32>
    %210 = vector.extract_strided_slice %56 {offsets = [0, 0, 9], sizes = [2, 16, 39], strides = [1, 1, 1]} : vector<2x16x128xf32> to vector<2x16x39xf32>
    %c9 = arith.constant 9 : index
    %211 = memref.load %arg3[%c9] : memref<88xf32, #tpu.memory_space<smem>>
    %212 = vector.broadcast %211 : f32 to vector<2x16x39xf32>
    %213 = arith.mulf %212, %210 : vector<2x16x39xf32>
    %214 = arith.addf %197, %213 : vector<2x16x39xf32>
    %c31 = arith.constant 31 : index
    %215 = memref.load %arg3[%c31] : memref<88xf32, #tpu.memory_space<smem>>
    %216 = vector.broadcast %215 : f32 to vector<2x16x39xf32>
    %217 = arith.mulf %216, %210 : vector<2x16x39xf32>
    %218 = arith.addf %201, %217 : vector<2x16x39xf32>
    %c53 = arith.constant 53 : index
    %219 = memref.load %arg3[%c53] : memref<88xf32, #tpu.memory_space<smem>>
    %220 = vector.broadcast %219 : f32 to vector<2x16x39xf32>
    %221 = arith.mulf %220, %210 : vector<2x16x39xf32>
    %222 = arith.addf %205, %221 : vector<2x16x39xf32>
    %c75 = arith.constant 75 : index
    %223 = memref.load %arg3[%c75] : memref<88xf32, #tpu.memory_space<smem>>
    %224 = vector.broadcast %223 : f32 to vector<2x16x39xf32>
    %225 = arith.mulf %224, %210 : vector<2x16x39xf32>
    %226 = arith.addf %209, %225 : vector<2x16x39xf32>
    %227 = vector.extract_strided_slice %56 {offsets = [0, 0, 10], sizes = [2, 16, 39], strides = [1, 1, 1]} : vector<2x16x128xf32> to vector<2x16x39xf32>
    %c10 = arith.constant 10 : index
    %228 = memref.load %arg3[%c10] : memref<88xf32, #tpu.memory_space<smem>>
    %229 = vector.broadcast %228 : f32 to vector<2x16x39xf32>
    %230 = arith.mulf %229, %227 : vector<2x16x39xf32>
    %231 = arith.addf %214, %230 : vector<2x16x39xf32>
    %c32_37 = arith.constant 32 : index
    %232 = memref.load %arg3[%c32_37] : memref<88xf32, #tpu.memory_space<smem>>
    %233 = vector.broadcast %232 : f32 to vector<2x16x39xf32>
    %234 = arith.mulf %233, %227 : vector<2x16x39xf32>
    %235 = arith.addf %218, %234 : vector<2x16x39xf32>
    %c54 = arith.constant 54 : index
    %236 = memref.load %arg3[%c54] : memref<88xf32, #tpu.memory_space<smem>>
    %237 = vector.broadcast %236 : f32 to vector<2x16x39xf32>
    %238 = arith.mulf %237, %227 : vector<2x16x39xf32>
    %239 = arith.addf %222, %238 : vector<2x16x39xf32>
    %c76 = arith.constant 76 : index
    %240 = memref.load %arg3[%c76] : memref<88xf32, #tpu.memory_space<smem>>
    %241 = vector.broadcast %240 : f32 to vector<2x16x39xf32>
    %242 = arith.mulf %241, %227 : vector<2x16x39xf32>
    %243 = arith.addf %226, %242 : vector<2x16x39xf32>
    %c0_38 = arith.constant 0 : index
    %c1_39 = arith.constant 1 : index
    %c0_40 = arith.constant 0 : index
    %244 = vector.load %arg8[%c0_38, %c1_39, %c0_40] : memref<2x17x128xf32, #tpu.memory_space<vmem>>, vector<2x16x128xf32>
    %245 = vector.extract_strided_slice %244 {offsets = [0, 0, 0], sizes = [2, 16, 39], strides = [1, 1, 1]} : vector<2x16x128xf32> to vector<2x16x39xf32>
    %c11 = arith.constant 11 : index
    %246 = memref.load %arg3[%c11] : memref<88xf32, #tpu.memory_space<smem>>
    %247 = vector.broadcast %246 : f32 to vector<2x16x39xf32>
    %248 = arith.mulf %247, %245 : vector<2x16x39xf32>
    %249 = arith.addf %231, %248 : vector<2x16x39xf32>
    %c33 = arith.constant 33 : index
    %250 = memref.load %arg3[%c33] : memref<88xf32, #tpu.memory_space<smem>>
    %251 = vector.broadcast %250 : f32 to vector<2x16x39xf32>
    %252 = arith.mulf %251, %245 : vector<2x16x39xf32>
    %253 = arith.addf %235, %252 : vector<2x16x39xf32>
    %c55 = arith.constant 55 : index
    %254 = memref.load %arg3[%c55] : memref<88xf32, #tpu.memory_space<smem>>
    %255 = vector.broadcast %254 : f32 to vector<2x16x39xf32>
    %256 = arith.mulf %255, %245 : vector<2x16x39xf32>
    %257 = arith.addf %239, %256 : vector<2x16x39xf32>
    %c77 = arith.constant 77 : index
    %258 = memref.load %arg3[%c77] : memref<88xf32, #tpu.memory_space<smem>>
    %259 = vector.broadcast %258 : f32 to vector<2x16x39xf32>
    %260 = arith.mulf %259, %245 : vector<2x16x39xf32>
    %261 = arith.addf %243, %260 : vector<2x16x39xf32>
    %262 = vector.extract_strided_slice %244 {offsets = [0, 0, 1], sizes = [2, 16, 39], strides = [1, 1, 1]} : vector<2x16x128xf32> to vector<2x16x39xf32>
    %c12 = arith.constant 12 : index
    %263 = memref.load %arg3[%c12] : memref<88xf32, #tpu.memory_space<smem>>
    %264 = vector.broadcast %263 : f32 to vector<2x16x39xf32>
    %265 = arith.mulf %264, %262 : vector<2x16x39xf32>
    %266 = arith.addf %249, %265 : vector<2x16x39xf32>
    %c34 = arith.constant 34 : index
    %267 = memref.load %arg3[%c34] : memref<88xf32, #tpu.memory_space<smem>>
    %268 = vector.broadcast %267 : f32 to vector<2x16x39xf32>
    %269 = arith.mulf %268, %262 : vector<2x16x39xf32>
    %270 = arith.addf %253, %269 : vector<2x16x39xf32>
    %c56 = arith.constant 56 : index
    %271 = memref.load %arg3[%c56] : memref<88xf32, #tpu.memory_space<smem>>
    %272 = vector.broadcast %271 : f32 to vector<2x16x39xf32>
    %273 = arith.mulf %272, %262 : vector<2x16x39xf32>
    %274 = arith.addf %257, %273 : vector<2x16x39xf32>
    %c78 = arith.constant 78 : index
    %275 = memref.load %arg3[%c78] : memref<88xf32, #tpu.memory_space<smem>>
    %276 = vector.broadcast %275 : f32 to vector<2x16x39xf32>
    %277 = arith.mulf %276, %262 : vector<2x16x39xf32>
    %278 = arith.addf %261, %277 : vector<2x16x39xf32>
    %279 = vector.extract_strided_slice %244 {offsets = [0, 0, 2], sizes = [2, 16, 39], strides = [1, 1, 1]} : vector<2x16x128xf32> to vector<2x16x39xf32>
    %c13 = arith.constant 13 : index
    %280 = memref.load %arg3[%c13] : memref<88xf32, #tpu.memory_space<smem>>
    %281 = vector.broadcast %280 : f32 to vector<2x16x39xf32>
    %282 = arith.mulf %281, %279 : vector<2x16x39xf32>
    %283 = arith.addf %266, %282 : vector<2x16x39xf32>
    %c35 = arith.constant 35 : index
    %284 = memref.load %arg3[%c35] : memref<88xf32, #tpu.memory_space<smem>>
    %285 = vector.broadcast %284 : f32 to vector<2x16x39xf32>
    %286 = arith.mulf %285, %279 : vector<2x16x39xf32>
    %287 = arith.addf %270, %286 : vector<2x16x39xf32>
    %c57 = arith.constant 57 : index
    %288 = memref.load %arg3[%c57] : memref<88xf32, #tpu.memory_space<smem>>
    %289 = vector.broadcast %288 : f32 to vector<2x16x39xf32>
    %290 = arith.mulf %289, %279 : vector<2x16x39xf32>
    %291 = arith.addf %274, %290 : vector<2x16x39xf32>
    %c79 = arith.constant 79 : index
    %292 = memref.load %arg3[%c79] : memref<88xf32, #tpu.memory_space<smem>>
    %293 = vector.broadcast %292 : f32 to vector<2x16x39xf32>
    %294 = arith.mulf %293, %279 : vector<2x16x39xf32>
    %295 = arith.addf %278, %294 : vector<2x16x39xf32>
    %296 = vector.extract_strided_slice %244 {offsets = [0, 0, 3], sizes = [2, 16, 39], strides = [1, 1, 1]} : vector<2x16x128xf32> to vector<2x16x39xf32>
    %c14 = arith.constant 14 : index
    %297 = memref.load %arg3[%c14] : memref<88xf32, #tpu.memory_space<smem>>
    %298 = vector.broadcast %297 : f32 to vector<2x16x39xf32>
    %299 = arith.mulf %298, %296 : vector<2x16x39xf32>
    %300 = arith.addf %283, %299 : vector<2x16x39xf32>
    %c36 = arith.constant 36 : index
    %301 = memref.load %arg3[%c36] : memref<88xf32, #tpu.memory_space<smem>>
    %302 = vector.broadcast %301 : f32 to vector<2x16x39xf32>
    %303 = arith.mulf %302, %296 : vector<2x16x39xf32>
    %304 = arith.addf %287, %303 : vector<2x16x39xf32>
    %c58 = arith.constant 58 : index
    %305 = memref.load %arg3[%c58] : memref<88xf32, #tpu.memory_space<smem>>
    %306 = vector.broadcast %305 : f32 to vector<2x16x39xf32>
    %307 = arith.mulf %306, %296 : vector<2x16x39xf32>
    %308 = arith.addf %291, %307 : vector<2x16x39xf32>
    %c80 = arith.constant 80 : index
    %309 = memref.load %arg3[%c80] : memref<88xf32, #tpu.memory_space<smem>>
    %310 = vector.broadcast %309 : f32 to vector<2x16x39xf32>
    %311 = arith.mulf %310, %296 : vector<2x16x39xf32>
    %312 = arith.addf %295, %311 : vector<2x16x39xf32>
    %313 = vector.extract_strided_slice %244 {offsets = [0, 0, 4], sizes = [2, 16, 39], strides = [1, 1, 1]} : vector<2x16x128xf32> to vector<2x16x39xf32>
    %c15 = arith.constant 15 : index
    %314 = memref.load %arg3[%c15] : memref<88xf32, #tpu.memory_space<smem>>
    %315 = vector.broadcast %314 : f32 to vector<2x16x39xf32>
    %316 = arith.mulf %315, %313 : vector<2x16x39xf32>
    %317 = arith.addf %300, %316 : vector<2x16x39xf32>
    %c37 = arith.constant 37 : index
    %318 = memref.load %arg3[%c37] : memref<88xf32, #tpu.memory_space<smem>>
    %319 = vector.broadcast %318 : f32 to vector<2x16x39xf32>
    %320 = arith.mulf %319, %313 : vector<2x16x39xf32>
    %321 = arith.addf %304, %320 : vector<2x16x39xf32>
    %c59 = arith.constant 59 : index
    %322 = memref.load %arg3[%c59] : memref<88xf32, #tpu.memory_space<smem>>
    %323 = vector.broadcast %322 : f32 to vector<2x16x39xf32>
    %324 = arith.mulf %323, %313 : vector<2x16x39xf32>
    %325 = arith.addf %308, %324 : vector<2x16x39xf32>
    %c81 = arith.constant 81 : index
    %326 = memref.load %arg3[%c81] : memref<88xf32, #tpu.memory_space<smem>>
    %327 = vector.broadcast %326 : f32 to vector<2x16x39xf32>
    %328 = arith.mulf %327, %313 : vector<2x16x39xf32>
    %329 = arith.addf %312, %328 : vector<2x16x39xf32>
    %330 = vector.extract_strided_slice %244 {offsets = [0, 0, 5], sizes = [2, 16, 39], strides = [1, 1, 1]} : vector<2x16x128xf32> to vector<2x16x39xf32>
    %c16_41 = arith.constant 16 : index
    %331 = memref.load %arg3[%c16_41] : memref<88xf32, #tpu.memory_space<smem>>
    %332 = vector.broadcast %331 : f32 to vector<2x16x39xf32>
    %333 = arith.mulf %332, %330 : vector<2x16x39xf32>
    %334 = arith.addf %317, %333 : vector<2x16x39xf32>
    %c38 = arith.constant 38 : index
    %335 = memref.load %arg3[%c38] : memref<88xf32, #tpu.memory_space<smem>>
    %336 = vector.broadcast %335 : f32 to vector<2x16x39xf32>
    %337 = arith.mulf %336, %330 : vector<2x16x39xf32>
    %338 = arith.addf %321, %337 : vector<2x16x39xf32>
    %c60 = arith.constant 60 : index
    %339 = memref.load %arg3[%c60] : memref<88xf32, #tpu.memory_space<smem>>
    %340 = vector.broadcast %339 : f32 to vector<2x16x39xf32>
    %341 = arith.mulf %340, %330 : vector<2x16x39xf32>
    %342 = arith.addf %325, %341 : vector<2x16x39xf32>
    %c82 = arith.constant 82 : index
    %343 = memref.load %arg3[%c82] : memref<88xf32, #tpu.memory_space<smem>>
    %344 = vector.broadcast %343 : f32 to vector<2x16x39xf32>
    %345 = arith.mulf %344, %330 : vector<2x16x39xf32>
    %346 = arith.addf %329, %345 : vector<2x16x39xf32>
    %347 = vector.extract_strided_slice %244 {offsets = [0, 0, 6], sizes = [2, 16, 39], strides = [1, 1, 1]} : vector<2x16x128xf32> to vector<2x16x39xf32>
    %c17 = arith.constant 17 : index
    %348 = memref.load %arg3[%c17] : memref<88xf32, #tpu.memory_space<smem>>
    %349 = vector.broadcast %348 : f32 to vector<2x16x39xf32>
    %350 = arith.mulf %349, %347 : vector<2x16x39xf32>
    %351 = arith.addf %334, %350 : vector<2x16x39xf32>
    %c39 = arith.constant 39 : index
    %352 = memref.load %arg3[%c39] : memref<88xf32, #tpu.memory_space<smem>>
    %353 = vector.broadcast %352 : f32 to vector<2x16x39xf32>
    %354 = arith.mulf %353, %347 : vector<2x16x39xf32>
    %355 = arith.addf %338, %354 : vector<2x16x39xf32>
    %c61 = arith.constant 61 : index
    %356 = memref.load %arg3[%c61] : memref<88xf32, #tpu.memory_space<smem>>
    %357 = vector.broadcast %356 : f32 to vector<2x16x39xf32>
    %358 = arith.mulf %357, %347 : vector<2x16x39xf32>
    %359 = arith.addf %342, %358 : vector<2x16x39xf32>
    %c83 = arith.constant 83 : index
    %360 = memref.load %arg3[%c83] : memref<88xf32, #tpu.memory_space<smem>>
    %361 = vector.broadcast %360 : f32 to vector<2x16x39xf32>
    %362 = arith.mulf %361, %347 : vector<2x16x39xf32>
    %363 = arith.addf %346, %362 : vector<2x16x39xf32>
    %364 = vector.extract_strided_slice %244 {offsets = [0, 0, 7], sizes = [2, 16, 39], strides = [1, 1, 1]} : vector<2x16x128xf32> to vector<2x16x39xf32>
    %c18 = arith.constant 18 : index
    %365 = memref.load %arg3[%c18] : memref<88xf32, #tpu.memory_space<smem>>
    %366 = vector.broadcast %365 : f32 to vector<2x16x39xf32>
    %367 = arith.mulf %366, %364 : vector<2x16x39xf32>
    %368 = arith.addf %351, %367 : vector<2x16x39xf32>
    %c40 = arith.constant 40 : index
    %369 = memref.load %arg3[%c40] : memref<88xf32, #tpu.memory_space<smem>>
    %370 = vector.broadcast %369 : f32 to vector<2x16x39xf32>
    %371 = arith.mulf %370, %364 : vector<2x16x39xf32>
    %372 = arith.addf %355, %371 : vector<2x16x39xf32>
    %c62 = arith.constant 62 : index
    %373 = memref.load %arg3[%c62] : memref<88xf32, #tpu.memory_space<smem>>
    %374 = vector.broadcast %373 : f32 to vector<2x16x39xf32>
    %375 = arith.mulf %374, %364 : vector<2x16x39xf32>
    %376 = arith.addf %359, %375 : vector<2x16x39xf32>
    %c84 = arith.constant 84 : index
    %377 = memref.load %arg3[%c84] : memref<88xf32, #tpu.memory_space<smem>>
    %378 = vector.broadcast %377 : f32 to vector<2x16x39xf32>
    %379 = arith.mulf %378, %364 : vector<2x16x39xf32>
    %380 = arith.addf %363, %379 : vector<2x16x39xf32>
    %381 = vector.extract_strided_slice %244 {offsets = [0, 0, 8], sizes = [2, 16, 39], strides = [1, 1, 1]} : vector<2x16x128xf32> to vector<2x16x39xf32>
    %c19 = arith.constant 19 : index
    %382 = memref.load %arg3[%c19] : memref<88xf32, #tpu.memory_space<smem>>
    %383 = vector.broadcast %382 : f32 to vector<2x16x39xf32>
    %384 = arith.mulf %383, %381 : vector<2x16x39xf32>
    %385 = arith.addf %368, %384 : vector<2x16x39xf32>
    %c41 = arith.constant 41 : index
    %386 = memref.load %arg3[%c41] : memref<88xf32, #tpu.memory_space<smem>>
    %387 = vector.broadcast %386 : f32 to vector<2x16x39xf32>
    %388 = arith.mulf %387, %381 : vector<2x16x39xf32>
    %389 = arith.addf %372, %388 : vector<2x16x39xf32>
    %c63 = arith.constant 63 : index
    %390 = memref.load %arg3[%c63] : memref<88xf32, #tpu.memory_space<smem>>
    %391 = vector.broadcast %390 : f32 to vector<2x16x39xf32>
    %392 = arith.mulf %391, %381 : vector<2x16x39xf32>
    %393 = arith.addf %376, %392 : vector<2x16x39xf32>
    %c85 = arith.constant 85 : index
    %394 = memref.load %arg3[%c85] : memref<88xf32, #tpu.memory_space<smem>>
    %395 = vector.broadcast %394 : f32 to vector<2x16x39xf32>
    %396 = arith.mulf %395, %381 : vector<2x16x39xf32>
    %397 = arith.addf %380, %396 : vector<2x16x39xf32>
    %398 = vector.extract_strided_slice %244 {offsets = [0, 0, 9], sizes = [2, 16, 39], strides = [1, 1, 1]} : vector<2x16x128xf32> to vector<2x16x39xf32>
    %c20 = arith.constant 20 : index
    %399 = memref.load %arg3[%c20] : memref<88xf32, #tpu.memory_space<smem>>
    %400 = vector.broadcast %399 : f32 to vector<2x16x39xf32>
    %401 = arith.mulf %400, %398 : vector<2x16x39xf32>
    %402 = arith.addf %385, %401 : vector<2x16x39xf32>
    %c42 = arith.constant 42 : index
    %403 = memref.load %arg3[%c42] : memref<88xf32, #tpu.memory_space<smem>>
    %404 = vector.broadcast %403 : f32 to vector<2x16x39xf32>
    %405 = arith.mulf %404, %398 : vector<2x16x39xf32>
    %406 = arith.addf %389, %405 : vector<2x16x39xf32>
    %c64 = arith.constant 64 : index
    %407 = memref.load %arg3[%c64] : memref<88xf32, #tpu.memory_space<smem>>
    %408 = vector.broadcast %407 : f32 to vector<2x16x39xf32>
    %409 = arith.mulf %408, %398 : vector<2x16x39xf32>
    %410 = arith.addf %393, %409 : vector<2x16x39xf32>
    %c86 = arith.constant 86 : index
    %411 = memref.load %arg3[%c86] : memref<88xf32, #tpu.memory_space<smem>>
    %412 = vector.broadcast %411 : f32 to vector<2x16x39xf32>
    %413 = arith.mulf %412, %398 : vector<2x16x39xf32>
    %414 = arith.addf %397, %413 : vector<2x16x39xf32>
    %415 = vector.extract_strided_slice %244 {offsets = [0, 0, 10], sizes = [2, 16, 39], strides = [1, 1, 1]} : vector<2x16x128xf32> to vector<2x16x39xf32>
    %c21 = arith.constant 21 : index
    %416 = memref.load %arg3[%c21] : memref<88xf32, #tpu.memory_space<smem>>
    %417 = vector.broadcast %416 : f32 to vector<2x16x39xf32>
    %418 = arith.mulf %417, %415 : vector<2x16x39xf32>
    %419 = arith.addf %402, %418 : vector<2x16x39xf32>
    %c43 = arith.constant 43 : index
    %420 = memref.load %arg3[%c43] : memref<88xf32, #tpu.memory_space<smem>>
    %421 = vector.broadcast %420 : f32 to vector<2x16x39xf32>
    %422 = arith.mulf %421, %415 : vector<2x16x39xf32>
    %423 = arith.addf %406, %422 : vector<2x16x39xf32>
    %c65 = arith.constant 65 : index
    %424 = memref.load %arg3[%c65] : memref<88xf32, #tpu.memory_space<smem>>
    %425 = vector.broadcast %424 : f32 to vector<2x16x39xf32>
    %426 = arith.mulf %425, %415 : vector<2x16x39xf32>
    %427 = arith.addf %410, %426 : vector<2x16x39xf32>
    %c87 = arith.constant 87 : index
    %428 = memref.load %arg3[%c87] : memref<88xf32, #tpu.memory_space<smem>>
    %429 = vector.broadcast %428 : f32 to vector<2x16x39xf32>
    %430 = arith.mulf %429, %415 : vector<2x16x39xf32>
    %431 = arith.addf %414, %430 : vector<2x16x39xf32>
    %cst_42 = arith.constant 0.000000e+00 : f32
    %432 = vector.broadcast %cst_42 : f32 to vector<2x16x39xf32>
    %433 = arith.cmpf ogt, %419, %432 : vector<2x16x39xf32>
    %cst_43 = arith.constant 0.000000e+00 : f32
    %434 = vector.broadcast %cst_43 : f32 to vector<2x16x39xf32>
    %435 = arith.minimumf %419, %434 : vector<2x16x39xf32>
    %436 = math.exp %435 : vector<2x16x39xf32>
    %cst_44 = arith.constant 1.000000e+00 : f32
    %437 = vector.broadcast %cst_44 : f32 to vector<2x16x39xf32>
    %438 = arith.subf %436, %437 : vector<2x16x39xf32>
    %439 = arith.select %433, %419, %438 : vector<2x16x39xi1>, vector<2x16x39xf32>
    %440 = vector.shape_cast %439 : vector<2x16x39xf32> to vector<1x2x16x39xf32>
    %cst_45 = arith.constant dense<0.000000e+00> : vector<1xf32>
    %441 = vector.multi_reduction <add>, %440, %cst_45 [1, 2, 3] : vector<1x2x16x39xf32> to vector<1xf32>
    %442 = vector.shape_cast %441 : vector<1xf32> to vector<1x1x1x1xf32>
    %443 = vector.extract %442[0, 0, 0, 0] : f32 from vector<1x1x1x1xf32>
    %cst_46 = arith.constant 8.01282062E-4 : f32
    %444 = arith.mulf %443, %cst_46 : f32
    %445 = vector.broadcast %444 : f32 to vector<2x16x39xf32>
    %446 = arith.subf %439, %445 : vector<2x16x39xf32>
    %447 = arith.mulf %446, %446 : vector<2x16x39xf32>
    %448 = vector.shape_cast %447 : vector<2x16x39xf32> to vector<1x2x16x39xf32>
    %cst_47 = arith.constant dense<0.000000e+00> : vector<1xf32>
    %449 = vector.multi_reduction <add>, %448, %cst_47 [1, 2, 3] : vector<1x2x16x39xf32> to vector<1xf32>
    %450 = vector.shape_cast %449 : vector<1xf32> to vector<1x1x1x1xf32>
    %451 = vector.extract %450[0, 0, 0, 0] : f32 from vector<1x1x1x1xf32>
    %cst_48 = arith.constant 8.01282062E-4 : f32
    %452 = arith.mulf %451, %cst_48 : f32
    %453 = math.rsqrt %452 : f32
    %454 = vector.broadcast %453 : f32 to vector<2x16x39xf32>
    %455 = arith.mulf %446, %454 : vector<2x16x39xf32>
    %456 = vector.extract_strided_slice %455 {offsets = [0, 0, 0], sizes = [2, 1, 39], strides = [1, 1, 1]} : vector<2x16x39xf32> to vector<2x1x39xf32>
    %457 = vector.extract_strided_slice %455 {offsets = [0, 1, 0], sizes = [2, 1, 39], strides = [1, 1, 1]} : vector<2x16x39xf32> to vector<2x1x39xf32>
    %458 = arith.maximumf %456, %457 : vector<2x1x39xf32>
    %459 = vector.extract_strided_slice %455 {offsets = [0, 4, 0], sizes = [2, 1, 39], strides = [1, 1, 1]} : vector<2x16x39xf32> to vector<2x1x39xf32>
    %460 = vector.extract_strided_slice %455 {offsets = [0, 5, 0], sizes = [2, 1, 39], strides = [1, 1, 1]} : vector<2x16x39xf32> to vector<2x1x39xf32>
    %461 = arith.maximumf %459, %460 : vector<2x1x39xf32>
    %462 = vector.extract_strided_slice %455 {offsets = [0, 8, 0], sizes = [2, 1, 39], strides = [1, 1, 1]} : vector<2x16x39xf32> to vector<2x1x39xf32>
    %463 = vector.extract_strided_slice %455 {offsets = [0, 9, 0], sizes = [2, 1, 39], strides = [1, 1, 1]} : vector<2x16x39xf32> to vector<2x1x39xf32>
    %464 = arith.maximumf %462, %463 : vector<2x1x39xf32>
    %465 = vector.extract_strided_slice %455 {offsets = [0, 12, 0], sizes = [2, 1, 39], strides = [1, 1, 1]} : vector<2x16x39xf32> to vector<2x1x39xf32>
    %466 = vector.extract_strided_slice %455 {offsets = [0, 13, 0], sizes = [2, 1, 39], strides = [1, 1, 1]} : vector<2x16x39xf32> to vector<2x1x39xf32>
    %467 = arith.maximumf %465, %466 : vector<2x1x39xf32>
    %468 = tpu.concatenate %458, %461, %464, %467 in 1 : vector<2x1x39xf32>, vector<2x1x39xf32>, vector<2x1x39xf32>, vector<2x1x39xf32> -> vector<2x4x39xf32>
    %469 = vector.extract_strided_slice %468 {offsets = [0, 0, 0], sizes = [2, 4, 38], strides = [1, 1, 1]} : vector<2x4x39xf32> to vector<2x4x38xf32>
    %470 = vector.extract_strided_slice %468 {offsets = [0, 0, 1], sizes = [2, 4, 38], strides = [1, 1, 1]} : vector<2x4x39xf32> to vector<2x4x38xf32>
    %471 = arith.maximumf %469, %470 : vector<2x4x38xf32>
    %cst_49 = arith.constant 0.000000e+00 : f32
    %472 = vector.broadcast %cst_49 : f32 to vector<2x16x39xf32>
    %473 = arith.cmpf ogt, %423, %472 : vector<2x16x39xf32>
    %cst_50 = arith.constant 0.000000e+00 : f32
    %474 = vector.broadcast %cst_50 : f32 to vector<2x16x39xf32>
    %475 = arith.minimumf %423, %474 : vector<2x16x39xf32>
    %476 = math.exp %475 : vector<2x16x39xf32>
    %cst_51 = arith.constant 1.000000e+00 : f32
    %477 = vector.broadcast %cst_51 : f32 to vector<2x16x39xf32>
    %478 = arith.subf %476, %477 : vector<2x16x39xf32>
    %479 = arith.select %473, %423, %478 : vector<2x16x39xi1>, vector<2x16x39xf32>
    %480 = vector.shape_cast %479 : vector<2x16x39xf32> to vector<1x2x16x39xf32>
    %cst_52 = arith.constant dense<0.000000e+00> : vector<1xf32>
    %481 = vector.multi_reduction <add>, %480, %cst_52 [1, 2, 3] : vector<1x2x16x39xf32> to vector<1xf32>
    %482 = vector.shape_cast %481 : vector<1xf32> to vector<1x1x1x1xf32>
    %483 = vector.extract %482[0, 0, 0, 0] : f32 from vector<1x1x1x1xf32>
    %cst_53 = arith.constant 8.01282062E-4 : f32
    %484 = arith.mulf %483, %cst_53 : f32
    %485 = vector.broadcast %484 : f32 to vector<2x16x39xf32>
    %486 = arith.subf %479, %485 : vector<2x16x39xf32>
    %487 = arith.mulf %486, %486 : vector<2x16x39xf32>
    %488 = vector.shape_cast %487 : vector<2x16x39xf32> to vector<1x2x16x39xf32>
    %cst_54 = arith.constant dense<0.000000e+00> : vector<1xf32>
    %489 = vector.multi_reduction <add>, %488, %cst_54 [1, 2, 3] : vector<1x2x16x39xf32> to vector<1xf32>
    %490 = vector.shape_cast %489 : vector<1xf32> to vector<1x1x1x1xf32>
    %491 = vector.extract %490[0, 0, 0, 0] : f32 from vector<1x1x1x1xf32>
    %cst_55 = arith.constant 8.01282062E-4 : f32
    %492 = arith.mulf %491, %cst_55 : f32
    %493 = math.rsqrt %492 : f32
    %494 = vector.broadcast %493 : f32 to vector<2x16x39xf32>
    %495 = arith.mulf %486, %494 : vector<2x16x39xf32>
    %496 = vector.extract_strided_slice %495 {offsets = [0, 0, 0], sizes = [2, 1, 39], strides = [1, 1, 1]} : vector<2x16x39xf32> to vector<2x1x39xf32>
    %497 = vector.extract_strided_slice %495 {offsets = [0, 1, 0], sizes = [2, 1, 39], strides = [1, 1, 1]} : vector<2x16x39xf32> to vector<2x1x39xf32>
    %498 = arith.maximumf %496, %497 : vector<2x1x39xf32>
    %499 = vector.extract_strided_slice %495 {offsets = [0, 4, 0], sizes = [2, 1, 39], strides = [1, 1, 1]} : vector<2x16x39xf32> to vector<2x1x39xf32>
    %500 = vector.extract_strided_slice %495 {offsets = [0, 5, 0], sizes = [2, 1, 39], strides = [1, 1, 1]} : vector<2x16x39xf32> to vector<2x1x39xf32>
    %501 = arith.maximumf %499, %500 : vector<2x1x39xf32>
    %502 = vector.extract_strided_slice %495 {offsets = [0, 8, 0], sizes = [2, 1, 39], strides = [1, 1, 1]} : vector<2x16x39xf32> to vector<2x1x39xf32>
    %503 = vector.extract_strided_slice %495 {offsets = [0, 9, 0], sizes = [2, 1, 39], strides = [1, 1, 1]} : vector<2x16x39xf32> to vector<2x1x39xf32>
    %504 = arith.maximumf %502, %503 : vector<2x1x39xf32>
    %505 = vector.extract_strided_slice %495 {offsets = [0, 12, 0], sizes = [2, 1, 39], strides = [1, 1, 1]} : vector<2x16x39xf32> to vector<2x1x39xf32>
    %506 = vector.extract_strided_slice %495 {offsets = [0, 13, 0], sizes = [2, 1, 39], strides = [1, 1, 1]} : vector<2x16x39xf32> to vector<2x1x39xf32>
    %507 = arith.maximumf %505, %506 : vector<2x1x39xf32>
    %508 = tpu.concatenate %498, %501, %504, %507 in 1 : vector<2x1x39xf32>, vector<2x1x39xf32>, vector<2x1x39xf32>, vector<2x1x39xf32> -> vector<2x4x39xf32>
    %509 = vector.extract_strided_slice %508 {offsets = [0, 0, 0], sizes = [2, 4, 38], strides = [1, 1, 1]} : vector<2x4x39xf32> to vector<2x4x38xf32>
    %510 = vector.extract_strided_slice %508 {offsets = [0, 0, 1], sizes = [2, 4, 38], strides = [1, 1, 1]} : vector<2x4x39xf32> to vector<2x4x38xf32>
    %511 = arith.maximumf %509, %510 : vector<2x4x38xf32>
    %cst_56 = arith.constant 0.000000e+00 : f32
    %512 = vector.broadcast %cst_56 : f32 to vector<2x16x39xf32>
    %513 = arith.cmpf ogt, %427, %512 : vector<2x16x39xf32>
    %cst_57 = arith.constant 0.000000e+00 : f32
    %514 = vector.broadcast %cst_57 : f32 to vector<2x16x39xf32>
    %515 = arith.minimumf %427, %514 : vector<2x16x39xf32>
    %516 = math.exp %515 : vector<2x16x39xf32>
    %cst_58 = arith.constant 1.000000e+00 : f32
    %517 = vector.broadcast %cst_58 : f32 to vector<2x16x39xf32>
    %518 = arith.subf %516, %517 : vector<2x16x39xf32>
    %519 = arith.select %513, %427, %518 : vector<2x16x39xi1>, vector<2x16x39xf32>
    %520 = vector.shape_cast %519 : vector<2x16x39xf32> to vector<1x2x16x39xf32>
    %cst_59 = arith.constant dense<0.000000e+00> : vector<1xf32>
    %521 = vector.multi_reduction <add>, %520, %cst_59 [1, 2, 3] : vector<1x2x16x39xf32> to vector<1xf32>
    %522 = vector.shape_cast %521 : vector<1xf32> to vector<1x1x1x1xf32>
    %523 = vector.extract %522[0, 0, 0, 0] : f32 from vector<1x1x1x1xf32>
    %cst_60 = arith.constant 8.01282062E-4 : f32
    %524 = arith.mulf %523, %cst_60 : f32
    %525 = vector.broadcast %524 : f32 to vector<2x16x39xf32>
    %526 = arith.subf %519, %525 : vector<2x16x39xf32>
    %527 = arith.mulf %526, %526 : vector<2x16x39xf32>
    %528 = vector.shape_cast %527 : vector<2x16x39xf32> to vector<1x2x16x39xf32>
    %cst_61 = arith.constant dense<0.000000e+00> : vector<1xf32>
    %529 = vector.multi_reduction <add>, %528, %cst_61 [1, 2, 3] : vector<1x2x16x39xf32> to vector<1xf32>
    %530 = vector.shape_cast %529 : vector<1xf32> to vector<1x1x1x1xf32>
    %531 = vector.extract %530[0, 0, 0, 0] : f32 from vector<1x1x1x1xf32>
    %cst_62 = arith.constant 8.01282062E-4 : f32
    %532 = arith.mulf %531, %cst_62 : f32
    %533 = math.rsqrt %532 : f32
    %534 = vector.broadcast %533 : f32 to vector<2x16x39xf32>
    %535 = arith.mulf %526, %534 : vector<2x16x39xf32>
    %536 = vector.extract_strided_slice %535 {offsets = [0, 0, 0], sizes = [2, 1, 39], strides = [1, 1, 1]} : vector<2x16x39xf32> to vector<2x1x39xf32>
    %537 = vector.extract_strided_slice %535 {offsets = [0, 1, 0], sizes = [2, 1, 39], strides = [1, 1, 1]} : vector<2x16x39xf32> to vector<2x1x39xf32>
    %538 = arith.maximumf %536, %537 : vector<2x1x39xf32>
    %539 = vector.extract_strided_slice %535 {offsets = [0, 4, 0], sizes = [2, 1, 39], strides = [1, 1, 1]} : vector<2x16x39xf32> to vector<2x1x39xf32>
    %540 = vector.extract_strided_slice %535 {offsets = [0, 5, 0], sizes = [2, 1, 39], strides = [1, 1, 1]} : vector<2x16x39xf32> to vector<2x1x39xf32>
    %541 = arith.maximumf %539, %540 : vector<2x1x39xf32>
    %542 = vector.extract_strided_slice %535 {offsets = [0, 8, 0], sizes = [2, 1, 39], strides = [1, 1, 1]} : vector<2x16x39xf32> to vector<2x1x39xf32>
    %543 = vector.extract_strided_slice %535 {offsets = [0, 9, 0], sizes = [2, 1, 39], strides = [1, 1, 1]} : vector<2x16x39xf32> to vector<2x1x39xf32>
    %544 = arith.maximumf %542, %543 : vector<2x1x39xf32>
    %545 = vector.extract_strided_slice %535 {offsets = [0, 12, 0], sizes = [2, 1, 39], strides = [1, 1, 1]} : vector<2x16x39xf32> to vector<2x1x39xf32>
    %546 = vector.extract_strided_slice %535 {offsets = [0, 13, 0], sizes = [2, 1, 39], strides = [1, 1, 1]} : vector<2x16x39xf32> to vector<2x1x39xf32>
    %547 = arith.maximumf %545, %546 : vector<2x1x39xf32>
    %548 = tpu.concatenate %538, %541, %544, %547 in 1 : vector<2x1x39xf32>, vector<2x1x39xf32>, vector<2x1x39xf32>, vector<2x1x39xf32> -> vector<2x4x39xf32>
    %549 = vector.extract_strided_slice %548 {offsets = [0, 0, 0], sizes = [2, 4, 38], strides = [1, 1, 1]} : vector<2x4x39xf32> to vector<2x4x38xf32>
    %550 = vector.extract_strided_slice %548 {offsets = [0, 0, 1], sizes = [2, 4, 38], strides = [1, 1, 1]} : vector<2x4x39xf32> to vector<2x4x38xf32>
    %551 = arith.maximumf %549, %550 : vector<2x4x38xf32>
    %cst_63 = arith.constant 0.000000e+00 : f32
    %552 = vector.broadcast %cst_63 : f32 to vector<2x16x39xf32>
    %553 = arith.cmpf ogt, %431, %552 : vector<2x16x39xf32>
    %cst_64 = arith.constant 0.000000e+00 : f32
    %554 = vector.broadcast %cst_64 : f32 to vector<2x16x39xf32>
    %555 = arith.minimumf %431, %554 : vector<2x16x39xf32>
    %556 = math.exp %555 : vector<2x16x39xf32>
    %cst_65 = arith.constant 1.000000e+00 : f32
    %557 = vector.broadcast %cst_65 : f32 to vector<2x16x39xf32>
    %558 = arith.subf %556, %557 : vector<2x16x39xf32>
    %559 = arith.select %553, %431, %558 : vector<2x16x39xi1>, vector<2x16x39xf32>
    %560 = vector.shape_cast %559 : vector<2x16x39xf32> to vector<1x2x16x39xf32>
    %cst_66 = arith.constant dense<0.000000e+00> : vector<1xf32>
    %561 = vector.multi_reduction <add>, %560, %cst_66 [1, 2, 3] : vector<1x2x16x39xf32> to vector<1xf32>
    %562 = vector.shape_cast %561 : vector<1xf32> to vector<1x1x1x1xf32>
    %563 = vector.extract %562[0, 0, 0, 0] : f32 from vector<1x1x1x1xf32>
    %cst_67 = arith.constant 8.01282062E-4 : f32
    %564 = arith.mulf %563, %cst_67 : f32
    %565 = vector.broadcast %564 : f32 to vector<2x16x39xf32>
    %566 = arith.subf %559, %565 : vector<2x16x39xf32>
    %567 = arith.mulf %566, %566 : vector<2x16x39xf32>
    %568 = vector.shape_cast %567 : vector<2x16x39xf32> to vector<1x2x16x39xf32>
    %cst_68 = arith.constant dense<0.000000e+00> : vector<1xf32>
    %569 = vector.multi_reduction <add>, %568, %cst_68 [1, 2, 3] : vector<1x2x16x39xf32> to vector<1xf32>
    %570 = vector.shape_cast %569 : vector<1xf32> to vector<1x1x1x1xf32>
    %571 = vector.extract %570[0, 0, 0, 0] : f32 from vector<1x1x1x1xf32>
    %cst_69 = arith.constant 8.01282062E-4 : f32
    %572 = arith.mulf %571, %cst_69 : f32
    %573 = math.rsqrt %572 : f32
    %574 = vector.broadcast %573 : f32 to vector<2x16x39xf32>
    %575 = arith.mulf %566, %574 : vector<2x16x39xf32>
    %576 = vector.extract_strided_slice %575 {offsets = [0, 0, 0], sizes = [2, 1, 39], strides = [1, 1, 1]} : vector<2x16x39xf32> to vector<2x1x39xf32>
    %577 = vector.extract_strided_slice %575 {offsets = [0, 1, 0], sizes = [2, 1, 39], strides = [1, 1, 1]} : vector<2x16x39xf32> to vector<2x1x39xf32>
    %578 = arith.maximumf %576, %577 : vector<2x1x39xf32>
    %579 = vector.extract_strided_slice %575 {offsets = [0, 4, 0], sizes = [2, 1, 39], strides = [1, 1, 1]} : vector<2x16x39xf32> to vector<2x1x39xf32>
    %580 = vector.extract_strided_slice %575 {offsets = [0, 5, 0], sizes = [2, 1, 39], strides = [1, 1, 1]} : vector<2x16x39xf32> to vector<2x1x39xf32>
    %581 = arith.maximumf %579, %580 : vector<2x1x39xf32>
    %582 = vector.extract_strided_slice %575 {offsets = [0, 8, 0], sizes = [2, 1, 39], strides = [1, 1, 1]} : vector<2x16x39xf32> to vector<2x1x39xf32>
    %583 = vector.extract_strided_slice %575 {offsets = [0, 9, 0], sizes = [2, 1, 39], strides = [1, 1, 1]} : vector<2x16x39xf32> to vector<2x1x39xf32>
    %584 = arith.maximumf %582, %583 : vector<2x1x39xf32>
    %585 = vector.extract_strided_slice %575 {offsets = [0, 12, 0], sizes = [2, 1, 39], strides = [1, 1, 1]} : vector<2x16x39xf32> to vector<2x1x39xf32>
    %586 = vector.extract_strided_slice %575 {offsets = [0, 13, 0], sizes = [2, 1, 39], strides = [1, 1, 1]} : vector<2x16x39xf32> to vector<2x1x39xf32>
    %587 = arith.maximumf %585, %586 : vector<2x1x39xf32>
    %588 = tpu.concatenate %578, %581, %584, %587 in 1 : vector<2x1x39xf32>, vector<2x1x39xf32>, vector<2x1x39xf32>, vector<2x1x39xf32> -> vector<2x4x39xf32>
    %589 = vector.extract_strided_slice %588 {offsets = [0, 0, 0], sizes = [2, 4, 38], strides = [1, 1, 1]} : vector<2x4x39xf32> to vector<2x4x38xf32>
    %590 = vector.extract_strided_slice %588 {offsets = [0, 0, 1], sizes = [2, 4, 38], strides = [1, 1, 1]} : vector<2x4x39xf32> to vector<2x4x38xf32>
    %591 = arith.maximumf %589, %590 : vector<2x4x38xf32>
    %592 = tpu.concatenate %471, %511, %551, %591 in 1 : vector<2x4x38xf32>, vector<2x4x38xf32>, vector<2x4x38xf32>, vector<2x4x38xf32> -> vector<2x16x38xf32>
    %593 = vector.shape_cast %592 : vector<2x16x38xf32> to vector<32x38xf32>
    %594 = tpu.iota {dimensions = array<i32: 0>} : vector<38x10xi32>
    %595 = tpu.iota {dimensions = array<i32: 1>} : vector<38x10xi32>
    %c4_i32 = arith.constant 4 : i32
    %596 = vector.broadcast %c4_i32 : i32 to vector<38x10xi32>
    %597 = arith.muli %596, %595 : vector<38x10xi32>
    %598 = arith.cmpi eq, %594, %597 : vector<38x10xi32>
    %599 = arith.extui %598 : vector<38x10xi1> to vector<38x10xi32>
    %600 = arith.sitofp %599 : vector<38x10xi32> to vector<38x10xf32>
    %cst_70 = arith.constant dense<0.000000e+00> : vector<32x10xf32>
    %601 = tpu.matmul %593, %600, %cst_70 {dimension_numbers = #tpu.dot_dimension_numbers<[1], [0], [0], [1], [0, 0, 1, 1], [], []>} : vector<32x38xf32>, vector<38x10xf32>, vector<32x10xf32> -> vector<32x10xf32>
    %602 = vector.shape_cast %601 : vector<32x10xf32> to vector<2x16x10xf32>
    %cst_71 = arith.constant 0.000000e+00 : f32
    %603 = vector.broadcast %cst_71 : f32 to vector<2x44x128xf32>
    %c0_72 = arith.constant 0 : index
    %c0_73 = arith.constant 0 : index
    %c0_74 = arith.constant 0 : index
    %604 = vector.load %arg9[%c0_72, %c0_73, %c0_74] : memref<2x44x128xf32, #tpu.memory_space<vmem>>, vector<2x44x128xf32>
    tpu.vector_store %arg9[%c0_72, %c0_73, %c0_74], %603 {strides = array<i32>} : memref<2x44x128xf32, #tpu.memory_space<vmem>>, vector<2x44x128xf32>,
    %605 = vector.extract_strided_slice %602 {offsets = [0, 0, 0], sizes = [2, 4, 10], strides = [1, 1, 1]} : vector<2x16x10xf32> to vector<2x4x10xf32>
    %c0_75 = arith.constant 0 : index
    %c4_76 = arith.constant 4 : index
    %c2_77 = arith.constant 2 : index
    %606 = vector.load %arg9[%c0_75, %c4_76, %c2_77] : memref<2x44x128xf32, #tpu.memory_space<vmem>>, vector<2x4x10xf32>
    tpu.vector_store %arg9[%c0_75, %c4_76, %c2_77], %605 {strides = array<i32>} : memref<2x44x128xf32, #tpu.memory_space<vmem>>, vector<2x4x10xf32>,
    %607 = vector.extract_strided_slice %602 {offsets = [0, 4, 0], sizes = [2, 4, 10], strides = [1, 1, 1]} : vector<2x16x10xf32> to vector<2x4x10xf32>
    %c0_78 = arith.constant 0 : index
    %c15_79 = arith.constant 15 : index
    %c2_80 = arith.constant 2 : index
    %608 = vector.load %arg9[%c0_78, %c15_79, %c2_80] : memref<2x44x128xf32, #tpu.memory_space<vmem>>, vector<2x4x10xf32>
    tpu.vector_store %arg9[%c0_78, %c15_79, %c2_80], %607 {strides = array<i32>} : memref<2x44x128xf32, #tpu.memory_space<vmem>>, vector<2x4x10xf32>,
    %609 = vector.extract_strided_slice %602 {offsets = [0, 8, 0], sizes = [2, 4, 10], strides = [1, 1, 1]} : vector<2x16x10xf32> to vector<2x4x10xf32>
    %c0_81 = arith.constant 0 : index
    %c26_82 = arith.constant 26 : index
    %c2_83 = arith.constant 2 : index
    %610 = vector.load %arg9[%c0_81, %c26_82, %c2_83] : memref<2x44x128xf32, #tpu.memory_space<vmem>>, vector<2x4x10xf32>
    tpu.vector_store %arg9[%c0_81, %c26_82, %c2_83], %609 {strides = array<i32>} : memref<2x44x128xf32, #tpu.memory_space<vmem>>, vector<2x4x10xf32>,
    %611 = vector.extract_strided_slice %602 {offsets = [0, 12, 0], sizes = [2, 4, 10], strides = [1, 1, 1]} : vector<2x16x10xf32> to vector<2x4x10xf32>
    %c0_84 = arith.constant 0 : index
    %c37_85 = arith.constant 37 : index
    %c2_86 = arith.constant 2 : index
    %612 = vector.load %arg9[%c0_84, %c37_85, %c2_86] : memref<2x44x128xf32, #tpu.memory_space<vmem>>, vector<2x4x10xf32>
    tpu.vector_store %arg9[%c0_84, %c37_85, %c2_86], %611 {strides = array<i32>} : memref<2x44x128xf32, #tpu.memory_space<vmem>>, vector<2x4x10xf32>,
    %c0_87 = arith.constant 0 : index
    %c0_88 = arith.constant 0 : index
    %c0_89 = arith.constant 0 : index
    %613 = vector.load %arg9[%c0_87, %c0_88, %c0_89] : memref<2x44x128xf32, #tpu.memory_space<vmem>>, vector<2x44x128xf32>
    %614 = vector.extract_strided_slice %613 {offsets = [0, 0, 0], sizes = [2, 44, 10], strides = [1, 1, 1]} : vector<2x44x128xf32> to vector<2x44x10xf32>
    %615 = vector.extract_strided_slice %613 {offsets = [0, 0, 1], sizes = [2, 44, 10], strides = [1, 1, 1]} : vector<2x44x128xf32> to vector<2x44x10xf32>
    %616 = vector.extract_strided_slice %613 {offsets = [0, 0, 2], sizes = [2, 44, 10], strides = [1, 1, 1]} : vector<2x44x128xf32> to vector<2x44x10xf32>
    %617 = vector.extract_strided_slice %613 {offsets = [0, 0, 3], sizes = [2, 44, 10], strides = [1, 1, 1]} : vector<2x44x128xf32> to vector<2x44x10xf32>
    %618 = tpu.concatenate %614, %615, %616, %617 in 1 : vector<2x44x10xf32>, vector<2x44x10xf32>, vector<2x44x10xf32>, vector<2x44x10xf32> -> vector<2x176x10xf32>
    %c0_90 = arith.constant 0 : index
    %c0_91 = arith.constant 0 : index
    %619 = vector.load %arg5[%c0_90, %c0_91] : memref<4x176xf32, #tpu.memory_space<vmem>>, vector<4x176xf32>
    %620 = vector.extract_strided_slice %618 {offsets = [0, 0, 0], sizes = [1, 176, 10], strides = [1, 1, 1]} : vector<2x176x10xf32> to vector<1x176x10xf32>
    %621 = vector.shape_cast %620 : vector<1x176x10xf32> to vector<176x10xf32>
    %cst_92 = arith.constant dense<0.000000e+00> : vector<4x10xf32>
    %622 = tpu.matmul %619, %621, %cst_92 {dimension_numbers = #tpu.dot_dimension_numbers<[1], [0], [0], [1], [0, 0, 1, 1], [], []>} : vector<4x176xf32>, vector<176x10xf32>, vector<4x10xf32> -> vector<4x10xf32>
    %623 = vector.extract_strided_slice %618 {offsets = [1, 0, 0], sizes = [1, 176, 10], strides = [1, 1, 1]} : vector<2x176x10xf32> to vector<1x176x10xf32>
    %624 = vector.shape_cast %623 : vector<1x176x10xf32> to vector<176x10xf32>
    %cst_93 = arith.constant dense<0.000000e+00> : vector<4x10xf32>
    %625 = tpu.matmul %619, %624, %cst_93 {dimension_numbers = #tpu.dot_dimension_numbers<[1], [0], [0], [1], [0, 0, 1, 1], [], []>} : vector<4x176xf32>, vector<176x10xf32>, vector<4x10xf32> -> vector<4x10xf32>
    %626 = tpu.concatenate %622, %625 in 0 : vector<4x10xf32>, vector<4x10xf32> -> vector<8x10xf32>
    %c0_94 = arith.constant 0 : index
    %627 = memref.load %arg6[%c0_94] : memref<1xf32, #tpu.memory_space<smem>>
    %628 = vector.broadcast %627 : f32 to vector<8x10xf32>
    %629 = arith.addf %626, %628 : vector<8x10xf32>
    %cst_95 = arith.constant 0.000000e+00 : f32
    %630 = vector.broadcast %cst_95 : f32 to vector<8x10xf32>
    %631 = arith.cmpf ogt, %629, %630 : vector<8x10xf32>
    %cst_96 = arith.constant 0.000000e+00 : f32
    %632 = vector.broadcast %cst_96 : f32 to vector<8x10xf32>
    %633 = arith.minimumf %629, %632 : vector<8x10xf32>
    %634 = math.exp %633 : vector<8x10xf32>
    %cst_97 = arith.constant 1.000000e+00 : f32
    %635 = vector.broadcast %cst_97 : f32 to vector<8x10xf32>
    %636 = arith.subf %634, %635 : vector<8x10xf32>
    %637 = arith.select %631, %629, %636 : vector<8x10xi1>, vector<8x10xf32>
    %c0_98 = arith.constant 0 : index
    %c0_99 = arith.constant 0 : index
    %638 = vector.load %arg7[%c0_98, %c0_99] : memref<8x10xf32, #tpu.memory_space<vmem>>, vector<8x10xf32>
    tpu.vector_store %arg7[%c0_98, %c0_99], %637 {strides = array<i32>} : memref<8x10xf32, #tpu.memory_space<vmem>>, vector<8x10xf32>,
    return
  }
}

</mosaic_0001>

<bundles_post_ra>
// kernel: _lambda_.1
= control target key start
LH: loop header
LB: loop body
LE: loop exit
PB: predicated region body
PF: predicated region fallthrough
CT: control target
= control target key end

     0   :  { %13 = vsyncpa [#allocation7], 0  ;;  %s5857_s0 = inlined_call_operand.vmem [shape: f32[22,32], index: 0, kind: input, shape index: {}]   ;;  %s5858_s1 = inlined_call_operand.vmem [shape: f32[16,22], index: 1, kind: input, shape index: {}]   ;;  %s5859_s2 = inlined_call_operand.vmem [shape: f32[16,1], index: 2, kind: input, shape index: {}]   ;;  %s5860_s3 = inlined_call_operand.vmem [shape: f32[88], index: 3, kind: input, shape index: {}]   ;;  %s5861_s4 = inlined_call_operand.vmem [shape: f32[4], index: 4, kind: input, shape index: {}]   ;;  %s5862_s5 = inlined_call_operand.vmem [shape: f32[4,176], index: 5, kind: input, shape index: {}]   ;;  %s5863_s6 = inlined_call_operand.<no memory space> [shape: f32[1], index: 6, kind: input, shape index: {}]   ;;  %s5864_s7 = inlined_call_operand.hbm [shape: f32[8,10], index: 7, kind: output, shape index: {}]  }
   0x1   :  { %14 = vsyncpa [#allocation9], 0 }
   0x2   :  { %15 = vsyncpa [#allocation6], 0  ;;  %s28_s26 = sshll.u32 %s5860_s3, 4  ;;  %s38_s29 = sshll.u32 %s5861_s4, 4  ;;  %s29_s26 = int_to_ptr.vmem [resolvable:$true] %s28_s26  ;;  %s39_s29 = int_to_ptr.vmem [resolvable:$true] %s38_s29 }
   0x3   :  { %s3707_s30 = scalar_lea.vmem %s29_s26, 16  ;;  %p3712_p1 = scmp.lt.s32.totalorder %s29_s26, %s29_s26 }
   0x4   :  { %p3708_p0 = scmp.ne.s32.totalorder %s29_s26, %s3707_s30  ;;  %p3713_p2 = scmp.lt.s32.totalorder %s3707_s30, %s3707_s30 }
   0x6   :  { %p3714_p3 = por %p3713_p2, %p3712_p1 }
   0x8   :  { %p3715_p4 = pnand %p3714_p3, %p3708_p0 }
   0xa   :  { %3718 = shalt.err (!%p3715_p4)
}
   0xb   :  { %s3757_s8 = smov [#allocation5]   ;;  %s3719_s9 = scalar_lea.vmem %s39_s29, 16 }
   0xc   :  { %31 = dma.vmem_to_smem %s29_s26, 16, %s3757_s8, [#allocation7]  }
   0xd   :  { %p3720_p5 = scmp.ne.s32.totalorder %s39_s29, %s3719_s9  ;;  %p3724_p6 = scmp.lt.s32.totalorder %s39_s29, %s39_s29 }
   0xe   :  { %p3725_p7 = scmp.lt.s32.totalorder %s3719_s9, %s3719_s9 }
  0x10   :  { %p3726_p8 = por %p3725_p7, %p3724_p6 }
  0x12   :  { %p3727_p9 = pnand %p3726_p8, %p3720_p5 }
  0x14   :  { %3730 = shalt.err (!%p3727_p9)
}
  0x15   :  { %s3758_s3 = smov [#allocation8]  }
  0x16   :  { %41 = dma.vmem_to_smem %s39_s29, 16, %s3758_s3, [#allocation9]  }
  0x17   :  { %3751 = dma.done.wait [#allocation7], 16  }
  0x18   :  { %3752 = vsyncadd [#allocation7], 4294967280 }
  0x19   :  { %3753 = dma.done.wait [#allocation9], 16  }
  0x1a   :  { %3754 = vsyncadd [#allocation9], 4294967280 }
  0x1b   :  { %52 = sfence }
  0x1c   :  { %v57_v0 = vld [vmem:[%s5857_s0 + $0x10] sm:$0x3f]  ;;  %vm77_vm0 = vcmask 1045504   ;;  %v56_v1 = vld [vmem:[%s5857_s0 + $0x8] sm:$0xff]  ;;  %vm70_vm1 = vcmask 179200   ;;  %v53_v2 = vld [vmem:[%s5858_s1] sm:$0xff] }
  0x1d   :  { %3568 = vmatprep.subr.msk.mxu0 %vm77_vm0, %v57_v0  ;;  %v58_v3 = vld [vmem:[%s5859_s2] sm:$0xff]  ;;  %3574 = vmatprep.mubr.msk.f32.mxu0 %vm70_vm1, %v53_v2  ;;  %v3759_v5 = vmov 0   ;;  %v54_v6 = vld [vmem:[%s5858_s1 + $0x8] sm:$0xff]  ;;  %vm168_vm3 = vcmask 261120   ;;  %vm193_vm5 = vcmask 130048   ;;  %vm196_vm6 = vcmask 122880  }
  0x1e   :  { %3569 = vmatpush3.msk.msra.mxu0 %vm77_vm0, %v57_v0  ;;  %v55_v4 = vld [vmem:[%s5857_s0] sm:$0xff]  ;;  %3636 = vset.pattern.permute.xlu0 %v3759_v5  ;;  %v59_v7 = vld [vmem:[%s5859_s2 + $0x8] sm:$0xff]  ;;  %vm201_vm7 = vcmask 1047808   ;;  %v3760_v40 = vmov 0.0   ;;  %vm204_vm8 = vcmask 1040640   ;;  %vm209_vm9 = vcmask 254080  }
  0x1f   :  { %3570 = vmatprep.subr.mxu0 %v56_v1  ;;  %62 = vperm.xlu0 %3636, %v58_v3   ;;  %195 = vst.msk [vmem:[#allocation2 + $0x8] sm:$0xff] %vm193_vm5, %v3760_v40  ;;  %194 = vst.msk [vmem:[#allocation2] sm:$0xff] %vm193_vm5, %v3760_v40  ;;  %s3761_s0 = smov 112   ;;  %s3762_s1 = smov 16   ;;  %vm230_vm10 = vcmask 261248   ;;  %vm2439_vm13 = vcmask 318464  }
  0x20   :  { %3571 = vmatpush3.msra.mxu0 %v56_v1  ;;  %197 = vst.msk [vmem:[#allocation2 + $0x10] sm:$0x1] %vm196_vm6, %v3760_v40  ;;  %200 = vst.msk [vmem:[#allocation2 + $0x28] sm:$0x1] %vm196_vm6, %v3760_v40  ;;  %s3437_s2 = sld [smem:[#allocation5 + $0x1]]  ;;  %s3763_s28 = smov 127  }
  0x21   :  { %3572 = vmatprep.subr.mxu0 %v55_v4  ;;  %198 = vst.msk [vmem:[#allocation2 + $0x18] sm:$0xff] %vm193_vm5, %v3760_v40  ;;  %199 = vst.msk [vmem:[#allocation2 + $0x20] sm:$0xff] %vm193_vm5, %v3760_v40  ;;  %s3441_s23 = sld [smem:[#allocation5 + $0x2]]  ;;  %s3764_s29 = smov 126  }
  0x22   :  { %3573 = vmatpush3.msra.mxu0 %v55_v4  ;;  %3053 = vst [vmem:[#allocation3] sm:$0xff] %v3760_v40  ;;  %3054 = vst [vmem:[#allocation3 + $0x8] sm:$0xff] %v3760_v40  ;;  %s3481_s24 = sld [smem:[#allocation5 + $0xc]]  ;;  %s3765_s8 = smov 125  }
  0x23   :  { %3575 = vmatmul.mubr.msk.f32.vlgmr.msra.gmra.mxu0 %vm70_vm1, %v54_v6  ;;  %67 = vperm.xlu0 %3636, %v59_v7   ;;  %3055 = vst [vmem:[#allocation3 + $0x10] sm:$0xff] %v3760_v40  ;;  %3056 = vst [vmem:[#allocation3 + $0x18] sm:$0xff] %v3760_v40  ;;  %s3445_s25 = sld [smem:[#allocation5 + $0x3]]  ;;  %s3766_s3 = smov 124  }
  0x24   :  { %3057 = vst [vmem:[#allocation3 + $0x20] sm:$0xff] %v3760_v40  ;;  %3058 = vst [vmem:[#allocation3 + $0x28] sm:$0xf] %v3760_v40  ;;  %3255 = vmatprep.subr.mxu0 %v3760_v40  ;;  %s3449_s26 = sld [smem:[#allocation5 + $0x4]]  ;;  %s3767_s10 = smov 123  }
  0x25   :  { %3059 = vst [vmem:[#allocation3 + $0x30] sm:$0xff] %v3760_v40  ;;  %3060 = vst [vmem:[#allocation3 + $0x38] sm:$0xff] %v3760_v40  ;;  %s3453_s27 = sld [smem:[#allocation5 + $0x5]]  ;;  %s3768_s12 = smov 122  }
  0x26   :  { %3061 = vst [vmem:[#allocation3 + $0x40] sm:$0xff] %v3760_v40  ;;  %3062 = vst [vmem:[#allocation3 + $0x48] sm:$0xff] %v3760_v40  ;;  %v3860_v48 = vstv %s3437_s2  ;;  %s3457_s30 = sld [smem:[#allocation5 + $0x6]]  ;;  %s3769_s14 = smov 121  }
  0x27   :  { %3063 = vst [vmem:[#allocation3 + $0x50] sm:$0xff] %v3760_v40  ;;  %3064 = vst [vmem:[#allocation3 + $0x58] sm:$0xf] %v3760_v40  ;;  %v3862_v49 = vstv %s3441_s23  ;;  %s3461_s9 = sld [smem:[#allocation5 + $0x7]]  ;;  %s3770_s16 = smov 120  }
  0x28   :  { %203 = vst.msk [vmem:[#allocation2 + $0x8] sm:$0xff] %vm201_vm7, %v3760_v40  ;;  %202 = vst.msk [vmem:[#allocation2] sm:$0xff] %vm201_vm7, %v3760_v40  ;;  %v3873_v55 = vstv %s3481_s24  ;;  %s3465_s4 = sld [smem:[#allocation5 + $0x8]]  ;;  %s3771_s18 = smov 119  }
  0x29   :  { %205 = vst.msk [vmem:[#allocation2 + $0x10] sm:$0x1] %vm204_vm8, %v3760_v40  ;;  %208 = vst.msk [vmem:[#allocation2 + $0x28] sm:$0x1] %vm204_vm8, %v3760_v40  ;;  %v3875_v56 = vstv %s3445_s25  ;;  %s3469_s11 = sld [smem:[#allocation5 + $0x9]]  ;;  %s3772_s20 = smov 118  }
  0x2a   :  { %206 = vst.msk [vmem:[#allocation2 + $0x18] sm:$0xff] %vm201_vm7, %v3760_v40  ;;  %207 = vst.msk [vmem:[#allocation2 + $0x20] sm:$0xff] %vm201_vm7, %v3760_v40  ;;  %v3883_v59 = vstv %s3449_s26  ;;  %s3473_s13 = sld [smem:[#allocation5 + $0xa]] }
  0x2b   :  { %210 = vst.msk [vmem:[#allocation2 + $0x10] sm:$0x1] %vm209_vm9, %v3760_v40  ;;  %211 = vst.msk [vmem:[#allocation2 + $0x28] sm:$0x1] %vm209_vm9, %v3760_v40  ;;  %v3893_v63 = vstv %s3453_s27  ;;  %s3485_s15 = sld [smem:[#allocation5 + $0xd]]  ;;  %vm2523_vm9 = vcmask 1040384  }
  0x2c   :  { %v3901_v2 = vstv %s3457_s30  ;;  %s3489_s17 = sld [smem:[#allocation5 + $0xe]] }
  0x2d   :  { %v3909_v5 = vstv %s3461_s9  ;;  %s3493_s19 = sld [smem:[#allocation5 + $0xf]] }
  0x2e   :  { %s3497_s21 = sld [smem:[#allocation5 + $0x10]] }
  0x2f   :  { %s3501_s22 = sld [smem:[#allocation5 + $0x11]] }
  0x30   :  { %s3513_s2 = sld [smem:[#allocation5 + $0x14]] }
  0x31   :  { %s3517_s23 = sld [smem:[#allocation5 + $0x15]] }
  0x32   :  { %s251_s24 = sld [smem:[#allocation5]] }
  0x33   :  { %s235_s25 = sld [smem:[#allocation8]] }
  0x34   :  { %s3477_s26 = sld [smem:[#allocation5 + $0xb]] }
  0x35   :  { %s3446_s27 = sld [smem:[#allocation5 + $0x19]] }
  0x36   :  { %v4003_v40 = vstv %s3513_s2  ;;  %s3454_s30 = sld [smem:[#allocation5 + $0x1b]] }
  0x37   :  { %s3450_s9 = sld [smem:[#allocation5 + $0x1a]] }
  0x38   :  { %s3494_s2 = sld [smem:[#allocation5 + $0x25]] }
  0x9a   :  { %v63_v8 = vpop.permute.xlu0 %62 }
  0x9e   :  { %v68_v9 = vpop.permute.xlu0 %67 }
  0xe3   :  { %v3576_v10 = vpop.f32.mrf.mxu0 }
  0xe4   :  { %v153_v11 = vadd.f32 %v3576_v10, %v68_v9 }
  0xe5   :  { %v147_v12 = vpop.f32.mrf.mxu0 }
  0xe6   :  { %v159_v13 = vmin.f32 %v153_v11, 0.0  ;;  %v148_v14 = vadd.f32 %v147_v12, %v63_v8  ;;  %vm157_vm4 = vcmp.gt.f32.partialorder %v153_v11, 0.0  ;;  %v3917_v8 = vstv %s3465_s4  ;;  %s3458_s4 = sld [smem:[#allocation5 + $0x1c]] }
  0xe8   :  { %v162_v15 = vmul.f32 1.442695, %v159_v13  ;;  %v158_v16 = vmin.f32 %v148_v14, 0.0  ;;  %vm156_vm2 = vcmp.gt.f32.partialorder %v148_v14, 0.0 }
  0xea   :  { %3638 = vpow2.f32 %v162_v15  ;;  %v160_v17 = vmul.f32 1.442695, %v158_v16 }
  0xec   :  { %3640 = vpow2.f32 %v160_v17  ;;  %v3941_v17 = vstv %s3485_s15  ;;  %s3466_s15 = sld [smem:[#allocation5 + $0x1e]] }
  0xf7   :  { %v3639_v18 = vpop.eup %3638 }
  0xf8   :  { %v3430_v21 = vadd.f32 -1.0, %v3639_v18 }
  0xf9   :  { %v3641_v19 = vpop.eup %3640 }
  0xfa   :  { %v3429_v20 = vadd.f32 -1.0, %v3641_v19  ;;  %v167_v24 = vsel %vm157_vm4, %v153_v11, %v3430_v21  ;;  %v3925_v11 = vstv %s3469_s11  ;;  %s3462_s11 = sld [smem:[#allocation5 + $0x1d]] }
  0xfb   :  { %v172_v25 = vsel %vm168_vm3, %v167_v24, 0.0 }
  0xfc   :  { %v166_v22 = vsel %vm156_vm2, %v148_v14, %v3429_v20  ;;  %v3933_v14 = vstv %s3473_s13  ;;  %v3949_v20 = vstv %s3489_s17  ;;  %s3438_s13 = sld [smem:[#allocation5 + $0x17]] }
  0xfd   :  { %v169_v23 = vsel %vm168_vm3, %v166_v22, 0.0  ;;  %s3442_s17 = sld [smem:[#allocation5 + $0x18]] }
  0xfe   :  { %170 = vadd.xlane.f32.xlu1 %v169_v23  ;;  %v3957_v23 = vstv %s3493_s19  ;;  %s3470_s19 = sld [smem:[#allocation5 + $0x1f]] }
 0x102   :  { %173 = vadd.xlane.f32.xlu1 %v172_v25 }
 0x187   :  { %v171_v26 = vpop.xlane.xlu1 %170 }
 0x188   :  { %v175_v27 = vmul.f32 0.03125, %v171_v26 }
 0x18a   :  { %v177_v28 = vsub.f32 %v166_v22, %v175_v27  ;;  %v3967_v27 = vstv %s3497_s21  ;;  %s3474_s21 = sld [smem:[#allocation5 + $0x20]] }
 0x18b   :  { %v174_v29 = vpop.xlane.xlu1 %173 }
 0x18c   :  { %v176_v30 = vmul.f32 0.03125, %v174_v29  ;;  %v179_v31 = vmul.f32 %v177_v28, %v177_v28 }
 0x18e   :  { %v178_v32 = vsub.f32 %v167_v24, %v176_v30  ;;  %v181_v33 = vsel %vm168_vm3, %v179_v31, 0.0 }
 0x18f   :  { %182 = vadd.xlane.f32.xlu0 %v181_v33 }
 0x190   :  { %v180_v34 = vmul.f32 %v178_v32, %v178_v32 }
 0x192   :  { %v184_v35 = vsel %vm168_vm3, %v180_v34, 0.0 }
 0x193   :  { %185 = vadd.xlane.f32.xlu1 %v184_v35 }
 0x218   :  { %v183_v38 = vpop.xlane.xlu0 %182 }
 0x219   :  { %v187_v39 = vmul.f32 0.03125, %v183_v38 }
 0x21c   :  { %v186_v36 = vpop.xlane.xlu1 %185 }
 0x21d   :  { %v188_v37 = vmul.f32 0.03125, %v186_v36 }
 0x21f   :  { %3642 = vrsqrt.f32 %v188_v37 }
 0x220   :  { %3644 = vrsqrt.f32 %v187_v39 }
 0x22c   :  { %v3643_v41 = vpop.eup %3642 }
 0x22d   :  { %v192_v42 = vmul.f32 %v3643_v41, %v178_v32  ;;  %v3645_v43 = vpop.eup %3644  ;;  %v3981_v32 = vstv %s3501_s22  ;;  %s3482_s22 = sld [smem:[#allocation5 + $0x22]] }
 0x22e   :  { %v191_v44 = vmul.f32 %v3645_v43, %v177_v28 }
 0x22f   :  { %216 = vrot.lane.b32.xlu1 %v192_v42, %s3761_s0 }
 0x233   :  { %220 = vrot.lane.b32.xlu1 %v192_v42, %s3762_s1  ;;  %v4008_v42 = vstv %s3517_s23  ;;  %s3498_s23 = sld [smem:[#allocation5 + $0x26]] }
 0x237   :  { %214 = vrot.lane.b32.xlu1 %v191_v44, %s3761_s0  ;;  %s3505_s0 = sld [smem:[#allocation5 + $0x12]] }
 0x23b   :  { %218 = vrot.lane.b32.xlu1 %v191_v44, %s3762_s1 }
 0x23d   :  { %v3989_v35 = vstv %s3505_s0  ;;  %s3486_s0 = sld [smem:[#allocation5 + $0x23]] }
 0x2a1   :  { %v217_v45 = vpop.permute.xlu1 %216 }
 0x2a2   :  { %224 = vrot.lane.b32.xlu1 %v217_v45, %s3762_s1 }
 0x2a5   :  { %v221_v46 = vpop.permute.xlu1 %220 }
 0x2a6   :  { %232 = vst.msk [vmem:[#allocation2 + $0x8] sm:$0xff] %vm230_vm10, %v221_v46 }
 0x2a9   :  { %v215_v47 = vpop.permute.xlu1 %214 }
 0x2aa   :  { %222 = vrot.lane.b32.xlu0 %v215_v47, %s3762_s1  ;;  %s3509_s1 = sld [smem:[#allocation5 + $0x13]] }
 0x2ad   :  { %v3864_v50 = vld [vmem:[#allocation2 + $0x8] sm:$0xff]  ;;  %v219_v51 = vpop.permute.xlu1 %218 }
 0x2ae   :  { %231 = vst.msk [vmem:[#allocation2] sm:$0xff] %vm230_vm10, %v219_v51  ;;  %v294_v52 = vmul.f32 %v3860_v48, %v3864_v50  ;;  %v398_v53 = vmul.f32 %v3862_v49, %v3864_v50  ;;  %v3871_v54 = vld [vmem:[#allocation2 + $0x9] sm:$0xff]  ;;  %v502_v58 = vmul.f32 %v3875_v56, %v3864_v50  ;;  %v606_v61 = vmul.f32 %v3883_v59, %v3864_v50 }
 0x2af   :  { %v1378_v57 = vmul.f32 %v3873_v55, %v3871_v54  ;;  %v710_v0 = vmul.f32 %v3893_v63, %v3864_v50  ;;  %v814_v3 = vmul.f32 %v3901_v2, %v3864_v50  ;;  %v918_v6 = vmul.f32 %v3909_v5, %v3864_v50 }
 0x2b0   :  { %303 = vrot.lane.b32.xlu1 %v294_v52, %s3763_s28  ;;  %407 = vrot.lane.b32.xlu0 %v398_v53, %s3764_s29  ;;  %v1022_v9 = vmul.f32 %v3917_v8, %v3864_v50  ;;  %v1126_v12 = vmul.f32 %v3925_v11, %v3864_v50  ;;  %v1230_v15 = vmul.f32 %v3933_v14, %v3864_v50  ;;  %v3997_v38 = vstv %s3509_s1  ;;  %s3490_s1 = sld [smem:[#allocation5 + $0x24]] }
 0x2b1   :  { %v1482_v18 = vmul.f32 %v3941_v17, %v3871_v54  ;;  %v1586_v21 = vmul.f32 %v3949_v20, %v3871_v54  ;;  %v1690_v24 = vmul.f32 %v3957_v23, %v3871_v54  ;;  %v1794_v28 = vmul.f32 %v3967_v27, %v3871_v54 }
 0x2b2   :  { %v1898_v33 = vmul.f32 %v3981_v32, %v3871_v54  ;;  %v2002_v36 = vmul.f32 %v3989_v35, %v3871_v54  ;;  %v2106_v39 = vmul.f32 %v3997_v38, %v3871_v54  ;;  %v2210_v41 = vmul.f32 %v4003_v40, %v3871_v54 }
 0x2b3   :  { %v2314_v43 = vmul.f32 %v4008_v42, %v3871_v54 }
 0x2b4   :  { %1387 = vrot.lane.b32.xlu1 %v1378_v57, %s3763_s28  ;;  %511 = vrot.lane.b32.xlu0 %v502_v58, %s3765_s8  ;;  %v4026_v58 = vstv %s251_s24  ;;  %s3502_s24 = sld [smem:[#allocation5 + $0x27]] }
 0x2b5   :  { %v3887_v60 = vld [vmem:[#allocation2] sm:$0xff] }
 0x2b6   :  { %v293_v62 = vmul.f32 %v3860_v48, %v3887_v60  ;;  %v397_v1 = vmul.f32 %v3862_v49, %v3887_v60  ;;  %v501_v4 = vmul.f32 %v3875_v56, %v3887_v60  ;;  %v605_v7 = vmul.f32 %v3883_v59, %v3887_v60  ;;  %v3965_v26 = vld [vmem:[#allocation2 + $0x1] sm:$0xff] }
 0x2b7   :  { %v709_v10 = vmul.f32 %v3893_v63, %v3887_v60  ;;  %v813_v13 = vmul.f32 %v3901_v2, %v3887_v60  ;;  %v917_v16 = vmul.f32 %v3909_v5, %v3887_v60  ;;  %v1021_v19 = vmul.f32 %v3917_v8, %v3887_v60 }
 0x2b8   :  { %615 = vrot.lane.b32.xlu0 %v606_v61, %s3766_s3  ;;  %301 = vrot.lane.b32.xlu1 %v293_v62, %s3763_s28  ;;  %v1125_v22 = vmul.f32 %v3925_v11, %v3887_v60  ;;  %v1229_v25 = vmul.f32 %v3933_v14, %v3887_v60  ;;  %v1481_v29 = vmul.f32 %v3941_v17, %v3965_v26 }
 0x2b9   :  { %v1377_v30 = vmul.f32 %v3873_v55, %v3965_v26  ;;  %v1585_v31 = vmul.f32 %v3949_v20, %v3965_v26  ;;  %v1689_v34 = vmul.f32 %v3957_v23, %v3965_v26  ;;  %v1793_v37 = vmul.f32 %v3967_v27, %v3965_v26 }
 0x2bc   :  { %719 = vrot.lane.b32.xlu0 %v710_v0, %s3767_s10  ;;  %405 = vrot.lane.b32.xlu1 %v397_v1, %s3764_s29 }
 0x2c0   :  { %823 = vrot.lane.b32.xlu0 %v814_v3, %s3768_s12  ;;  %509 = vrot.lane.b32.xlu1 %v501_v4, %s3765_s8  ;;  %v254_v3 = vmul.f32 %v4026_v58, %v3864_v50  ;;  %v4038_v4 = vstv %s235_s25  ;;  %s3506_s25 = sld [smem:[#allocation5 + $0x28]] }
 0x2c4   :  { %927 = vrot.lane.b32.xlu0 %v918_v6, %s3769_s14  ;;  %613 = vrot.lane.b32.xlu1 %v605_v7, %s3766_s3 }
 0x2c8   :  { %1031 = vrot.lane.b32.xlu0 %v1022_v9, %s3770_s16  ;;  %717 = vrot.lane.b32.xlu1 %v709_v10, %s3767_s10  ;;  %v258_v10 = vadd.f32 %v254_v3, %v4038_v4 }
 0x2cc   :  { %1135 = vrot.lane.b32.xlu0 %v1126_v12, %s3771_s18  ;;  %821 = vrot.lane.b32.xlu1 %v813_v13, %s3768_s12 }
 0x2d0   :  { %1239 = vrot.lane.b32.xlu0 %v1230_v15, %s3772_s20  ;;  %925 = vrot.lane.b32.xlu1 %v917_v16, %s3769_s14 }
 0x2d4   :  { %1491 = vrot.lane.b32.xlu0 %v1482_v18, %s3764_s29  ;;  %1029 = vrot.lane.b32.xlu1 %v1021_v19, %s3770_s16 }
 0x2d8   :  { %1595 = vrot.lane.b32.xlu0 %v1586_v21, %s3765_s8  ;;  %1133 = vrot.lane.b32.xlu1 %v1125_v22, %s3771_s18 }
 0x2dc   :  { %1699 = vrot.lane.b32.xlu0 %v1690_v24, %s3766_s3  ;;  %1237 = vrot.lane.b32.xlu1 %v1229_v25, %s3772_s20 }
 0x2e0   :  { %1803 = vrot.lane.b32.xlu0 %v1794_v28, %s3767_s10  ;;  %1489 = vrot.lane.b32.xlu1 %v1481_v29, %s3764_s29 }
 0x2e4   :  { %1385 = vrot.lane.b32.xlu0 %v1377_v30, %s3763_s28  ;;  %1593 = vrot.lane.b32.xlu1 %v1585_v31, %s3765_s8 }
 0x2e8   :  { %1907 = vrot.lane.b32.xlu0 %v1898_v33, %s3768_s12  ;;  %1697 = vrot.lane.b32.xlu1 %v1689_v34, %s3766_s3 }
 0x2ec   :  { %2011 = vrot.lane.b32.xlu0 %v2002_v36, %s3769_s14  ;;  %1801 = vrot.lane.b32.xlu1 %v1793_v37, %s3767_s10 }
 0x2f0   :  { %2115 = vrot.lane.b32.xlu0 %v2106_v39, %s3770_s16 }
 0x2f4   :  { %2219 = vrot.lane.b32.xlu0 %v2210_v41, %s3771_s18 }
 0x2f8   :  { %2323 = vrot.lane.b32.xlu0 %v2314_v43, %s3772_s20 }
 0x314   :  { %v225_v44 = vpop.permute.xlu1 %224 }
 0x315   :  { %234 = vst.msk [vmem:[#allocation2 + $0x20] sm:$0xff] %vm230_vm10, %v225_v44 }
 0x31c   :  { %v4015_v45 = vld [vmem:[#allocation2 + $0x20] sm:$0xff]  ;;  %v223_v46 = vpop.permute.xlu0 %222 }
 0x31d   :  { %233 = vst.msk [vmem:[#allocation2 + $0x18] sm:$0xff] %vm230_vm10, %v223_v46  ;;  %v296_v47 = vmul.f32 %v3860_v48, %v4015_v45  ;;  %v400_v51 = vmul.f32 %v3862_v49, %v4015_v45  ;;  %v504_v62 = vmul.f32 %v3875_v56, %v4015_v45  ;;  %v712_v15 = vmul.f32 %v3893_v63, %v4015_v45 }
 0x31e   :  { %v816_v21 = vmul.f32 %v3901_v2, %v4015_v45  ;;  %v920_v28 = vmul.f32 %v3909_v5, %v4015_v45  ;;  %vm2526_vm10 = vcmask 1041408  }
 0x31f   :  { %307 = vrot.lane.b32.xlu1 %v296_v47, %s3763_s28 }
 0x322   :  { %v408_v52 = vpop.permute.xlu0 %407  ;;  %v304_v53 = vpop.permute.xlu1 %303 }
 0x323   :  { %411 = vrot.lane.b32.xlu1 %v400_v51, %s3764_s29  ;;  %v314_v12 = vadd.f32 %v304_v53, %v258_v10 }
 0x324   :  { %v4024_v57 = vld [vmem:[#allocation2 + $0x18] sm:$0xff] }
 0x325   :  { %v399_v61 = vmul.f32 %v3862_v49, %v4024_v57  ;;  %v503_v6 = vmul.f32 %v3875_v56, %v4024_v57  ;;  %v608_v49 = vmul.f32 %v3883_v59, %v4015_v45  ;;  %v607_v13 = vmul.f32 %v3883_v59, %v4024_v57 }
 0x326   :  { %v512_v0 = vpop.permute.xlu0 %511  ;;  %v4032_v1 = vpop.permute.xlu1 %1387  ;;  %v418_v18 = vadd.f32 %v408_v52, %v314_v12  ;;  %v711_v19 = vmul.f32 %v3893_v63, %v4024_v57  ;;  %v815_v25 = vmul.f32 %v3901_v2, %v4024_v57  ;;  %v253_v63 = vmul.f32 %v4026_v58, %v3887_v60 }
 0x327   :  { %409 = vrot.lane.b32.xlu0 %v399_v61, %s3764_s29  ;;  %515 = vrot.lane.b32.xlu1 %v504_v62, %s3765_s8  ;;  %v919_v34 = vmul.f32 %v3909_v5, %v4024_v57  ;;  %v1024_v2 = vmul.f32 %v3917_v8, %v4015_v45  ;;  %v1023_v46 = vmul.f32 %v3917_v8, %v4024_v57  ;;  %v4080_v61 = vstv %s3477_s26  ;;  %s3510_s26 = sld [smem:[#allocation5 + $0x29]] }
 0x328   :  { %v522_v59 = vadd.f32 %v512_v0, %v418_v18  ;;  %v257_v39 = vadd.f32 %v253_v63, %v4038_v4  ;;  %v1128_v5 = vmul.f32 %v3925_v11, %v4015_v45  ;;  %v1127_v3 = vmul.f32 %v3925_v11, %v4024_v57 }
 0x329   :  { %v1232_v8 = vmul.f32 %v3933_v14, %v4015_v45  ;;  %v1338_v10 = vmul.f32 %v4080_v61, %v3871_v54  ;;  %v1231_v11 = vmul.f32 %v3933_v14, %v4024_v57 }
 0x32a   :  { %v616_v7 = vpop.permute.xlu0 %615  ;;  %v302_v9 = vpop.permute.xlu1 %301 }
 0x32b   :  { %513 = vrot.lane.b32.xlu0 %v503_v6, %s3765_s8  ;;  %619 = vrot.lane.b32.xlu1 %v608_v49, %s3766_s3  ;;  %v626_v31 = vadd.f32 %v616_v7, %v522_v59  ;;  %v313_v43 = vadd.f32 %v302_v9, %v257_v39  ;;  %v4086_v6 = vld [vmem:[#allocation2 + $0x21] sm:$0xff] }
 0x32e   :  { %v720_v16 = vpop.permute.xlu0 %719  ;;  %v406_v56 = vpop.permute.xlu1 %405 }
 0x32f   :  { %617 = vrot.lane.b32.xlu0 %v607_v13, %s3766_s3  ;;  %723 = vrot.lane.b32.xlu1 %v712_v15, %s3767_s10  ;;  %v730_v33 = vadd.f32 %v720_v16, %v626_v31  ;;  %v417_v52 = vadd.f32 %v406_v56, %v313_v43  ;;  %v1380_v16 = vmul.f32 %v3873_v55, %v4086_v6  ;;  %v4098_v56 = vld [vmem:[#allocation2 + $0x19] sm:$0xff] }
 0x330   :  { %v1587_v63 = vmul.f32 %v3949_v20, %v4098_v56  ;;  %v2003_v39 = vmul.f32 %v3989_v35, %v4098_v56 }
 0x332   :  { %v824_v22 = vpop.permute.xlu0 %823  ;;  %v510_v24 = vpop.permute.xlu1 %509 }
 0x333   :  { %721 = vrot.lane.b32.xlu0 %v711_v19, %s3767_s10  ;;  %827 = vrot.lane.b32.xlu1 %v816_v21, %s3768_s12  ;;  %v834_v41 = vadd.f32 %v824_v22, %v730_v33  ;;  %v521_v62 = vadd.f32 %v510_v24, %v417_v52  ;;  %v1379_v22 = vmul.f32 %v3873_v55, %v4098_v56  ;;  %v4170_v52 = vstv %s3446_s27  ;;  %s3514_s27 = sld [smem:[#allocation5 + $0x2a]] }
 0x334   :  { %v1484_v24 = vmul.f32 %v3941_v17, %v4086_v6  ;;  %v1337_v55 = vmul.f32 %v4080_v61, %v3965_v26  ;;  %v1692_v33 = vmul.f32 %v3957_v23, %v4086_v6 }
 0x336   :  { %v928_v29 = vpop.permute.xlu0 %927  ;;  %v614_v30 = vpop.permute.xlu1 %613 }
 0x337   :  { %825 = vrot.lane.b32.xlu0 %v815_v25, %s3768_s12  ;;  %931 = vrot.lane.b32.xlu1 %v920_v28, %s3769_s14  ;;  %v938_v44 = vadd.f32 %v928_v29, %v834_v41  ;;  %v625_v9 = vadd.f32 %v614_v30, %v521_v62  ;;  %v1483_v28 = vmul.f32 %v3941_v17, %v4098_v56 }
 0x338   :  { %v1588_v29 = vmul.f32 %v3949_v20, %v4086_v6  ;;  %v1691_v17 = vmul.f32 %v3957_v23, %v4098_v56  ;;  %v1795_v20 = vmul.f32 %v3967_v27, %v4098_v56  ;;  %v1899_v23 = vmul.f32 %v3981_v32, %v4098_v56 }
 0x339   :  { %v2001_v41 = vmul.f32 %v3989_v35, %v3965_v26  ;;  %v528_v62 = vmul.f32 %v4170_v52, %v3864_v50 }
 0x33a   :  { %v1032_v36 = vpop.permute.xlu0 %1031  ;;  %v718_v37 = vpop.permute.xlu1 %717 }
 0x33b   :  { %929 = vrot.lane.b32.xlu0 %v919_v34, %s3769_s14  ;;  %1035 = vrot.lane.b32.xlu1 %v1024_v2, %s3770_s16  ;;  %v1042_v53 = vadd.f32 %v1032_v36, %v938_v44  ;;  %v729_v13 = vadd.f32 %v718_v37, %v625_v9  ;;  %v295_v2 = vmul.f32 %v3860_v48, %v4024_v57 }
 0x33c   :  { %v1897_v36 = vmul.f32 %v3981_v32, %v3965_v26  ;;  %v1796_v48 = vmul.f32 %v3967_v27, %v4086_v6  ;;  %v2107_v27 = vmul.f32 %v3997_v38, %v4098_v56  ;;  %v1900_v44 = vmul.f32 %v3981_v32, %v4086_v6 }
 0x33d   :  { %v2315_v32 = vmul.f32 %v4008_v42, %v4098_v56 }
 0x33e   :  { %v1136_v47 = vpop.permute.xlu0 %1135  ;;  %v822_v51 = vpop.permute.xlu1 %821 }
 0x33f   :  { %1033 = vrot.lane.b32.xlu0 %v1023_v46, %s3770_s16  ;;  %1139 = vrot.lane.b32.xlu1 %v1128_v5, %s3771_s18  ;;  %v1146_v0 = vadd.f32 %v1136_v47, %v1042_v53  ;;  %v833_v19 = vadd.f32 %v822_v51, %v729_v13  ;;  %v2211_v46 = vmul.f32 %v4003_v40, %v4098_v56 }
 0x340   :  { %v2105_v5 = vmul.f32 %v3997_v38, %v3965_v26  ;;  %v2004_v51 = vmul.f32 %v3989_v35, %v4086_v6  ;;  %v4182_v35 = vstv %s3454_s30  ;;  %s3518_s30 = sld [smem:[#allocation5 + $0x2b]] }
 0x342   :  { %v1240_v49 = vpop.permute.xlu0 %1239  ;;  %v926_v7 = vpop.permute.xlu1 %925 }
 0x343   :  { %v1250_v12 = vadd.f32 %v1240_v49, %v1146_v0  ;;  %1137 = vrot.lane.b32.xlu0 %v1127_v3, %s3771_s18  ;;  %1243 = vrot.lane.b32.xlu1 %v1232_v8, %s3772_s20  ;;  %v937_v21 = vadd.f32 %v926_v7, %v833_v19  ;;  %v2209_v0 = vmul.f32 %v4003_v40, %v3965_v26  ;;  %v4192_v7 = vstv %s3450_s9  ;;  %s3434_s9 = sld [smem:[#allocation5 + $0x16]] }
 0x344   :  { %v735_v3 = vmul.f32 %v4182_v35, %v3887_v60  ;;  %v2108_v8 = vmul.f32 %v3997_v38, %v4086_v6  ;;  %v634_v9 = vmul.f32 %v4192_v7, %v4015_v45  ;;  %v4202_v38 = vstv %s3458_s4  ;;  %s3431_s4 = sld [smem:[#allocation8 + $0x1]] }
 0x345   :  { %v4092_v15 = vadd.f32 %v1338_v10, %v1250_v12  ;;  %v2313_v10 = vmul.f32 %v4008_v42, %v3965_v26  ;;  %v738_v19 = vmul.f32 %v4182_v35, %v4015_v45 }
 0x346   :  { %v1030_v18 = vpop.permute.xlu1 %1029  ;;  %v4140_v37 = vpop.permute.xlu0 %1491 }
 0x347   :  { %1241 = vrot.lane.b32.xlu0 %v1231_v11, %s3772_s20  ;;  %1391 = vrot.lane.b32.xlu1 %v1380_v16, %s3763_s28  ;;  %v1041_v14 = vadd.f32 %v1030_v18, %v937_v21  ;;  %v839_v11 = vmul.f32 %v4202_v38, %v3887_v60  ;;  %v2212_v16 = vmul.f32 %v4003_v40, %v4086_v6  ;;  %v4222_v40 = vstv %s3462_s11  ;;  %s3478_s11 = sld [smem:[#allocation5 + $0x21]] }
 0x348   :  { %v2316_v21 = vmul.f32 %v4008_v42, %v4086_v6 }
 0x34a   :  { %v1134_v59 = vpop.permute.xlu1 %1133  ;;  %v4150_v43 = vpop.permute.xlu0 %1595 }
 0x34b   :  { %1389 = vrot.lane.b32.xlu0 %v1379_v22, %s3763_s28  ;;  %1495 = vrot.lane.b32.xlu1 %v1484_v24, %s3764_s29  ;;  %v1145_v25 = vadd.f32 %v1134_v59, %v1041_v14  ;;  %v4224_v24 = vstv %s3438_s13  ;;  %v943_v59 = vmul.f32 %v4222_v40, %v3887_v60 }
 0x34c   :  { %v319_v14 = vmul.f32 %v4224_v24, %v3887_v60 }
 0x34e   :  { %v1238_v30 = vpop.permute.xlu1 %1237  ;;  %v4162_v47 = vpop.permute.xlu0 %1699 }
 0x34f   :  { %v1249_v31 = vadd.f32 %v1238_v30, %v1145_v25  ;;  %1493 = vrot.lane.b32.xlu0 %v1483_v28, %s3764_s29  ;;  %1599 = vrot.lane.b32.xlu1 %v1588_v29, %s3765_s8  ;;  %v842_v28 = vmul.f32 %v4202_v38, %v4015_v45  ;;  %v320_v29 = vmul.f32 %v4224_v24, %v3864_v50  ;;  %v4242_v30 = vstv %s3466_s15 }
 0x351   :  { %v4120_v34 = vadd.f32 %v1337_v55, %v1249_v31  ;;  %v4244_v31 = vstv %s3442_s17  ;;  %s3439_s17 = sld [smem:[#allocation5 + $0x2d]] }
 0x352   :  { %v4174_v53 = vpop.permute.xlu0 %1803  ;;  %v4198_v12 = vpop.permute.xlu1 %1489 }
 0x353   :  { %1597 = vrot.lane.b32.xlu0 %v1587_v63, %s3765_s8  ;;  %1703 = vrot.lane.b32.xlu1 %v1692_v33, %s3766_s3  ;;  %v1047_v63 = vmul.f32 %v4242_v30, %v3887_v60  ;;  %v423_v33 = vmul.f32 %v4244_v31, %v3887_v60 }
 0x356   :  { %v4188_v49 = vpop.permute.xlu0 %1385  ;;  %v4212_v18 = vpop.permute.xlu1 %1593 }
 0x357   :  { %1701 = vrot.lane.b32.xlu0 %v1691_v17, %s3766_s3  ;;  %305 = vrot.lane.b32.xlu1 %v295_v2, %s3763_s28 }
 0x35a   :  { %v4204_v13 = vpop.permute.xlu0 %1907  ;;  %v4230_v25 = vpop.permute.xlu1 %1697 }
 0x35b   :  { %1805 = vrot.lane.b32.xlu0 %v1795_v20, %s3767_s10  ;;  %1905 = vrot.lane.b32.xlu1 %v1897_v36, %s3768_s12  ;;  %v424_v20 = vmul.f32 %v4244_v31, %v3864_v50 }
 0x35e   :  { %v4218_v22 = vpop.permute.xlu0 %2011  ;;  %v4246_v55 = vpop.permute.xlu1 %1801 }
 0x35f   :  { %1909 = vrot.lane.b32.xlu0 %v1899_v23, %s3768_s12  ;;  %1807 = vrot.lane.b32.xlu1 %v1796_v48, %s3767_s10  ;;  %v322_v48 = vmul.f32 %v4224_v24, %v4015_v45 }
 0x362   :  { %v4234_v42 = vpop.permute.xlu0 %2115 }
 0x363   :  { %2013 = vrot.lane.b32.xlu0 %v2003_v39, %s3769_s14  ;;  %2009 = vrot.lane.b32.xlu1 %v2001_v41, %s3769_s14 }
 0x366   :  { %v4252_v17 = vpop.permute.xlu0 %2219 }
 0x367   :  { %2117 = vrot.lane.b32.xlu0 %v2107_v27, %s3770_s16  ;;  %1911 = vrot.lane.b32.xlu1 %v1900_v44, %s3768_s12  ;;  %v527_v27 = vmul.f32 %v4170_v52, %v3887_v60 }
 0x36a   :  { %v4259_v36 = vpop.permute.xlu0 %2323 }
 0x36b   :  { %2221 = vrot.lane.b32.xlu0 %v2211_v46, %s3771_s18  ;;  %2113 = vrot.lane.b32.xlu1 %v2105_v5, %s3770_s16  ;;  %v426_v5 = vmul.f32 %v4244_v31, %v4015_v45 }
 0x36f   :  { %2325 = vrot.lane.b32.xlu0 %v2315_v32, %s3772_s20  ;;  %2015 = vrot.lane.b32.xlu1 %v2004_v51, %s3769_s14  ;;  %v256_v32 = vmul.f32 %v4026_v58, %v4015_v45 }
 0x373   :  { %537 = vrot.lane.b32.xlu0 %v528_v62, %s3765_s8  ;;  %2217 = vrot.lane.b32.xlu1 %v2209_v0, %s3771_s18  ;;  %v631_v0 = vmul.f32 %v4192_v7, %v3887_v60  ;;  %v530_v60 = vmul.f32 %v4170_v52, %v4015_v45 }
 0x377   :  { %743 = vrot.lane.b32.xlu0 %v735_v3, %s3767_s10  ;;  %2119 = vrot.lane.b32.xlu1 %v2108_v8, %s3770_s16  ;;  %v260_v3 = vadd.f32 %v256_v32, %v4038_v4 }
 0x37b   :  { %645 = vrot.lane.b32.xlu0 %v634_v9, %s3766_s3  ;;  %2321 = vrot.lane.b32.xlu1 %v2313_v10, %s3772_s20 }
 0x37f   :  { %847 = vrot.lane.b32.xlu0 %v839_v11, %s3768_s12  ;;  %2223 = vrot.lane.b32.xlu1 %v2212_v16, %s3771_s18  ;;  %v632_v11 = vmul.f32 %v4192_v7, %v3864_v50 }
 0x383   :  { %749 = vrot.lane.b32.xlu0 %v738_v19, %s3767_s10  ;;  %2327 = vrot.lane.b32.xlu1 %v2316_v21, %s3772_s20 }
 0x387   :  { %951 = vrot.lane.b32.xlu0 %v943_v59, %s3769_s14  ;;  %327 = vrot.lane.b32.xlu1 %v319_v14, %s3763_s28 }
 0x38b   :  { %853 = vrot.lane.b32.xlu0 %v842_v28, %s3768_s12  ;;  %329 = vrot.lane.b32.xlu1 %v320_v29, %s3763_s28 }
 0x38f   :  { %1055 = vrot.lane.b32.xlu0 %v1047_v63, %s3770_s16  ;;  %431 = vrot.lane.b32.xlu1 %v423_v33, %s3764_s29  ;;  %v736_v33 = vmul.f32 %v4182_v35, %v3864_v50 }
 0x391   :  { %v308_v2 = vpop.permute.xlu1 %307 }
 0x392   :  { %v316_v8 = vadd.f32 %v308_v2, %v260_v3  ;;  %v1340_v3 = vmul.f32 %v4080_v61, %v4086_v6 }
 0x393   :  { %433 = vrot.lane.b32.xlu1 %v424_v20, %s3764_s29 }
 0x395   :  { %v412_v23 = vpop.permute.xlu1 %411 }
 0x396   :  { %v420_v16 = vadd.f32 %v412_v23, %v316_v8 }
 0x397   :  { %333 = vrot.lane.b32.xlu1 %v322_v48, %s3763_s28 }
 0x399   :  { %v4264_v39 = vpop.permute.xlu0 %409  ;;  %v516_v41 = vpop.permute.xlu1 %515 }
 0x39a   :  { %v524_v19 = vadd.f32 %v516_v41, %v420_v16  ;;  %v840_v41 = vmul.f32 %v4202_v38, %v3864_v50  ;;  %v1048_v16 = vmul.f32 %v4242_v30, %v3864_v50 }
 0x39b   :  { %535 = vrot.lane.b32.xlu1 %v527_v27, %s3765_s8 }
 0x39d   :  { %v4269_v44 = vpop.permute.xlu0 %513  ;;  %v620_v46 = vpop.permute.xlu1 %619 }
 0x39e   :  { %v628_v14 = vadd.f32 %v620_v46, %v524_v19 }
 0x39f   :  { %437 = vrot.lane.b32.xlu1 %v426_v5, %s3764_s29 }
 0x3a1   :  { %v4276_v51 = vpop.permute.xlu0 %617  ;;  %v724_v62 = vpop.permute.xlu1 %723 }
 0x3a2   :  { %v732_v28 = vadd.f32 %v724_v62, %v628_v14  ;;  %v944_v62 = vmul.f32 %v4222_v40, %v3864_v50 }
 0x3a3   :  { %639 = vrot.lane.b32.xlu1 %v631_v0, %s3766_s3 }
 0x3a5   :  { %v4282_v9 = vpop.permute.xlu0 %721  ;;  %v828_v10 = vpop.permute.xlu1 %827 }
 0x3a6   :  { %v836_v2 = vadd.f32 %v828_v10, %v732_v28 }
 0x3a7   :  { %641 = vrot.lane.b32.xlu1 %v632_v11, %s3766_s3 }
 0x3a9   :  { %v4287_v21 = vpop.permute.xlu0 %825  ;;  %v932_v59 = vpop.permute.xlu1 %931 }
 0x3aa   :  { %v940_v20 = vadd.f32 %v932_v59, %v836_v2 }
 0x3ab   :  { %541 = vrot.lane.b32.xlu1 %v530_v60, %s3765_s8  ;;  %v321_v60 = vmul.f32 %v4224_v24, %v4024_v57 }
 0x3ad   :  { %v930_v29 = vpop.permute.xlu0 %929  ;;  %v1036_v63 = vpop.permute.xlu1 %1035 }
 0x3ae   :  { %v1044_v27 = vadd.f32 %v1036_v63, %v940_v20  ;;  %v425_v63 = vmul.f32 %v4244_v31, %v4024_v57  ;;  %v529_v20 = vmul.f32 %v4170_v52, %v4024_v57 }
 0x3af   :  { %745 = vrot.lane.b32.xlu1 %v736_v33, %s3767_s10  ;;  %v255_v33 = vmul.f32 %v4026_v58, %v4024_v57 }
 0x3b1   :  { %v1034_v23 = vpop.permute.xlu0 %1033  ;;  %v1140_v48 = vpop.permute.xlu1 %1139  ;;  %v259_v24 = vadd.f32 %v255_v33, %v4038_v4  ;;  %v1398_v4 = vadd.f32 %v4032_v1, %v4092_v15 }
 0x3b2   :  { %v1148_v46 = vadd.f32 %v1140_v48, %v1044_v27  ;;  %v633_v27 = vmul.f32 %v4192_v7, %v4024_v57 }
 0x3b3   :  { %849 = vrot.lane.b32.xlu1 %v840_v41, %s3768_s12 }
 0x3b5   :  { %v1138_v5 = vpop.permute.xlu0 %1137  ;;  %v1244_v32 = vpop.permute.xlu1 %1243 }
 0x3b6   :  { %v1252_v0 = vadd.f32 %v1244_v32, %v1148_v46 }
 0x3b7   :  { %953 = vrot.lane.b32.xlu1 %v944_v62, %s3769_s14  ;;  %v737_v62 = vmul.f32 %v4182_v35, %v4024_v57  ;;  %v1502_v35 = vadd.f32 %v4140_v37, %v1398_v4  ;;  %v1049_v37 = vmul.f32 %v4242_v30, %v4024_v57 }
 0x3b8   :  { %v4303_v8 = vadd.f32 %v1340_v3, %v1252_v0  ;;  %v841_v3 = vmul.f32 %v4202_v38, %v4024_v57 }
 0x3b9   :  { %v1242_v10 = vpop.permute.xlu0 %1241  ;;  %v4305_v11 = vpop.permute.xlu1 %1391  ;;  %v1606_v38 = vadd.f32 %v4150_v43, %v1502_v35 }
 0x3bb   :  { %1057 = vrot.lane.b32.xlu1 %v1048_v16, %s3770_s16 }
 0x3bd   :  { %v1390_v19 = vpop.permute.xlu0 %1389  ;;  %v4310_v59 = vpop.permute.xlu1 %1495 }
 0x3bf   :  { %331 = vrot.lane.b32.xlu1 %v321_v60, %s3763_s28 }
 0x3c1   :  { %v1494_v14 = vpop.permute.xlu0 %1493  ;;  %v4315_v28 = vpop.permute.xlu1 %1599 }
 0x3c3   :  { %435 = vrot.lane.b32.xlu1 %v425_v63, %s3764_s29 }
 0x3c5   :  { %v4322_v2 = vpop.permute.xlu1 %1703  ;;  %v1598_v48 = vpop.permute.xlu0 %1597 }
 0x3c7   :  { %539 = vrot.lane.b32.xlu1 %v529_v20, %s3765_s8 }
 0x3c9   :  { %v306_v41 = vpop.permute.xlu1 %305  ;;  %v1702_v58 = vpop.permute.xlu0 %1701 }
 0x3ca   :  { %v315_v31 = vadd.f32 %v306_v41, %v259_v24 }
 0x3cb   :  { %643 = vrot.lane.b32.xlu1 %v633_v27, %s3766_s3 }
 0x3cc   :  { %v419_v46 = vadd.f32 %v4264_v39, %v315_v31 }
 0x3cd   :  { %v1906_v32 = vpop.permute.xlu1 %1905  ;;  %v1806_v16 = vpop.permute.xlu0 %1805 }
 0x3ce   :  { %v523_v52 = vadd.f32 %v4269_v44, %v419_v46  ;;  %v1397_v44 = vadd.f32 %v4188_v49, %v4120_v34  ;;  %v1710_v34 = vadd.f32 %v4162_v47, %v1606_v38 }
 0x3cf   :  { %747 = vrot.lane.b32.xlu1 %v737_v62, %s3767_s10 }
 0x3d0   :  { %v627_v0 = vadd.f32 %v4276_v51, %v523_v52  ;;  %v945_v51 = vmul.f32 %v4222_v40, %v4024_v57  ;;  %v4373_v52 = vstv %s3474_s21  ;;  %s3447_s21 = sld [smem:[#allocation5 + $0x2f]] }
 0x3d1   :  { %v4339_v7 = vpop.permute.xlu1 %1807  ;;  %v1910_v33 = vpop.permute.xlu0 %1909 }
 0x3d2   :  { %v731_v39 = vadd.f32 %v4282_v9, %v627_v0  ;;  %v1501_v9 = vadd.f32 %v4198_v12, %v1397_v44  ;;  %v1339_v12 = vmul.f32 %v4080_v61, %v4098_v56 }
 0x3d3   :  { %851 = vrot.lane.b32.xlu1 %v841_v3, %s3768_s12  ;;  %v1256_v3 = vmul.f32 %v4373_v52, %v3864_v50 }
 0x3d4   :  { %v835_v1 = vadd.f32 %v4287_v21, %v731_v39  ;;  %v4357_v21 = vstv %s3470_s19  ;;  %v1605_v43 = vadd.f32 %v4212_v18, %v1501_v9  ;;  %s3443_s19 = sld [smem:[#allocation5 + $0x2e]] }
 0x3d5   :  { %v2010_v15 = vpop.permute.xlu1 %2009  ;;  %v1152_v41 = vmul.f32 %v4357_v21, %v3864_v50  ;;  %v2014_v27 = vpop.permute.xlu0 %2013 }
 0x3d6   :  { %v939_v60 = vadd.f32 %v930_v29, %v835_v1  ;;  %v1814_v29 = vadd.f32 %v4174_v53, %v1710_v34  ;;  %v1709_v31 = vadd.f32 %v4230_v25, %v1605_v43  ;;  %v1400_v25 = vadd.f32 %v4305_v11, %v4303_v8 }
 0x3d7   :  { %955 = vrot.lane.b32.xlu1 %v945_v51, %s3769_s14 }
 0x3d8   :  { %v1043_v63 = vadd.f32 %v1034_v23, %v939_v60  ;;  %v1918_v47 = vadd.f32 %v4204_v13, %v1814_v29  ;;  %v1813_v13 = vadd.f32 %v4246_v55, %v1709_v31  ;;  %v4401_v29 = vstv %s3486_s0  ;;  %s3455_s0 = sld [smem:[#allocation5 + $0x31]] }
 0x3d9   :  { %v1912_v20 = vpop.permute.xlu1 %1911 }
 0x3da   :  { %v1147_v49 = vadd.f32 %v1138_v5, %v1043_v63  ;;  %v2022_v53 = vadd.f32 %v4218_v22, %v1918_v47  ;;  %v1917_v35 = vadd.f32 %v1906_v32, %v1813_v13 }
 0x3db   :  { %1059 = vrot.lane.b32.xlu1 %v1049_v37, %s3770_s16 }
 0x3dc   :  { %v1251_v24 = vadd.f32 %v1242_v10, %v1147_v49  ;;  %v1153_v10 = vmul.f32 %v4357_v21, %v4024_v57  ;;  %v2126_v61 = vadd.f32 %v4234_v42, %v2022_v53  ;;  %v2021_v8 = vadd.f32 %v2010_v15, %v1917_v35 }
 0x3dd   :  { %v2114_v23 = vpop.permute.xlu1 %2113  ;;  %v1509_v53 = vmul.f32 %v4401_v29, %v4098_v56 }
 0x3de   :  { %v1343_v5 = vadd.f32 %v1339_v12, %v1251_v24  ;;  %v2230_v4 = vadd.f32 %v4252_v17, %v2126_v61  ;;  %v2125_v1 = vadd.f32 %v2114_v23, %v2021_v8 }
 0x3df   :  { %1161 = vrot.lane.b32.xlu1 %v1152_v41, %s3771_s18  ;;  %v1508_v41 = vmul.f32 %v4401_v29, %v3871_v54 }
 0x3e0   :  { %v1399_v46 = vadd.f32 %v1390_v19, %v1343_v5  ;;  %v2118_v19 = vpop.permute.xlu0 %2117  ;;  %v4383_v42 = vadd.f32 %v4259_v36, %v2230_v4 }
 0x3e1   :  { %v2016_v18 = vpop.permute.xlu1 %2015 }
 0x3e2   :  { %v1503_v62 = vadd.f32 %v1494_v14, %v1399_v46  ;;  %v1504_v14 = vadd.f32 %v4310_v59, %v1400_v25  ;;  %v2420_v50 = vmin.f32 %v4383_v42, 0.0  ;;  %vm2416_vm12 = vcmp.gt.f32.partialorder %v4383_v42, 0.0 }
 0x3e3   :  { %1163 = vrot.lane.b32.xlu1 %v1153_v10, %s3771_s18 }
 0x3e4   :  { %v1607_v22 = vadd.f32 %v1598_v48, %v1503_v62  ;;  %v1608_v55 = vadd.f32 %v4315_v28, %v1504_v14  ;;  %v1257_v48 = vmul.f32 %v4373_v52, %v4024_v57  ;;  %v2222_v59 = vpop.permute.xlu0 %2221  ;;  %v2425_v60 = vmul.f32 1.442695, %v2420_v50 }
 0x3e5   :  { %v2218_v0 = vpop.permute.xlu1 %2217 }
 0x3e6   :  { %v1711_v39 = vadd.f32 %v1702_v58, %v1607_v22  ;;  %v1712_v36 = vadd.f32 %v4322_v2, %v1608_v55  ;;  %v2229_v28 = vadd.f32 %v2218_v0, %v2125_v1  ;;  %3646 = vpow2.f32 %v2425_v60 }
 0x3e7   :  { %1265 = vrot.lane.b32.xlu1 %v1256_v3, %s3772_s20  ;;  %v4423_v0 = vstv %s3494_s2  ;;  %v4451_v1 = vstv %s3498_s23  ;;  %s3463_s2 = sld [smem:[#allocation5 + $0x33]] }
 0x3e8   :  { %v1815_v17 = vadd.f32 %v1806_v16, %v1711_v39  ;;  %v1816_v58 = vadd.f32 %v4339_v7, %v1712_v36  ;;  %v4394_v16 = vstv %s3482_s22  ;;  %v2326_v34 = vpop.permute.xlu0 %2325  ;;  %v4431_v39 = vld [vmem:[#allocation2 + $0x9] sm:$0xff]  ;;  %s3451_s22 = sld [smem:[#allocation5 + $0x30]] }
 0x3e9   :  { %v2120_v11 = vpop.permute.xlu1 %2119  ;;  %v1403_v51 = vmul.f32 %v4394_v16, %v3965_v26  ;;  %v1405_v7 = vmul.f32 %v4394_v16, %v4098_v56  ;;  %v1716_v35 = vmul.f32 %v4431_v39, %v4423_v0  ;;  %s3467_s23 = sld [smem:[#allocation5 + $0x34]] }
 0x3ea   :  { %v1919_v44 = vadd.f32 %v1910_v33, %v1815_v17  ;;  %v1920_v9 = vadd.f32 %v1912_v20, %v1816_v58 }
 0x3eb   :  { %1267 = vrot.lane.b32.xlu1 %v1257_v48, %s3772_s20 }
 0x3ec   :  { %v2023_v32 = vadd.f32 %v2014_v27, %v1919_v44  ;;  %v2024_v33 = vadd.f32 %v2016_v18, %v1920_v9  ;;  %v4411_v18 = vstv %s3490_s1  ;;  %v1717_v44 = vmul.f32 %v4423_v0, %v4098_v56  ;;  %s3459_s1 = sld [smem:[#allocation5 + $0x32]] }
 0x3ed   :  { %v2322_v15 = vpop.permute.xlu1 %2321  ;;  %v1612_v61 = vmul.f32 %v4411_v18, %v3871_v54  ;;  %v1613_v25 = vmul.f32 %v4411_v18, %v4098_v56 }
 0x3ee   :  { %v2127_v38 = vadd.f32 %v2118_v19, %v2023_v32  ;;  %v2333_v63 = vadd.f32 %v2322_v15, %v2229_v28  ;;  %v2128_v24 = vadd.f32 %v2120_v11, %v2024_v33 }
 0x3ef   :  { %1411 = vrot.lane.b32.xlu1 %v1403_v51, %s3763_s28  ;;  %v1820_v51 = vmul.f32 %v4431_v39, %v4451_v1 }
 0x3f0   :  { %v2231_v2 = vadd.f32 %v2222_v59, %v2127_v38  ;;  %v2419_v37 = vmin.f32 %v2333_v63, 0.0  ;;  %vm2415_vm11 = vcmp.gt.f32.partialorder %v2333_v63, 0.0 }
 0x3f1   :  { %v2224_v49 = vpop.permute.xlu1 %2223 }
 0x3f2   :  { %v2335_v43 = vadd.f32 %v2326_v34, %v2231_v2  ;;  %v2423_v26 = vmul.f32 1.442695, %v2419_v37  ;;  %v2232_v12 = vadd.f32 %v2224_v49, %v2128_v24  ;;  %v4467_v2 = vstv %s3502_s24  ;;  %s3471_s24 = sld [smem:[#allocation5 + $0x35]] }
 0x3f3   :  { %1415 = vrot.lane.b32.xlu1 %v1405_v7, %s3763_s28  ;;  %v3647_v62 = vpop.eup %3646  ;;  %v1924_v37 = vmul.f32 %v4431_v39, %v4467_v2  ;;  %v1925_v49 = vmul.f32 %v4467_v2, %v4098_v56  ;;  %v4479_v7 = vstv %s3506_s25  ;;  %s3475_s25 = sld [smem:[#allocation5 + $0x36]] }
 0x3f4   :  { %v2421_v20 = vmin.f32 %v2335_v43, 0.0  ;;  %3648 = vpow2.f32 %v2423_v26  ;;  %v3522_v22 = vadd.f32 -1.0, %v3647_v62  ;;  %vm2417_vm14 = vcmp.gt.f32.partialorder %v2335_v43, 0.0 }
 0x3f5   :  { %v2328_v23 = vpop.permute.xlu1 %2327  ;;  %v2028_v24 = vmul.f32 %v4431_v39, %v4479_v7 }
 0x3f6   :  { %v2427_v47 = vmul.f32 1.442695, %v2421_v20  ;;  %v2336_v5 = vadd.f32 %v2328_v23, %v2232_v12  ;;  %v4436_v55 = vsel %vm2416_vm12, %v4383_v42, %v3522_v22  ;;  %v2029_v20 = vmul.f32 %v4479_v7, %v4098_v56 }
 0x3f7   :  { %1517 = vrot.lane.b32.xlu1 %v1508_v41, %s3764_s29  ;;  %v2441_v50 = vsel %vm2439_vm13, %v4436_v55, 0.0  ;;  %v4491_v12 = vstv %s3510_s26  ;;  %v946_v23 = vmul.f32 %v4222_v40, %v4015_v45  ;;  %v4511_v40 = vstv %s3514_s27  ;;  %s3483_s26 = sld [smem:[#allocation5 + $0x38]] }
 0x3f8   :  { %3650 = vpow2.f32 %v2427_v47  ;;  %v2422_v27 = vmin.f32 %v2336_v5, 0.0  ;;  %vm2418_vm15 = vcmp.gt.f32.partialorder %v2336_v5, 0.0  ;;  %v2132_v47 = vmul.f32 %v4431_v39, %v4491_v12  ;;  %s3487_s27 = sld [smem:[#allocation5 + $0x39]] }
 0x3f9   :  { %v4407_v31 = vpop.permute.xlu1 %327 }
 0x3fa   :  { %v2429_v46 = vmul.f32 1.442695, %v2422_v27 }
 0x3fb   :  { %1519 = vrot.lane.b32.xlu1 %v1509_v53, %s3764_s29 }
 0x3fc   :  { %3652 = vpow2.f32 %v2429_v46  ;;  %v2133_v46 = vmul.f32 %v4491_v12, %v4098_v56 }
 0x3fd   :  { %v4414_v10 = vpop.permute.xlu1 %329 }
 0x3ff   :  { %1621 = vrot.lane.b32.xlu1 %v1612_v61, %s3765_s8  ;;  %v1050_v61 = vmul.f32 %v4242_v30, %v4015_v45  ;;  %v1154_v30 = vmul.f32 %v4357_v21, %v4015_v45 }
 0x401   :  { %v3649_v13 = vpop.eup %3648  ;;  %v4419_v4 = vpop.permute.xlu1 %431 }
 0x402   :  { %v3521_v19 = vadd.f32 -1.0, %v3649_v13  ;;  %v2236_v13 = vmul.f32 %v4431_v39, %v4511_v40 }
 0x403   :  { %1623 = vrot.lane.b32.xlu1 %v1613_v25, %s3765_s8 }
 0x404   :  { %v4426_v3 = vsel %vm2415_vm11, %v2333_v63, %v3521_v19  ;;  %v1821_v63 = vmul.f32 %v4451_v1, %v4098_v56  ;;  %v2237_v19 = vmul.f32 %v4511_v40, %v4098_v56  ;;  %vm2529_vm11 = vcmask 1042432  }
 0x405   :  { %v3651_v54 = vpop.eup %3650  ;;  %v4429_v14 = vpop.permute.xlu1 %433  ;;  %v2440_v8 = vsel %vm2439_vm13, %v4426_v3, 0.0 }
 0x406   :  { %v3523_v17 = vadd.f32 -1.0, %v3651_v54  ;;  %v2442_v58 = vadd.f32 %v2441_v50, %v2440_v8  ;;  %v4527_v54 = vstv %s3518_s30  ;;  %v1258_v8 = vmul.f32 %v4373_v52, %v4015_v45  ;;  %s3491_s30 = sld [smem:[#allocation5 + $0x3a]] }
 0x407   :  { %1725 = vrot.lane.b32.xlu1 %v1716_v35, %s3766_s3  ;;  %v2341_v50 = vmul.f32 %v4527_v54, %v4098_v56 }
 0x408   :  { %v4441_v11 = vsel %vm2417_vm14, %v2335_v43, %v3523_v17  ;;  %v2340_v17 = vmul.f32 %v4431_v39, %v4527_v54 }
 0x409   :  { %v3653_v48 = vpop.eup %3652  ;;  %v4445_v36 = vpop.permute.xlu1 %333  ;;  %v2443_v42 = vsel %vm2439_vm13, %v4441_v11, 0.0 }
 0x40a   :  { %v3524_v59 = vadd.f32 -1.0, %v3653_v48  ;;  %v2444_v28 = vadd.f32 %v2443_v42, %v2442_v58 }
 0x40b   :  { %1727 = vrot.lane.b32.xlu1 %v1717_v44, %s3766_s3  ;;  %v4544_v44 = vstv %s3434_s9  ;;  %s3495_s9 = sld [smem:[#allocation5 + $0x3b]] }
 0x40c   :  { %v4454_v32 = vsel %vm2418_vm15, %v2336_v5, %v3524_v59  ;;  %v4502_v5 = vld [vmem:[#allocation2] sm:$0xff]  ;;  %v4547_v59 = vld [vmem:[#allocation2 + $0x8] sm:$0xff] }
 0x40d   :  { %v4456_v15 = vpop.permute.xlu1 %535  ;;  %v2445_v60 = vsel %vm2439_vm13, %v4454_v32, 0.0  ;;  %v1151_v27 = vmul.f32 %v4502_v5, %v4357_v21  ;;  %v1255_v25 = vmul.f32 %v4502_v5, %v4373_v52  ;;  %v1404_v21 = vmul.f32 %v4431_v39, %v4394_v16  ;;  %v4551_v52 = vld [vmem:[#allocation2 + $0x1] sm:$0xff] }
 0x40e   :  { %v2446_v38 = vadd.f32 %v2445_v60, %v2444_v28  ;;  %v264_v45 = vmul.f32 %v4547_v59, %v4544_v44  ;;  %v1507_v58 = vmul.f32 %v4551_v52, %v4401_v29  ;;  %v4555_v28 = vstv %s3431_s4  ;;  %s3499_s4 = sld [smem:[#allocation5 + $0x3c]] }
 0x40f   :  { %1829 = vrot.lane.b32.xlu1 %v1820_v51, %s3767_s10 }
 0x410   :  { %2447 = vadd.xlane.f32.xlu0 %v2446_v38  ;;  %v268_v60 = vadd.f32 %v264_v45, %v4555_v28  ;;  %v1406_v38 = vmul.f32 %v4394_v16, %v4086_v6 }
 0x411   :  { %v4463_v9 = vpop.permute.xlu1 %437 }
 0x413   :  { %1831 = vrot.lane.b32.xlu1 %v1821_v63, %s3767_s10 }
 0x415   :  { %v4470_v33 = vpop.permute.xlu1 %639 }
 0x417   :  { %1933 = vrot.lane.b32.xlu1 %v1924_v37, %s3768_s12  ;;  %v340_v37 = vadd.f32 %v4414_v10, %v268_v60  ;;  %v1510_v10 = vmul.f32 %v4401_v29, %v4086_v6 }
 0x419   :  { %v4475_v34 = vpop.permute.xlu1 %641 }
 0x41b   :  { %1935 = vrot.lane.b32.xlu1 %v1925_v49, %s3768_s12  ;;  %v265_v49 = vmul.f32 %v4544_v44, %v4024_v57 }
 0x41d   :  { %v4482_v43 = vpop.permute.xlu1 %541 }
 0x41f   :  { %2037 = vrot.lane.b32.xlu1 %v2028_v24, %s3769_s14  ;;  %v444_v24 = vadd.f32 %v4429_v14, %v340_v37 }
 0x421   :  { %v4487_v26 = vpop.permute.xlu1 %745 }
 0x423   :  { %2039 = vrot.lane.b32.xlu1 %v2029_v20, %s3769_s14  ;;  %v1611_v20 = vmul.f32 %v4551_v52, %v4411_v18 }
 0x425   :  { %v4496_v41 = vpop.permute.xlu1 %849 }
 0x426   :  { %957 = vrot.lane.b32.xlu0 %v946_v23, %s3769_s14 }
 0x427   :  { %2141 = vrot.lane.b32.xlu1 %v2132_v47, %s3770_s16  ;;  %v269_v47 = vadd.f32 %v265_v49, %v4555_v28  ;;  %v1923_v49 = vmul.f32 %v4551_v52, %v4467_v2 }
 0x429   :  { %v4506_v53 = vpop.permute.xlu1 %953 }
 0x42a   :  { %1159 = vrot.lane.b32.xlu0 %v1151_v27, %s3771_s18  ;;  %v538_v27 = vpop.permute.xlu0 %537 }
 0x42b   :  { %2143 = vrot.lane.b32.xlu1 %v2133_v46, %s3770_s16  ;;  %v548_v16 = vadd.f32 %v538_v27, %v444_v24 }
 0x42d   :  { %v4516_v62 = vpop.permute.xlu1 %1057  ;;  %v652_v57 = vadd.f32 %v4475_v34, %v548_v16  ;;  %v1614_v34 = vmul.f32 %v4411_v18, %v4086_v6  ;;  %v2235_v16 = vmul.f32 %v4551_v52, %v4511_v40 }
 0x42e   :  { %1061 = vrot.lane.b32.xlu0 %v1050_v61, %s3770_s16 }
 0x42f   :  { %2245 = vrot.lane.b32.xlu1 %v2236_v13, %s3771_s18  ;;  %v756_v14 = vadd.f32 %v4487_v26, %v652_v57 }
 0x431   :  { %v332_v22 = vpop.permute.xlu1 %331 }
 0x432   :  { %1263 = vrot.lane.b32.xlu0 %v1255_v25, %s3772_s20  ;;  %v341_v46 = vadd.f32 %v332_v22, %v269_v47  ;;  %v744_v47 = vpop.permute.xlu0 %743 }
 0x433   :  { %2247 = vrot.lane.b32.xlu1 %v2237_v19, %s3771_s18  ;;  %v1715_v19 = vmul.f32 %v4551_v52, %v4423_v0 }
 0x435   :  { %v436_v35 = vpop.permute.xlu1 %435 }
 0x436   :  { %1165 = vrot.lane.b32.xlu0 %v1154_v30, %s3771_s18  ;;  %v445_v13 = vadd.f32 %v436_v35, %v341_v46  ;;  %v646_v27 = vpop.permute.xlu0 %645 }
 0x437   :  { %2349 = vrot.lane.b32.xlu1 %v2340_v17, %s3772_s20  ;;  %v860_v17 = vadd.f32 %v4496_v41, %v756_v14  ;;  %v1819_v41 = vmul.f32 %v4551_v52, %v4451_v1 }
 0x439   :  { %v540_v48 = vpop.permute.xlu1 %539  ;;  %v964_v29 = vadd.f32 %v4506_v53, %v860_v17 }
 0x43a   :  { %1269 = vrot.lane.b32.xlu0 %v1258_v8, %s3772_s20  ;;  %v549_v25 = vadd.f32 %v540_v48, %v445_v13  ;;  %v4584_v48 = vstv %s3478_s11  ;;  %v848_v46 = vpop.permute.xlu0 %847  ;;  %v2238_v13 = vmul.f32 %v4511_v40, %v4086_v6  ;;  %s3503_s11 = sld [smem:[#allocation5 + $0x3d]] }
 0x43b   :  { %2351 = vrot.lane.b32.xlu1 %v2341_v50, %s3772_s20  ;;  %v1068_v50 = vadd.f32 %v4516_v62, %v964_v29  ;;  %v1348_v18 = vmul.f32 %v4431_v39, %v4584_v48  ;;  %v1718_v62 = vmul.f32 %v4423_v0, %v4086_v6  ;;  %v1349_v37 = vmul.f32 %v4584_v48, %v4098_v56 }
 0x43c   :  { %v2027_v0 = vmul.f32 %v4551_v52, %v4479_v7  ;;  %v1926_v56 = vmul.f32 %v4467_v2, %v4086_v6  ;;  %v2134_v2 = vmul.f32 %v4491_v12, %v4086_v6 }
 0x43d   :  { %v644_v42 = vpop.permute.xlu1 %643 }
 0x43e   :  { %1413 = vrot.lane.b32.xlu0 %v1404_v21, %s3763_s28  ;;  %v653_v22 = vadd.f32 %v644_v42, %v549_v25  ;;  %v263_v25 = vmul.f32 %v4502_v5, %v4544_v44 }
 0x441   :  { %v748_v51 = vpop.permute.xlu1 %747 }
 0x442   :  { %1515 = vrot.lane.b32.xlu0 %v1507_v58, %s3764_s29  ;;  %v757_v8 = vadd.f32 %v748_v51, %v653_v22 }
 0x445   :  { %v852_v63 = vpop.permute.xlu1 %851 }
 0x446   :  { %1417 = vrot.lane.b32.xlu0 %v1406_v38, %s3763_s28  ;;  %v861_v26 = vadd.f32 %v852_v63, %v757_v8  ;;  %v4646_v8 = vld [vmem:[#allocation2 + $0x20] sm:$0xff] }
 0x449   :  { %v956_v23 = vpop.permute.xlu1 %955 }
 0x44a   :  { %1619 = vrot.lane.b32.xlu0 %v1611_v20, %s3765_s8  ;;  %v965_v21 = vadd.f32 %v956_v23, %v861_v26  ;;  %v1822_v20 = vmul.f32 %v4451_v1, %v4086_v6  ;;  %v2131_v23 = vmul.f32 %v4551_v52, %v4491_v12  ;;  %v2030_v1 = vmul.f32 %v4479_v7, %v4086_v6  ;;  %v750_v7 = vpop.permute.xlu0 %749 }
 0x44b   :  { %v2342_v12 = vmul.f32 %v4527_v54, %v4086_v6  ;;  %v266_v6 = vmul.f32 %v4646_v8, %v4544_v44 }
 0x44d   :  { %v1060_v61 = vpop.permute.xlu1 %1059  ;;  %v270_v26 = vadd.f32 %v266_v6, %v4555_v28 }
 0x44e   :  { %1521 = vrot.lane.b32.xlu0 %v1510_v10, %s3764_s29  ;;  %v1069_v58 = vadd.f32 %v1060_v61, %v965_v21  ;;  %v2339_v61 = vmul.f32 %v4551_v52, %v4527_v54  ;;  %v952_v14 = vpop.permute.xlu0 %951 }
 0x451   :  { %v1162_v30 = vpop.permute.xlu1 %1161 }
 0x452   :  { %1723 = vrot.lane.b32.xlu0 %v1715_v19, %s3766_s3  ;;  %v1172_v45 = vadd.f32 %v1162_v30, %v1068_v50  ;;  %v267_v30 = vadd.f32 %v263_v25, %v4555_v28  ;;  %v854_v17 = vpop.permute.xlu0 %853 }
 0x454   :  { %v339_v22 = vadd.f32 %v4407_v31, %v267_v30  ;;  %v342_v31 = vadd.f32 %v4445_v36, %v270_v26 }
 0x455   :  { %v1164_v35 = vpop.permute.xlu1 %1163 }
 0x456   :  { %1625 = vrot.lane.b32.xlu0 %v1614_v34, %s3765_s8  ;;  %v1173_v51 = vadd.f32 %v1164_v35, %v1069_v58  ;;  %v443_v40 = vadd.f32 %v4419_v4, %v339_v22  ;;  %v1056_v34 = vpop.permute.xlu0 %1055  ;;  %v446_v4 = vadd.f32 %v4463_v9, %v342_v31 }
 0x458   :  { %v547_v54 = vadd.f32 %v4456_v15, %v443_v40  ;;  %v550_v15 = vadd.f32 %v4482_v43, %v446_v4  ;;  %v1347_v43 = vmul.f32 %v4551_v52, %v4584_v48 }
 0x459   :  { %v1266_v42 = vpop.permute.xlu1 %1265 }
 0x45a   :  { %v1276_v53 = vadd.f32 %v1266_v42, %v1172_v45  ;;  %1827 = vrot.lane.b32.xlu0 %v1819_v41, %s3767_s10  ;;  %v651_v35 = vadd.f32 %v4470_v33, %v547_v54 }
 0x45c   :  { %v4593_v60 = vadd.f32 %v1348_v18, %v1276_v53  ;;  %v755_v45 = vadd.f32 %v744_v47, %v651_v35 }
 0x45d   :  { %v1268_v38 = vpop.permute.xlu1 %1267 }
 0x45e   :  { %v1277_v63 = vadd.f32 %v1268_v38, %v1173_v51  ;;  %1729 = vrot.lane.b32.xlu0 %v1718_v62, %s3766_s3  ;;  %v859_v44 = vadd.f32 %v848_v46, %v755_v45  ;;  %v654_v62 = vadd.f32 %v646_v27, %v550_v15 }
 0x460   :  { %v4600_v24 = vadd.f32 %v1349_v37, %v1277_v63  ;;  %v963_v28 = vadd.f32 %v952_v14, %v859_v44 }
 0x461   :  { %v4623_v10 = vpop.permute.xlu1 %1411 }
 0x462   :  { %1931 = vrot.lane.b32.xlu0 %v1923_v49, %s3768_s12  ;;  %v758_v49 = vadd.f32 %v750_v7, %v654_v62 }
 0x465   :  { %v4629_v57 = vpop.permute.xlu1 %1415 }
 0x466   :  { %1833 = vrot.lane.b32.xlu0 %v1822_v20, %s3767_s10  ;;  %v1067_v20 = vadd.f32 %v1056_v34, %v963_v28 }
 0x469   :  { %v4638_v19 = vpop.permute.xlu1 %1517 }
 0x46a   :  { %2035 = vrot.lane.b32.xlu0 %v2027_v0, %s3769_s14 }
 0x46d   :  { %v4643_v29 = vpop.permute.xlu1 %1519 }
 0x46e   :  { %1937 = vrot.lane.b32.xlu0 %v1926_v56, %s3768_s12 }
 0x471   :  { %v1622_v50 = vpop.permute.xlu1 %1621 }
 0x472   :  { %2139 = vrot.lane.b32.xlu0 %v2131_v23, %s3770_s16  ;;  %v862_v23 = vadd.f32 %v854_v17, %v758_v49 }
 0x475   :  { %v4655_v42 = vpop.permute.xlu1 %1623 }
 0x476   :  { %2041 = vrot.lane.b32.xlu0 %v2030_v1, %s3769_s14 }
 0x479   :  { %v1726_v38 = vpop.permute.xlu1 %1725 }
 0x47a   :  { %2243 = vrot.lane.b32.xlu0 %v2235_v16, %s3771_s18 }
 0x47d   :  { %v4658_v9 = vpop.permute.xlu1 %1727 }
 0x47e   :  { %2145 = vrot.lane.b32.xlu0 %v2134_v2, %s3770_s16 }
 0x481   :  { %v1830_v2 = vpop.permute.xlu1 %1829 }
 0x482   :  { %2347 = vrot.lane.b32.xlu0 %v2339_v61, %s3772_s20 }
 0x485   :  { %v1832_v25 = vpop.permute.xlu1 %1831 }
 0x486   :  { %2249 = vrot.lane.b32.xlu0 %v2238_v13, %s3771_s18 }
 0x489   :  { %v1934_v40 = vpop.permute.xlu1 %1933 }
 0x48a   :  { %2353 = vrot.lane.b32.xlu0 %v2342_v12, %s3772_s20  ;;  %v4664_v12 = vld [vmem:[#allocation2 + $0x21] sm:$0xff] }
 0x48b   :  { %v1350_v14 = vmul.f32 %v4664_v12, %v4584_v48 }
 0x48d   :  { %v1936_v54 = vpop.permute.xlu1 %1935 }
 0x491   :  { %v2038_v26 = vpop.permute.xlu1 %2037 }
 0x495   :  { %v2040_v31 = vpop.permute.xlu1 %2039 }
 0x499   :  { %v2448_v21 = vpop.xlane.xlu0 %2447 }
 0x49a   :  { %v2449_v41 = vrot.slane %v2448_v21, 4 }
 0x49c   :  { %v2450_v58 = vadd.f32 %v2449_v41, %v2448_v21 }
 0x49d   :  { %v958_v53 = vpop.permute.xlu0 %957 }
 0x49e   :  { %v2451_v18 = vrot.slane %v2450_v58, 2  ;;  %v966_v1 = vadd.f32 %v958_v53, %v862_v23 }
 0x4a0   :  { %v2452_v51 = vadd.f32 %v2451_v18, %v2450_v58  ;;  %v2142_v58 = vpop.permute.xlu1 %2141 }
 0x4a1   :  { %v1160_v33 = vpop.permute.xlu0 %1159 }
 0x4a2   :  { %v2453_v63 = vrot.slane %v2452_v51, 1  ;;  %v1171_v0 = vadd.f32 %v1160_v33, %v1067_v20 }
 0x4a4   :  { %v2454_v37 = vadd.f32 %v2453_v63, %v2452_v51  ;;  %v2144_v15 = vpop.permute.xlu1 %2143 }
 0x4a5   :  { %v1062_v36 = vpop.permute.xlu0 %1061 }
 0x4a6   :  { %3593 = vpush %v2454_v37  ;;  %v1070_v46 = vadd.f32 %v1062_v36, %v966_v1 }
 0x4a8   :  { %v2246_v36 = vpop.permute.xlu1 %2245 }
 0x4a9   :  { %v1264_v56 = vpop.permute.xlu0 %1263 }
 0x4aa   :  { %v1275_v47 = vadd.f32 %v1264_v56, %v1171_v0  ;;  %v1425_v0 = vadd.f32 %v4629_v57, %v4600_v24 }
 0x4ac   :  { %v4662_v16 = vadd.f32 %v1347_v43, %v1275_v47  ;;  %v1529_v47 = vadd.f32 %v4643_v29, %v1425_v0 }
 0x4ad   :  { %v1166_v27 = vpop.permute.xlu0 %1165 }
 0x4ae   :  { %v1174_v61 = vadd.f32 %v1166_v27, %v1070_v46  ;;  %v2248_v27 = vpop.permute.xlu1 %2247  ;;  %v1423_v24 = vadd.f32 %v4623_v10, %v4662_v16 }
 0x4b1   :  { %v1270_v13 = vpop.permute.xlu0 %1269 }
 0x4b2   :  { %v1278_v7 = vadd.f32 %v1270_v13, %v1174_v61  ;;  %v1633_v61 = vadd.f32 %v4655_v42, %v1529_v47 }
 0x4b4   :  { %v4668_v30 = vadd.f32 %v1350_v14, %v1278_v7  ;;  %v1737_v7 = vadd.f32 %v4658_v9, %v1633_v61  ;;  %v4739_v61 = vstv %s3447_s21  ;;  %s3435_s21 = sld [smem:[#allocation5 + $0x2c]] }
 0x4b5   :  { %v1414_v17 = vpop.permute.xlu0 %1413 }
 0x4b6   :  { %v1424_v45 = vadd.f32 %v1414_v17, %v4593_v60  ;;  %v1841_v57 = vadd.f32 %v1832_v25, %v1737_v7  ;;  %v554_v7 = vmul.f32 %v4547_v59, %v4739_v61 }
 0x4b8   :  { %v1528_v48 = vadd.f32 %v4638_v19, %v1424_v45  ;;  %v1945_v29 = vadd.f32 %v1936_v54, %v1841_v57 }
 0x4b9   :  { %v1516_v22 = vpop.permute.xlu0 %1515 }
 0x4ba   :  { %v1632_v53 = vadd.f32 %v1622_v50, %v1528_v48  ;;  %v1527_v45 = vadd.f32 %v1516_v22, %v1423_v24 }
 0x4bc   :  { %v1736_v18 = vadd.f32 %v1726_v38, %v1632_v53 }
 0x4bd   :  { %v4670_v6 = vpop.permute.xlu0 %1417 }
 0x4be   :  { %v1840_v50 = vadd.f32 %v1830_v2, %v1736_v18  ;;  %v1426_v9 = vadd.f32 %v4670_v6, %v4668_v30 }
 0x4c0   :  { %v1944_v49 = vadd.f32 %v1934_v40, %v1840_v50  ;;  %v2350_v40 = vpop.permute.xlu1 %2349 }
 0x4c1   :  { %v1620_v34 = vpop.permute.xlu0 %1619 }
 0x4c2   :  { %v2048_v2 = vadd.f32 %v2038_v26, %v1944_v49  ;;  %v1631_v48 = vadd.f32 %v1620_v34, %v1527_v45  ;;  %v2049_v26 = vadd.f32 %v2040_v31, %v1945_v29 }
 0x4c4   :  { %v2152_v14 = vadd.f32 %v2142_v58, %v2048_v2  ;;  %v2153_v42 = vadd.f32 %v2144_v15, %v2049_v26  ;;  %v2352_v50 = vpop.permute.xlu1 %2351 }
 0x4c5   :  { %v4672_v35 = vpop.permute.xlu0 %1521 }
 0x4c6   :  { %v2256_v53 = vadd.f32 %v2246_v36, %v2152_v14  ;;  %v2257_v10 = vadd.f32 %v2248_v27, %v2153_v42  ;;  %v1530_v25 = vadd.f32 %v4672_v35, %v1426_v9  ;;  %v4763_v9 = vstv %s3455_s0 }
 0x4c8   :  { %v4718_v54 = vadd.f32 %v2352_v50, %v2257_v10 }
 0x4c9   :  { %v1724_v21 = vpop.permute.xlu0 %1723 }
 0x4ca   :  { %v2548_v35 = vmin.f32 %v4718_v54, 0.0  ;;  %vm2544_vm3 = vcmp.gt.f32.partialorder %v4718_v54, 0.0 }
 0x4cd   :  { %v4675_v41 = vpop.permute.xlu0 %1625 }
 0x4ce   :  { %v1634_v34 = vadd.f32 %v4675_v41, %v1530_v25  ;;  %v762_v25 = vmul.f32 %v4547_v59, %v4763_v9 }
 0x4d1   :  { %v1828_v4 = vpop.permute.xlu0 %1827 }
 0x4d5   :  { %v4678_v44 = vpop.permute.xlu0 %1729 }
 0x4d6   :  { %v1738_v6 = vadd.f32 %v4678_v44, %v1634_v34  ;;  %v2554_v44 = vmul.f32 1.442695, %v2548_v35 }
 0x4d7   :  { %s3594_s13 = spop %3593 }
 0x4d8   :  { %s2456_s15 = smul.f32 0.00080128206, %s3594_s13  ;;  %s3507_s13 = sld [smem:[#allocation5 + $0x3e]] }
 0x4d9   :  { %v1932_v51 = vpop.permute.xlu0 %1931 }
 0x4da   :  { %v2457_v33 = vstv %s2456_s15  ;;  %s3511_s15 = sld [smem:[#allocation5 + $0x3f]] }
 0x4db   :  { %v4681_v62 = vsub.f32 %v4426_v3, %v2457_v33  ;;  %v4684_v60 = vsub.f32 %v4436_v55, %v2457_v33  ;;  %v4687_v28 = vsub.f32 %v4441_v11, %v2457_v33  ;;  %v4690_v19 = vsub.f32 %v4454_v32, %v2457_v33 }
 0x4dc   :  { %v1735_v33 = vadd.f32 %v1724_v21, %v1631_v48 }
 0x4dd   :  { %v2462_v63 = vmul.f32 %v4681_v62, %v4681_v62  ;;  %v2463_v38 = vmul.f32 %v4684_v60, %v4684_v60  ;;  %v2464_v3 = vmul.f32 %v4687_v28, %v4687_v28  ;;  %v1834_v37 = vpop.permute.xlu0 %1833  ;;  %v2465_v55 = vmul.f32 %v4690_v19, %v4690_v19 }
 0x4de   :  { %v1839_v58 = vadd.f32 %v1828_v4, %v1735_v33 }
 0x4df   :  { %v2466_v11 = vsel %vm2439_vm13, %v2462_v63, 0.0  ;;  %v2467_v32 = vsel %vm2439_vm13, %v2463_v38, 0.0  ;;  %v2469_v23 = vsel %vm2439_vm13, %v2464_v3, 0.0  ;;  %v2471_v1 = vsel %vm2439_vm13, %v2465_v55, 0.0 }
 0x4e0   :  { %v2468_v20 = vadd.f32 %v2467_v32, %v2466_v11  ;;  %v4713_v63 = vadd.f32 %v2350_v40, %v2256_v53  ;;  %v1943_v22 = vadd.f32 %v1932_v51, %v1839_v58  ;;  %v4716_v38 = vstv %s3439_s17  ;;  %v4727_v11 = vld [vmem:[#allocation2 + $0x18] sm:$0xff]  ;;  %s3515_s17 = sld [smem:[#allocation5 + $0x40]] }
 0x4e1   :  { %v2036_v56 = vpop.permute.xlu0 %2035  ;;  %v346_v30 = vmul.f32 %v4547_v59, %v4716_v38  ;;  %v1842_v51 = vadd.f32 %v1834_v37, %v1738_v6  ;;  %v347_v41 = vmul.f32 %v4727_v11, %v4716_v38  ;;  %v555_v57 = vmul.f32 %v4727_v11, %v4739_v61 }
 0x4e2   :  { %v2470_v43 = vadd.f32 %v2469_v23, %v2468_v20  ;;  %v2047_v21 = vadd.f32 %v2036_v56, %v1943_v22  ;;  %v2547_v31 = vmin.f32 %v4713_v63, 0.0  ;;  %v4731_v20 = vstv %s3443_s19  ;;  %s3519_s19 = sld [smem:[#allocation5 + $0x41]] }
 0x4e3   :  { %v450_v23 = vmul.f32 %v4547_v59, %v4731_v20  ;;  %v451_v2 = vmul.f32 %v4727_v11, %v4731_v20  ;;  %vm2543_vm2 = vcmp.gt.f32.partialorder %v4713_v63, 0.0  ;;  %v4783_v6 = vstv %s3459_s1 }
 0x4e4   :  { %v2472_v46 = vadd.f32 %v2471_v1, %v2470_v43  ;;  %v2552_v36 = vmul.f32 1.442695, %v2547_v31  ;;  %v867_v35 = vmul.f32 %v4727_v11, %v4783_v6 }
 0x4e5   :  { %v1938_v13 = vpop.permute.xlu0 %1937 }
 0x4e6   :  { %2473 = vadd.xlane.f32.xlu1 %v2472_v46  ;;  %v1946_v32 = vadd.f32 %v1938_v13, %v1842_v51  ;;  %3654 = vpow2.f32 %v2552_v36  ;;  %v4791_v51 = vstv %s3463_s2  ;;  %s3479_s2 = sld [smem:[#allocation5 + $0x37]] }
 0x4e7   :  { %3656 = vpow2.f32 %v2554_v44  ;;  %v971_v36 = vmul.f32 %v4727_v11, %v4791_v51  ;;  %v4810_v44 = vstv %s3471_s24 }
 0x4e9   :  { %v2140_v17 = vpop.permute.xlu0 %2139 }
 0x4ea   :  { %v2151_v4 = vadd.f32 %v2140_v17, %v2047_v21  ;;  %v4747_v17 = vstv %s3451_s22  ;;  %s3432_s22 = sld [smem:[#allocation8 + $0x2]] }
 0x4eb   :  { %v658_v48 = vmul.f32 %v4547_v59, %v4747_v17  ;;  %v659_v50 = vmul.f32 %v4727_v11, %v4747_v17 }
 0x4ed   :  { %v2042_v18 = vpop.permute.xlu0 %2041 }
 0x4ee   :  { %v2050_v0 = vadd.f32 %v2042_v18, %v1946_v32  ;;  %v345_v32 = vmul.f32 %v4502_v5, %v4716_v38 }
 0x4f1   :  { %v2244_v16 = vpop.permute.xlu0 %2243 }
 0x4f2   :  { %v2255_v3 = vadd.f32 %v2244_v16, %v2151_v4  ;;  %v866_v4 = vmul.f32 %v4547_v59, %v4783_v6 }
 0x4f3   :  { %v3655_v24 = vpop.eup %3654 }
 0x4f4   :  { %v3657_v40 = vpop.eup %3656  ;;  %v3526_v45 = vadd.f32 -1.0, %v3655_v24  ;;  %v4854_v24 = vstv %s3487_s27  ;;  %s3444_s27 = sld [smem:[#allocation5 + $0x44]] }
 0x4f5   :  { %v2146_v15 = vpop.permute.xlu0 %2145  ;;  %v3527_v26 = vadd.f32 -1.0, %v3657_v40  ;;  %v1534_v40 = vmul.f32 %v4431_v39, %v4854_v24 }
 0x4f6   :  { %v2154_v43 = vadd.f32 %v2146_v15, %v2050_v0  ;;  %v4757_v33 = vsel %vm2543_vm2, %v4713_v63, %v3526_v45  ;;  %v763_v15 = vmul.f32 %v4727_v11, %v4763_v9  ;;  %v449_v0 = vmul.f32 %v4502_v5, %v4731_v20 }
 0x4f7   :  { %355 = vrot.lane.b32.xlu1 %v346_v30, %s3763_s28  ;;  %v2567_v58 = vsel %vm2439_vm13, %v4757_v33, 0.0  ;;  %v4770_v10 = vsel %vm2544_vm3, %v4718_v54, %v3527_v26  ;;  %vm2952_vm2 = vcmask 310272  }
 0x4f8   :  { %v2569_v34 = vsel %vm2439_vm13, %v4770_v10, 0.0 }
 0x4f9   :  { %v2348_v55 = vpop.permute.xlu0 %2347 }
 0x4fa   :  { %v2359_v49 = vadd.f32 %v2348_v55, %v2255_v3  ;;  %v970_v3 = vmul.f32 %v4547_v59, %v4791_v51  ;;  %v4799_v55 = vstv %s3467_s23 }
 0x4fb   :  { %357 = vrot.lane.b32.xlu1 %v347_v41, %s3763_s28  ;;  %v1074_v41 = vmul.f32 %v4547_v59, %v4799_v55 }
 0x4fc   :  { %v2546_v56 = vmin.f32 %v2359_v49, 0.0  ;;  %vm2542_vm1 = vcmp.gt.f32.partialorder %v2359_v49, 0.0 }
 0x4fd   :  { %v2250_v37 = vpop.permute.xlu0 %2249 }
 0x4fe   :  { %v2550_v47 = vmul.f32 1.442695, %v2546_v56  ;;  %v2258_v1 = vadd.f32 %v2250_v37, %v2154_v43  ;;  %v1178_v56 = vmul.f32 %v4547_v59, %v4810_v44  ;;  %v348_v37 = vmul.f32 %v4646_v8, %v4716_v38 }
 0x4ff   :  { %459 = vrot.lane.b32.xlu1 %v450_v23, %s3764_s29  ;;  %v1179_v23 = vmul.f32 %v4727_v11, %v4810_v44  ;;  %v4824_v43 = vstv %s3475_s25  ;;  %v452_v38 = vmul.f32 %v4646_v8, %v4731_v20  ;;  %v556_v20 = vmul.f32 %v4646_v8, %v4739_v61 }
 0x500   :  { %3658 = vpow2.f32 %v2550_v47  ;;  %v553_v47 = vmul.f32 %v4502_v5, %v4739_v61  ;;  %v660_v61 = vmul.f32 %v4646_v8, %v4747_v17 }
 0x501   :  { %v2354_v27 = vpop.permute.xlu0 %2353 }
 0x502   :  { %v2362_v46 = vadd.f32 %v2354_v27, %v2258_v1  ;;  %v1282_v1 = vmul.f32 %v4547_v59, %v4824_v43  ;;  %v1283_v27 = vmul.f32 %v4727_v11, %v4824_v43 }
 0x503   :  { %461 = vrot.lane.b32.xlu1 %v451_v2, %s3764_s29  ;;  %v657_v2 = vmul.f32 %v4502_v5, %v4747_v17  ;;  %v764_v17 = vmul.f32 %v4646_v8, %v4763_v9 }
 0x504   :  { %v2549_v13 = vmin.f32 %v2362_v46, 0.0  ;;  %vm2545_vm4 = vcmp.gt.f32.partialorder %v2362_v46, 0.0 }
 0x506   :  { %v2556_v14 = vmul.f32 1.442695, %v2549_v13 }
 0x507   :  { %563 = vrot.lane.b32.xlu1 %v554_v7, %s3765_s8  ;;  %v4849_v7 = vld [vmem:[#allocation2 + $0x19] sm:$0xff] }
 0x508   :  { %3660 = vpow2.f32 %v2556_v14  ;;  %v1535_v45 = vmul.f32 %v4849_v7, %v4854_v24 }
 0x50b   :  { %565 = vrot.lane.b32.xlu1 %v555_v57, %s3765_s8  ;;  %v761_v57 = vmul.f32 %v4502_v5, %v4763_v9  ;;  %v868_v9 = vmul.f32 %v4646_v8, %v4783_v6 }
 0x50d   :  { %v3659_v29 = vpop.eup %3658 }
 0x50e   :  { %v3525_v53 = vadd.f32 -1.0, %v3659_v29  ;;  %v4868_v29 = vstv %s3491_s30  ;;  %s3448_s30 = sld [smem:[#allocation5 + $0x45]] }
 0x50f   :  { %667 = vrot.lane.b32.xlu1 %v658_v48, %s3766_s3  ;;  %v865_v48 = vmul.f32 %v4502_v5, %v4783_v6  ;;  %v1639_v26 = vmul.f32 %v4849_v7, %v4868_v29 }
 0x510   :  { %v4754_v18 = vsel %vm2542_vm1, %v2359_v49, %v3525_v53  ;;  %v1075_v49 = vmul.f32 %v4727_v11, %v4799_v55  ;;  %v1638_v53 = vmul.f32 %v4431_v39, %v4868_v29 }
 0x511   :  { %v2566_v42 = vsel %vm2439_vm13, %v4754_v18, 0.0 }
 0x512   :  { %v2568_v63 = vadd.f32 %v2567_v58, %v2566_v42  ;;  %v4882_v42 = vstv %s3495_s9  ;;  %s3452_s9 = sld [smem:[#allocation5 + $0x46]] }
 0x513   :  { %669 = vrot.lane.b32.xlu1 %v659_v50, %s3766_s3  ;;  %v969_v50 = vmul.f32 %v4502_v5, %v4791_v51  ;;  %v1742_v58 = vmul.f32 %v4431_v39, %v4882_v42 }
 0x514   :  { %v2570_v31 = vadd.f32 %v2569_v34, %v2568_v63  ;;  %v1743_v63 = vmul.f32 %v4849_v7, %v4882_v42  ;;  %v972_v34 = vmul.f32 %v4646_v8, %v4791_v51 }
 0x515   :  { %v3661_v16 = vpop.eup %3660 }
 0x516   :  { %v3528_v22 = vadd.f32 -1.0, %v3661_v16  ;;  %v4896_v16 = vstv %s3499_s4  ;;  %s3456_s4 = sld [smem:[#allocation5 + $0x47]] }
 0x517   :  { %771 = vrot.lane.b32.xlu1 %v762_v25, %s3767_s10  ;;  %v1073_v25 = vmul.f32 %v4502_v5, %v4799_v55 }
 0x518   :  { %v4777_v21 = vsel %vm2545_vm4, %v2362_v46, %v3528_v22  ;;  %v4841_v46 = vstv %s3483_s26  ;;  %v1846_v22 = vmul.f32 %v4431_v39, %v4896_v16  ;;  %s3440_s26 = sld [smem:[#allocation5 + $0x43]] }
 0x519   :  { %v2571_v54 = vsel %vm2439_vm13, %v4777_v21, 0.0  ;;  %v1429_v13 = vmul.f32 %v4551_v52, %v4841_v46  ;;  %v1431_v14 = vmul.f32 %v4849_v7, %v4841_v46 }
 0x51a   :  { %v2572_v30 = vadd.f32 %v2571_v54, %v2570_v31  ;;  %v1847_v31 = vmul.f32 %v4849_v7, %v4896_v16  ;;  %v1177_v54 = vmul.f32 %v4502_v5, %v4810_v44 }
 0x51b   :  { %773 = vrot.lane.b32.xlu1 %v763_v15, %s3767_s10  ;;  %v4910_v15 = vstv %s3503_s11  ;;  %s3460_s11 = sld [smem:[#allocation5 + $0x48]] }
 0x51c   :  { %2573 = vadd.xlane.f32.xlu0 %v2572_v30  ;;  %v1950_v30 = vmul.f32 %v4431_v39, %v4910_v15  ;;  %v1951_v51 = vmul.f32 %v4849_v7, %v4910_v15 }
 0x51f   :  { %875 = vrot.lane.b32.xlu1 %v866_v4, %s3768_s12 }
 0x523   :  { %877 = vrot.lane.b32.xlu1 %v867_v35, %s3768_s12  ;;  %v1076_v35 = vmul.f32 %v4646_v8, %v4799_v55 }
 0x527   :  { %979 = vrot.lane.b32.xlu1 %v970_v3, %s3769_s14 }
 0x52b   :  { %981 = vrot.lane.b32.xlu1 %v971_v36, %s3769_s14  ;;  %v4924_v36 = vstv %s3507_s13  ;;  %s3464_s13 = sld [smem:[#allocation5 + $0x49]] }
 0x52c   :  { %v2054_v55 = vmul.f32 %v4431_v39, %v4924_v36 }
 0x52f   :  { %1083 = vrot.lane.b32.xlu1 %v1074_v41, %s3770_s16 }
 0x532   :  { %353 = vrot.lane.b32.xlu0 %v345_v32, %s3763_s28  ;;  %v1281_v32 = vmul.f32 %v4502_v5, %v4824_v43 }
 0x533   :  { %1085 = vrot.lane.b32.xlu1 %v1075_v49, %s3770_s16 }
 0x536   :  { %457 = vrot.lane.b32.xlu0 %v449_v0, %s3764_s29 }
 0x537   :  { %1187 = vrot.lane.b32.xlu1 %v1178_v56, %s3771_s18 }
 0x53a   :  { %359 = vrot.lane.b32.xlu0 %v348_v37, %s3763_s28  ;;  %v1180_v37 = vmul.f32 %v4646_v8, %v4810_v44 }
 0x53b   :  { %1189 = vrot.lane.b32.xlu1 %v1179_v23, %s3771_s18 }
 0x53e   :  { %561 = vrot.lane.b32.xlu0 %v553_v47, %s3765_s8  ;;  %v2055_v47 = vmul.f32 %v4849_v7, %v4924_v36 }
 0x53f   :  { %1291 = vrot.lane.b32.xlu1 %v1282_v1, %s3772_s20  ;;  %v4942_v1 = vstv %s3511_s15  ;;  %s3468_s15 = sld [smem:[#allocation5 + $0x4a]] }
 0x540   :  { %v2158_v44 = vmul.f32 %v4431_v39, %v4942_v1 }
 0x542   :  { %463 = vrot.lane.b32.xlu0 %v452_v38, %s3764_s29 }
 0x543   :  { %1293 = vrot.lane.b32.xlu1 %v1283_v27, %s3772_s20  ;;  %v1284_v27 = vmul.f32 %v4646_v8, %v4824_v43 }
 0x546   :  { %665 = vrot.lane.b32.xlu0 %v657_v2, %s3766_s3 }
 0x547   :  { %1437 = vrot.lane.b32.xlu1 %v1429_v13, %s3763_s28  ;;  %v1430_v13 = vmul.f32 %v4431_v39, %v4841_v46 }
 0x54a   :  { %567 = vrot.lane.b32.xlu0 %v556_v20, %s3765_s8  ;;  %v2159_v20 = vmul.f32 %v4849_v7, %v4942_v1 }
 0x54b   :  { %1441 = vrot.lane.b32.xlu1 %v1431_v14, %s3763_s28  ;;  %v4960_v14 = vstv %s3515_s17  ;;  %s3472_s17 = sld [smem:[#allocation5 + $0x4b]] }
 0x54e   :  { %769 = vrot.lane.b32.xlu0 %v761_v57, %s3767_s10  ;;  %v1533_v57 = vmul.f32 %v4551_v52, %v4854_v24 }
 0x54f   :  { %1543 = vrot.lane.b32.xlu1 %v1534_v40, %s3764_s29  ;;  %v4965_v40 = vld [vmem:[#allocation2 + $0x9] sm:$0xff] }
 0x552   :  { %671 = vrot.lane.b32.xlu0 %v660_v61, %s3766_s3  ;;  %v2262_v61 = vmul.f32 %v4965_v40, %v4960_v14 }
 0x553   :  { %1545 = vrot.lane.b32.xlu1 %v1535_v45, %s3764_s29  ;;  %v1432_v45 = vmul.f32 %v4664_v12, %v4841_v46 }
 0x556   :  { %873 = vrot.lane.b32.xlu0 %v865_v48, %s3768_s12  ;;  %v2263_v48 = vmul.f32 %v4849_v7, %v4960_v14 }
 0x557   :  { %1647 = vrot.lane.b32.xlu1 %v1638_v53, %s3765_s8  ;;  %v4978_v53 = vstv %s3519_s19  ;;  %s3476_s19 = sld [smem:[#allocation5 + $0x4c]] }
 0x55a   :  { %775 = vrot.lane.b32.xlu0 %v764_v17, %s3767_s10 }
 0x55b   :  { %1649 = vrot.lane.b32.xlu1 %v1639_v26, %s3765_s8  ;;  %v1637_v26 = vmul.f32 %v4551_v52, %v4868_v29 }
 0x55e   :  { %977 = vrot.lane.b32.xlu0 %v969_v50, %s3769_s14  ;;  %v2366_v50 = vmul.f32 %v4965_v40, %v4978_v53 }
 0x55f   :  { %1751 = vrot.lane.b32.xlu1 %v1742_v58, %s3766_s3  ;;  %v1536_v58 = vmul.f32 %v4664_v12, %v4854_v24 }
 0x562   :  { %879 = vrot.lane.b32.xlu0 %v868_v9, %s3768_s12  ;;  %v2367_v9 = vmul.f32 %v4849_v7, %v4978_v53 }
 0x563   :  { %1753 = vrot.lane.b32.xlu1 %v1743_v63, %s3766_s3 }
 0x566   :  { %1081 = vrot.lane.b32.xlu0 %v1073_v25, %s3770_s16  ;;  %v1741_v25 = vmul.f32 %v4551_v52, %v4882_v42 }
 0x567   :  { %1855 = vrot.lane.b32.xlu1 %v1846_v22, %s3767_s10 }
 0x56a   :  { %983 = vrot.lane.b32.xlu0 %v972_v34, %s3769_s14  ;;  %v1640_v34 = vmul.f32 %v4664_v12, %v4868_v29 }
 0x56b   :  { %1857 = vrot.lane.b32.xlu1 %v1847_v31, %s3767_s10  ;;  %v1845_v31 = vmul.f32 %v4551_v52, %v4896_v16 }
 0x56e   :  { %1185 = vrot.lane.b32.xlu0 %v1177_v54, %s3771_s18 }
 0x56f   :  { %1959 = vrot.lane.b32.xlu1 %v1950_v30, %s3768_s12  ;;  %v2474_v6 = vpop.xlane.xlu1 %2473  ;;  %v1744_v30 = vmul.f32 %v4664_v12, %v4882_v42 }
 0x570   :  { %v2475_v4 = vrot.slane %v2474_v6, 4 }
 0x572   :  { %v2476_v3 = vadd.f32 %v2475_v4, %v2474_v6  ;;  %1087 = vrot.lane.b32.xlu0 %v1076_v35, %s3770_s16  ;;  %v5004_v6 = vstv %s3435_s21  ;;  %v1949_v35 = vmul.f32 %v4551_v52, %v4910_v15  ;;  %s3484_s21 = sld [smem:[#allocation5 + $0x4e]] }
 0x573   :  { %1961 = vrot.lane.b32.xlu1 %v1951_v51, %s3768_s12  ;;  %v4927_v41 = vpop.permute.xlu1 %355  ;;  %v274_v29 = vmul.f32 %v4547_v59, %v5004_v6  ;;  %v5011_v51 = vstv %s3432_s22  ;;  %v275_v42 = vmul.f32 %v4727_v11, %v5004_v6  ;;  %s3488_s22 = sld [smem:[#allocation5 + $0x4f]] }
 0x574   :  { %v2477_v49 = vrot.slane %v2476_v3, 2 }
 0x576   :  { %1289 = vrot.lane.b32.xlu0 %v1281_v32, %s3772_s20  ;;  %v2478_v0 = vadd.f32 %v2477_v49, %v2476_v3  ;;  %v278_v49 = vadd.f32 %v274_v29, %v5011_v51 }
 0x577   :  { %2063 = vrot.lane.b32.xlu1 %v2054_v55, %s3769_s14  ;;  %v4935_v56 = vpop.permute.xlu1 %357  ;;  %v1848_v55 = vmul.f32 %v4664_v12, %v4896_v16 }
 0x578   :  { %v2479_v23 = vrot.slane %v2478_v0, 1  ;;  %v366_v59 = vadd.f32 %v4927_v41, %v278_v49  ;;  %v5046_v49 = vld [vmem:[#allocation2 + $0x1] sm:$0xff] }
 0x57a   :  { %1191 = vrot.lane.b32.xlu0 %v1180_v37, %s3771_s18  ;;  %v2480_v5 = vadd.f32 %v2479_v23, %v2478_v0 }
 0x57b   :  { %2065 = vrot.lane.b32.xlu1 %v2055_v47, %s3769_s14  ;;  %v4945_v38 = vpop.permute.xlu1 %459  ;;  %v279_v47 = vadd.f32 %v275_v42, %v5011_v51 }
 0x57c   :  { %3595 = vpush %v2480_v5  ;;  %v470_v5 = vadd.f32 %v4945_v38, %v366_v59  ;;  %v1952_v38 = vmul.f32 %v4664_v12, %v4910_v15 }
 0x57d   :  { %v367_v16 = vadd.f32 %v4935_v56, %v279_v47 }
 0x57e   :  { %1295 = vrot.lane.b32.xlu0 %v1284_v27, %s3772_s20  ;;  %v2053_v27 = vmul.f32 %v4551_v52, %v4924_v36 }
 0x57f   :  { %2167 = vrot.lane.b32.xlu1 %v2158_v44, %s3770_s16  ;;  %v4953_v2 = vpop.permute.xlu1 %461 }
 0x582   :  { %1439 = vrot.lane.b32.xlu0 %v1430_v13, %s3763_s28 }
 0x583   :  { %2169 = vrot.lane.b32.xlu1 %v2159_v20, %s3770_s16  ;;  %v564_v43 = vpop.permute.xlu1 %563 }
 0x584   :  { %v574_v13 = vadd.f32 %v564_v43, %v470_v5  ;;  %v2160_v5 = vmul.f32 %v4664_v12, %v4942_v1 }
 0x586   :  { %1541 = vrot.lane.b32.xlu0 %v1533_v57, %s3764_s29  ;;  %v471_v57 = vadd.f32 %v4953_v2, %v367_v16  ;;  %v2157_v2 = vmul.f32 %v4551_v52, %v4942_v1  ;;  %v2264_v1 = vmul.f32 %v4664_v12, %v4960_v14 }
 0x587   :  { %2271 = vrot.lane.b32.xlu1 %v2262_v61, %s3771_s18  ;;  %v4971_v39 = vpop.permute.xlu1 %565 }
 0x58a   :  { %1443 = vrot.lane.b32.xlu0 %v1432_v45, %s3763_s28 }
 0x58b   :  { %2273 = vrot.lane.b32.xlu1 %v2263_v48, %s3771_s18  ;;  %v668_v17 = vpop.permute.xlu1 %667 }
 0x58c   :  { %v678_v61 = vadd.f32 %v668_v17, %v574_v13 }
 0x58e   :  { %1645 = vrot.lane.b32.xlu0 %v1637_v26, %s3765_s8  ;;  %v575_v26 = vadd.f32 %v4971_v39, %v471_v57  ;;  %v2056_v39 = vmul.f32 %v4664_v12, %v4924_v36 }
 0x58f   :  { %2375 = vrot.lane.b32.xlu1 %v2366_v50, %s3772_s20  ;;  %v670_v46 = vpop.permute.xlu1 %669 }
 0x592   :  { %1547 = vrot.lane.b32.xlu0 %v1536_v58, %s3764_s29  ;;  %v679_v58 = vadd.f32 %v670_v46, %v575_v26 }
 0x593   :  { %2377 = vrot.lane.b32.xlu1 %v2367_v9, %s3772_s20  ;;  %v772_v63 = vpop.permute.xlu1 %771 }
 0x594   :  { %v782_v56 = vadd.f32 %v772_v63, %v678_v61 }
 0x596   :  { %1749 = vrot.lane.b32.xlu0 %v1741_v25, %s3766_s3 }
 0x597   :  { %v774_v22 = vpop.permute.xlu1 %773 }
 0x598   :  { %v783_v25 = vadd.f32 %v774_v22, %v679_v58 }
 0x59a   :  { %1651 = vrot.lane.b32.xlu0 %v1640_v34, %s3765_s8 }
 0x59b   :  { %v876_v24 = vpop.permute.xlu1 %875 }
 0x59c   :  { %v886_v9 = vadd.f32 %v876_v24, %v782_v56 }
 0x59e   :  { %1853 = vrot.lane.b32.xlu0 %v1845_v31, %s3767_s10 }
 0x59f   :  { %v878_v54 = vpop.permute.xlu1 %877 }
 0x5a2   :  { %1755 = vrot.lane.b32.xlu0 %v1744_v30, %s3766_s3  ;;  %v887_v30 = vadd.f32 %v878_v54, %v783_v25  ;;  %v2261_v54 = vmul.f32 %v5046_v49, %v4960_v14 }
 0x5a3   :  { %v980_v4 = vpop.permute.xlu1 %979 }
 0x5a4   :  { %v990_v34 = vadd.f32 %v980_v4, %v886_v9  ;;  %v5079_v9 = vld [vmem:[#allocation2] sm:$0xff] }
 0x5a5   :  { %v2574_v3 = vpop.xlane.xlu0 %2573  ;;  %v273_v14 = vmul.f32 %v5079_v9, %v5004_v6 }
 0x5a6   :  { %1957 = vrot.lane.b32.xlu0 %v1949_v35, %s3768_s12  ;;  %v2575_v37 = vrot.slane %v2574_v3, 4  ;;  %v5043_v35 = vstv %s3479_s2  ;;  %s3500_s2 = sld [smem:[#allocation5 + $0x52]] }
 0x5a7   :  { %v982_v32 = vpop.permute.xlu1 %981  ;;  %v1358_v42 = vmul.f32 %v4965_v40, %v5043_v35  ;;  %v277_v25 = vadd.f32 %v273_v14, %v5011_v51 }
 0x5a8   :  { %v2576_v20 = vadd.f32 %v2575_v37, %v2574_v3  ;;  %v991_v46 = vadd.f32 %v982_v32, %v887_v30  ;;  %v276_v30 = vmul.f32 %v4646_v8, %v5004_v6 }
 0x5a9   :  { %v5019_v0 = vpop.permute.xlu0 %353 }
 0x5aa   :  { %1859 = vrot.lane.b32.xlu0 %v1848_v55, %s3767_s10  ;;  %v2577_v43 = vrot.slane %v2576_v20, 2 }
 0x5ab   :  { %v1084_v23 = vpop.permute.xlu1 %1083 }
 0x5ac   :  { %v2578_v15 = vadd.f32 %v2577_v43, %v2576_v20  ;;  %v1094_v29 = vadd.f32 %v1084_v23, %v990_v34 }
 0x5ad   :  { %v5027_v44 = vpop.permute.xlu0 %457  ;;  %s3596_s0 = spop %3595 }
 0x5ae   :  { %s2482_s1 = smul.f32 0.00080128206, %s3596_s0  ;;  %2061 = vrot.lane.b32.xlu0 %v2053_v27, %s3769_s14  ;;  %v2579_v52 = vrot.slane %v2578_v15, 1  ;;  %v1359_v27 = vmul.f32 %v4849_v7, %v5043_v35  ;;  %s3492_s0 = sld [smem:[#allocation5 + $0x50]] }
 0x5af   :  { %v1086_v41 = vpop.permute.xlu1 %1085 }
 0x5b0   :  { %v2483_v45 = vstv %s2482_s1  ;;  %v1095_v22 = vadd.f32 %v1086_v41, %v991_v46  ;;  %v2580_v32 = vadd.f32 %v2579_v52, %v2578_v15  ;;  %v2365_v41 = vmul.f32 %v5046_v49, %v4978_v53  ;;  %s3496_s1 = sld [smem:[#allocation5 + $0x51]] }
 0x5b1   :  { %3662 = vrsqrt.f32 %v2483_v45  ;;  %v5034_v48 = vpop.permute.xlu0 %359  ;;  %v280_v52 = vadd.f32 %v276_v30, %v5011_v51  ;;  %v1357_v51 = vmul.f32 %v5046_v49, %v5043_v35 }
 0x5b2   :  { %1963 = vrot.lane.b32.xlu0 %v1952_v38, %s3768_s12  ;;  %v2368_v38 = vmul.f32 %v4664_v12, %v4978_v53  ;;  %v365_v53 = vadd.f32 %v5019_v0, %v277_v25 }
 0x5b3   :  { %v1188_v50 = vpop.permute.xlu1 %1187 }
 0x5b4   :  { %v1198_v24 = vadd.f32 %v1188_v50, %v1094_v29 }
 0x5b5   :  { %v562_v17 = vpop.permute.xlu0 %561 }
 0x5b6   :  { %2165 = vrot.lane.b32.xlu0 %v2157_v2, %s3770_s16 }
 0x5b7   :  { %v1190_v31 = vpop.permute.xlu1 %1189 }
 0x5b8   :  { %v1199_v59 = vadd.f32 %v1190_v31, %v1095_v22  ;;  %v469_v31 = vadd.f32 %v5027_v44, %v365_v53 }
 0x5b9   :  { %v464_v63 = vpop.permute.xlu0 %463 }
 0x5ba   :  { %2067 = vrot.lane.b32.xlu0 %v2056_v39, %s3769_s14  ;;  %v573_v29 = vadd.f32 %v562_v17, %v469_v31 }
 0x5bb   :  { %v1292_v3 = vpop.permute.xlu1 %1291 }
 0x5bc   :  { %v1302_v4 = vadd.f32 %v1292_v3, %v1198_v24 }
 0x5bd   :  { %v666_v36 = vpop.permute.xlu0 %665 }
 0x5be   :  { %v3663_v55 = vpop.eup %3662  ;;  %2269 = vrot.lane.b32.xlu0 %v2261_v54, %s3771_s18  ;;  %v5053_v37 = vadd.f32 %v1358_v42, %v1302_v4  ;;  %v677_v24 = vadd.f32 %v666_v36, %v573_v29  ;;  %v368_v4 = vadd.f32 %v5034_v48, %v280_v52 }
 0x5bf   :  { %3597 = vpush %v3663_v55  ;;  %v1294_v23 = vpop.permute.xlu1 %1293 }
 0x5c0   :  { %3599 = vpush %v2580_v32  ;;  %v1303_v47 = vadd.f32 %v1294_v23, %v1199_v59  ;;  %v472_v0 = vadd.f32 %v464_v63, %v368_v4 }
 0x5c1   :  { %v568_v16 = vpop.permute.xlu0 %567 }
 0x5c2   :  { %2171 = vrot.lane.b32.xlu0 %v2160_v5, %s3770_s16  ;;  %v5060_v13 = vadd.f32 %v1359_v27, %v1303_v47  ;;  %v576_v59 = vadd.f32 %v568_v16, %v472_v0 }
 0x5c3   :  { %v5062_v20 = vpop.permute.xlu1 %1437 }
 0x5c5   :  { %v770_v57 = vpop.permute.xlu0 %769 }
 0x5c6   :  { %2373 = vrot.lane.b32.xlu0 %v2365_v41, %s3772_s20  ;;  %v781_v3 = vadd.f32 %v770_v57, %v677_v24 }
 0x5c7   :  { %v5067_v61 = vpop.permute.xlu1 %1441 }
 0x5c9   :  { %v672_v45 = vpop.permute.xlu0 %671 }
 0x5ca   :  { %2275 = vrot.lane.b32.xlu0 %v2264_v1, %s3771_s18  ;;  %v680_v8 = vadd.f32 %v672_v45, %v576_v59  ;;  %v5144_v59 = vstv %s3440_s26  ;;  %s3512_s26 = sld [smem:[#allocation5 + $0x55]] }
 0x5cb   :  { %v5074_v56 = vpop.permute.xlu1 %1543 }
 0x5cd   :  { %v874_v26 = vpop.permute.xlu0 %873 }
 0x5ce   :  { %2379 = vrot.lane.b32.xlu0 %v2368_v38, %s3772_s20  ;;  %v885_v54 = vadd.f32 %v874_v26, %v781_v3 }
 0x5cf   :  { %v5077_v50 = vpop.permute.xlu1 %1545 }
 0x5d1   :  { %v776_v43 = vpop.permute.xlu0 %775 }
 0x5d2   :  { %v784_v36 = vadd.f32 %v776_v43, %v680_v8 }
 0x5d3   :  { %v5084_v34 = vpop.permute.xlu1 %1647 }
 0x5d5   :  { %v978_v58 = vpop.permute.xlu0 %977 }
 0x5d6   :  { %v989_v55 = vadd.f32 %v978_v58, %v885_v54 }
 0x5d7   :  { %v5090_v39 = vpop.permute.xlu1 %1649 }
 0x5d9   :  { %v880_v2 = vpop.permute.xlu0 %879 }
 0x5da   :  { %v888_v5 = vadd.f32 %v880_v2, %v784_v36  ;;  %v1360_v2 = vmul.f32 %v4664_v12, %v5043_v35 }
 0x5db   :  { %v5094_v42 = vpop.permute.xlu1 %1751 }
 0x5dd   :  { %v1082_v15 = vpop.permute.xlu0 %1081 }
 0x5de   :  { %v1093_v32 = vadd.f32 %v1082_v15, %v989_v55 }
 0x5df   :  { %v5096_v6 = vpop.permute.xlu1 %1753 }
 0x5e1   :  { %v984_v46 = vpop.permute.xlu0 %983 }
 0x5e2   :  { %v992_v27 = vadd.f32 %v984_v46, %v888_v5 }
 0x5e3   :  { %v1856_v16 = vpop.permute.xlu1 %1855 }
 0x5e5   :  { %v1186_v22 = vpop.permute.xlu0 %1185 }
 0x5e6   :  { %v1197_v17 = vadd.f32 %v1186_v22, %v1093_v32 }
 0x5e7   :  { %v5116_v14 = vpop.permute.xlu1 %1857 }
 0x5e9   :  { %v1088_v44 = vpop.permute.xlu0 %1087 }
 0x5ea   :  { %v1096_v41 = vadd.f32 %v1088_v44, %v992_v27  ;;  %v5157_v27 = vstv %s3444_s27  ;;  %s3516_s27 = sld [smem:[#allocation5 + $0x56]] }
 0x5eb   :  { %v1960_v46 = vpop.permute.xlu1 %1959 }
 0x5ed   :  { %v1290_v23 = vpop.permute.xlu0 %1289 }
 0x5ee   :  { %v1301_v47 = vadd.f32 %v1290_v23, %v1197_v17  ;;  %v5147_v17 = vld [vmem:[#allocation2 + $0x8] sm:$0xff] }
 0x5ef   :  { %v1962_v4 = vpop.permute.xlu1 %1961  ;;  %v372_v23 = vmul.f32 %v5147_v17, %v5144_v59 }
 0x5f0   :  { %v5100_v48 = vadd.f32 %v1357_v51, %v1301_v47  ;;  %s5102_s23 = spop %3597  ;;  %v373_v47 = vmul.f32 %v4727_v11, %v5144_v59 }
 0x5f1   :  { %s3600_s24 = spop %3599  ;;  %v1192_v63 = vpop.permute.xlu0 %1191 }
 0x5f2   :  { %s2582_s25 = smul.f32 0.00080128206, %s3600_s24  ;;  %v1200_v45 = vadd.f32 %v1192_v63, %v1096_v41  ;;  %v476_v41 = vmul.f32 %v5147_v17, %v5157_v27  ;;  %s3504_s24 = sld [smem:[#allocation5 + $0x53]] }
 0x5f3   :  { %v2064_v55 = vpop.permute.xlu1 %2063 }
 0x5f4   :  { %v2583_v57 = vstv %s2582_s25  ;;  %s3508_s25 = sld [smem:[#allocation5 + $0x54]] }
 0x5f5   :  { %v1296_v1 = vpop.permute.xlu0 %1295  ;;  %v5105_v38 = vsub.f32 %v4754_v18, %v2583_v57  ;;  %v5108_v26 = vsub.f32 %v4757_v33, %v2583_v57  ;;  %v5111_v43 = vsub.f32 %v4770_v10, %v2583_v57  ;;  %v5114_v58 = vsub.f32 %v4777_v21, %v2583_v57 }
 0x5f6   :  { %v1304_v53 = vadd.f32 %v1296_v1, %v1200_v45  ;;  %v477_v45 = vmul.f32 %v4727_v11, %v5157_v27 }
 0x5f7   :  { %v2588_v25 = vmul.f32 %v5105_v38, %v5105_v38  ;;  %v2589_v18 = vmul.f32 %v5108_v26, %v5108_v26  ;;  %v2590_v33 = vmul.f32 %v5111_v43, %v5111_v43  ;;  %v2591_v21 = vmul.f32 %v5114_v58, %v5114_v58  ;;  %v2066_v32 = vpop.permute.xlu1 %2065 }
 0x5f8   :  { %v5130_v30 = vadd.f32 %v1360_v2, %v1304_v53 }
 0x5f9   :  { %v1440_v10 = vpop.permute.xlu0 %1439  ;;  %v2592_v15 = vsel %vm2439_vm13, %v2588_v25, 0.0  ;;  %v2593_v31 = vsel %vm2439_vm13, %v2589_v18, 0.0  ;;  %v2595_v29 = vsel %vm2439_vm13, %v2590_v33, 0.0  ;;  %v2597_v52 = vsel %vm2439_vm13, %v2591_v21, 0.0 }
 0x5fa   :  { %v2594_v12 = vadd.f32 %v2593_v31, %v2592_v15  ;;  %v1450_v8 = vadd.f32 %v1440_v10, %v5053_v37  ;;  %v5169_v25 = vstv %s3448_s30  ;;  %v5179_v31 = vstv %s3452_s9  ;;  %s3520_s30 = sld [smem:[#allocation5 + $0x57]] }
 0x5fb   :  { %v2168_v63 = vpop.permute.xlu1 %2167  ;;  %v580_v18 = vmul.f32 %v5147_v17, %v5169_v25  ;;  %v581_v21 = vmul.f32 %v4727_v11, %v5169_v25  ;;  %s3436_s9 = sld [smem:[#allocation5 + $0x42]] }
 0x5fc   :  { %v2596_v24 = vadd.f32 %v2595_v29, %v2594_v12  ;;  %v1554_v51 = vadd.f32 %v5074_v56, %v1450_v8 }
 0x5fd   :  { %v5132_v35 = vpop.permute.xlu0 %1541 }
 0x5fe   :  { %v2598_v3 = vadd.f32 %v2597_v52, %v2596_v24  ;;  %v1658_v37 = vadd.f32 %v5084_v34, %v1554_v51  ;;  %v5194_v51 = vstv %s3456_s4  ;;  %s3433_s4 = sld [smem:[#allocation8 + $0x3]] }
 0x5ff   :  { %v2170_v1 = vpop.permute.xlu1 %2169 }
 0x600   :  { %2599 = vadd.xlane.f32.xlu1 %v2598_v3  ;;  %v1762_v56 = vadd.f32 %v5094_v42, %v1658_v37  ;;  %v1451_v42 = vadd.f32 %v5067_v61, %v5060_v13  ;;  %v1449_v3 = vadd.f32 %v5062_v20, %v5100_v48  ;;  %v788_v20 = vmul.f32 %v5147_v17, %v5194_v51 }
 0x601   :  { %v5136_v22 = vpop.permute.xlu0 %1443 }
 0x602   :  { %v1866_v34 = vadd.f32 %v1856_v16, %v1762_v56  ;;  %v1555_v16 = vadd.f32 %v5077_v50, %v1451_v42 }
 0x603   :  { %v2272_v53 = vpop.permute.xlu1 %2271 }
 0x604   :  { %v1970_v10 = vadd.f32 %v1960_v46, %v1866_v34  ;;  %v1659_v24 = vadd.f32 %v5090_v39, %v1555_v16  ;;  %v684_v46 = vmul.f32 %v5147_v17, %v5179_v31  ;;  %v1553_v39 = vadd.f32 %v5132_v35, %v1449_v3 }
 0x605   :  { %v5138_v54 = vpop.permute.xlu0 %1645  ;;  %v1452_v35 = vadd.f32 %v5136_v22, %v5130_v30 }
 0x606   :  { %v2074_v12 = vadd.f32 %v2064_v55, %v1970_v10  ;;  %v1763_v13 = vadd.f32 %v5096_v6, %v1659_v24  ;;  %v685_v55 = vmul.f32 %v4727_v11, %v5179_v31  ;;  %v5209_v10 = vstv %s3460_s11 }
 0x607   :  { %v2274_v29 = vpop.permute.xlu1 %2273  ;;  %v893_v24 = vmul.f32 %v4727_v11, %v5209_v10 }
 0x608   :  { %v2178_v61 = vadd.f32 %v2168_v63, %v2074_v12  ;;  %v1867_v50 = vadd.f32 %v5116_v14, %v1763_v13  ;;  %v1657_v63 = vadd.f32 %v5138_v54, %v1553_v39  ;;  %v789_v54 = vmul.f32 %v4727_v11, %v5194_v51 }
 0x609   :  { %v5140_v0 = vpop.permute.xlu0 %1547  ;;  %v5223_v13 = vstv %s3464_s13 }
 0x60a   :  { %v2282_v6 = vadd.f32 %v2272_v53, %v2178_v61  ;;  %v997_v39 = vmul.f32 %v4727_v11, %v5223_v13 }
 0x60d   :  { %v5142_v44 = vpop.permute.xlu0 %1749 }
 0x60e   :  { %v1761_v14 = vadd.f32 %v5142_v44, %v1657_v63 }
 0x611   :  { %v5151_v36 = vpop.permute.xlu0 %1651  ;;  %381 = vrot.lane.b32.xlu1 %v372_v23, %s3763_s28  ;;  %v2376_v23 = vpop.permute.xlu1 %2375 }
 0x612   :  { %v5204_v56 = vadd.f32 %v2376_v23, %v2282_v6  ;;  %v5231_v6 = vstv %s3468_s15  ;;  %s3480_s15 = sld [smem:[#allocation5 + $0x4d]] }
 0x614   :  { %v2670_v30 = vmin.f32 %v5204_v56, 0.0  ;;  %vm2666_vm5 = vcmp.gt.f32.partialorder %v5204_v56, 0.0 }
 0x615   :  { %v1854_v5 = vpop.permute.xlu0 %1853  ;;  %383 = vrot.lane.b32.xlu1 %v373_v47, %s3763_s28  ;;  %v1971_v47 = vadd.f32 %v1962_v4, %v1867_v50  ;;  %v2378_v4 = vpop.permute.xlu1 %2377  ;;  %v996_v50 = vmul.f32 %v5147_v17, %v5223_v13 }
 0x616   :  { %v2675_v16 = vmul.f32 1.442695, %v2670_v30 }
 0x617   :  { %v2075_v37 = vadd.f32 %v2066_v32, %v1971_v47 }
 0x618   :  { %3664 = vpow2.f32 %v2675_v16 }
 0x619   :  { %v5163_v57 = vpop.permute.xlu0 %1755  ;;  %485 = vrot.lane.b32.xlu1 %v476_v41, %s3764_s29  ;;  %v2179_v41 = vadd.f32 %v2170_v1, %v2075_v37  ;;  %v892_v1 = vmul.f32 %v5147_v17, %v5209_v10  ;;  %v1100_v37 = vmul.f32 %v5147_v17, %v5231_v6 }
 0x61b   :  { %v2283_v34 = vadd.f32 %v2274_v29, %v2179_v41  ;;  %v5241_v41 = vstv %s3472_s17 }
 0x61d   :  { %v1958_v2 = vpop.permute.xlu0 %1957  ;;  %487 = vrot.lane.b32.xlu1 %v477_v45, %s3764_s29  ;;  %v1865_v45 = vadd.f32 %v1854_v5, %v1761_v14  ;;  %v5211_v44 = vadd.f32 %v2378_v4, %v2283_v34  ;;  %v5237_v14 = vld [vmem:[#allocation2 + $0x18] sm:$0xff]  ;;  %v1204_v34 = vmul.f32 %v5147_v17, %v5241_v41 }
 0x61e   :  { %v1101_v11 = vmul.f32 %v5237_v14, %v5231_v6 }
 0x61f   :  { %v1969_v53 = vadd.f32 %v1958_v2, %v1865_v45  ;;  %v2671_v2 = vmin.f32 %v5211_v44, 0.0  ;;  %vm2667_vm7 = vcmp.gt.f32.partialorder %v5211_v44, 0.0 }
 0x621   :  { %v1860_v33 = vpop.permute.xlu0 %1859  ;;  %589 = vrot.lane.b32.xlu1 %v580_v18, %s3765_s8  ;;  %v1556_v18 = vadd.f32 %v5140_v0, %v1452_v35  ;;  %v2677_v61 = vmul.f32 1.442695, %v2671_v2 }
 0x623   :  { %v1660_v22 = vadd.f32 %v5151_v36, %v1556_v18  ;;  %3666 = vpow2.f32 %v2677_v61 }
 0x625   :  { %v2062_v15 = vpop.permute.xlu0 %2061  ;;  %591 = vrot.lane.b32.xlu1 %v581_v21, %s3765_s8  ;;  %v1764_v21 = vadd.f32 %v5163_v57, %v1660_v22  ;;  %v1205_v22 = vmul.f32 %v5237_v14, %v5241_v41 }
 0x626   :  { %v2073_v5 = vadd.f32 %v2062_v15, %v1969_v53 }
 0x627   :  { %v1868_v12 = vadd.f32 %v1860_v33, %v1764_v21 }
 0x629   :  { %v1964_v52 = vpop.permute.xlu0 %1963  ;;  %693 = vrot.lane.b32.xlu1 %v684_v46, %s3766_s3 }
 0x62a   :  { %v1972_v36 = vadd.f32 %v1964_v52, %v1868_v12 }
 0x62d   :  { %v2166_v8 = vpop.permute.xlu0 %2165  ;;  %695 = vrot.lane.b32.xlu1 %v685_v55, %s3766_s3 }
 0x62e   :  { %v2177_v0 = vadd.f32 %v2166_v8, %v2073_v5  ;;  %v5257_v5 = vstv %s3476_s19 }
 0x631   :  { %v2068_v48 = vpop.permute.xlu0 %2067  ;;  %797 = vrot.lane.b32.xlu1 %v788_v20, %s3767_s10 }
 0x632   :  { %v2076_v57 = vadd.f32 %v2068_v48, %v1972_v36  ;;  %v3665_v48 = vpop.eup %3664  ;;  %v5278_v36 = vstv %s3484_s21 }
 0x633   :  { %v3667_v35 = vpop.eup %3666  ;;  %v3530_v4 = vadd.f32 -1.0, %v3665_v48  ;;  %v1457_v61 = vmul.f32 %v4849_v7, %v5278_v36  ;;  %v5320_v48 = vstv %s3500_s2 }
 0x634   :  { %v3531_v18 = vadd.f32 -1.0, %v3667_v35  ;;  %v1872_v35 = vmul.f32 %v4965_v40, %v5320_v48 }
 0x635   :  { %v2270_v32 = vpop.permute.xlu0 %2269  ;;  %799 = vrot.lane.b32.xlu1 %v789_v54, %s3767_s10 }
 0x636   :  { %v2281_v29 = vadd.f32 %v2270_v32, %v2177_v0  ;;  %v5249_v32 = vsel %vm2666_vm5, %v5204_v56, %v3530_v4  ;;  %v5264_v56 = vsel %vm2667_vm7, %v5211_v44, %v3531_v18  ;;  %v1308_v0 = vmul.f32 %v5147_v17, %v5257_v5 }
 0x637   :  { %v2692_v16 = vsel %vm2439_vm13, %v5264_v56, 0.0  ;;  %v1309_v44 = vmul.f32 %v5237_v14, %v5257_v5  ;;  %v1873_v4 = vmul.f32 %v4849_v7, %v5320_v48  ;;  %vm3073_vm7 = vcmask 93200  }
 0x639   :  { %v2172_v42 = vpop.permute.xlu0 %2171  ;;  %901 = vrot.lane.b32.xlu1 %v892_v1, %s3768_s12  ;;  %v2690_v1 = vsel %vm2439_vm13, %v5249_v32, 0.0 }
 0x63a   :  { %v2180_v55 = vadd.f32 %v2172_v42, %v2076_v57  ;;  %v5285_v57 = vstv %s3488_s22  ;;  %s3774_s22 = smov 2  }
 0x63d   :  { %v2374_v46 = vpop.permute.xlu0 %2373  ;;  %903 = vrot.lane.b32.xlu1 %v893_v24, %s3768_s12 }
 0x63e   :  { %v2385_v15 = vadd.f32 %v2374_v46, %v2281_v29 }
 0x640   :  { %v2669_v3 = vmin.f32 %v2385_v15, 0.0  ;;  %vm2665_vm6 = vcmp.gt.f32.partialorder %v2385_v15, 0.0 }
 0x641   :  { %v2276_v33 = vpop.permute.xlu0 %2275  ;;  %1005 = vrot.lane.b32.xlu1 %v996_v50, %s3769_s14  ;;  %v1561_v50 = vmul.f32 %v4849_v7, %v5285_v57 }
 0x642   :  { %v2673_v8 = vmul.f32 1.442695, %v2669_v3  ;;  %v2284_v52 = vadd.f32 %v2276_v33, %v2180_v55  ;;  %v1560_v3 = vmul.f32 %v4965_v40, %v5285_v57  ;;  %v5293_v33 = vstv %s3492_s0 }
 0x643   :  { %v1664_v55 = vmul.f32 %v4965_v40, %v5293_v33 }
 0x644   :  { %3668 = vpow2.f32 %v2673_v8  ;;  %v371_v8 = vmul.f32 %v5079_v9, %v5144_v59 }
 0x645   :  { %v2380_v23 = vpop.permute.xlu0 %2379  ;;  %1007 = vrot.lane.b32.xlu1 %v997_v39, %s3769_s14  ;;  %v5304_v39 = vstv %s3496_s1 }
 0x646   :  { %v2388_v47 = vadd.f32 %v2380_v23, %v2284_v52  ;;  %v1665_v52 = vmul.f32 %v4849_v7, %v5293_v33  ;;  %v475_v23 = vmul.f32 %v5079_v9, %v5157_v27 }
 0x648   :  { %v2672_v63 = vmin.f32 %v2388_v47, 0.0  ;;  %vm2668_vm8 = vcmp.gt.f32.partialorder %v2388_v47, 0.0 }
 0x649   :  { %1109 = vrot.lane.b32.xlu1 %v1100_v37, %s3770_s16 }
 0x64a   :  { %v2679_v20 = vmul.f32 1.442695, %v2672_v63  ;;  %v5313_v63 = vld [vmem:[#allocation2 + $0x20] sm:$0xff] }
 0x64b   :  { %v374_v37 = vmul.f32 %v5313_v63, %v5144_v59  ;;  %v478_v59 = vmul.f32 %v5313_v63, %v5157_v27 }
 0x64c   :  { %3670 = vpow2.f32 %v2679_v20  ;;  %v1769_v20 = vmul.f32 %v4849_v7, %v5304_v39 }
 0x64d   :  { %1111 = vrot.lane.b32.xlu1 %v1101_v11, %s3770_s16  ;;  %v579_v11 = vmul.f32 %v5079_v9, %v5169_v25 }
 0x651   :  { %v3669_v45 = vpop.eup %3668  ;;  %1213 = vrot.lane.b32.xlu1 %v1204_v34, %s3771_s18  ;;  %v683_v34 = vmul.f32 %v5079_v9, %v5179_v31 }
 0x652   :  { %v3529_v54 = vadd.f32 -1.0, %v3669_v45  ;;  %v5334_v45 = vstv %s3504_s24 }
 0x654   :  { %v5251_v53 = vsel %vm2665_vm6, %v2385_v15, %v3529_v54  ;;  %v1455_v15 = vmul.f32 %v5046_v49, %v5278_v36  ;;  %v1976_v54 = vmul.f32 %v4965_v40, %v5334_v45 }
 0x655   :  { %v2689_v30 = vsel %vm2439_vm13, %v5251_v53, 0.0  ;;  %1215 = vrot.lane.b32.xlu1 %v1205_v22, %s3771_s18  ;;  %v1977_v22 = vmul.f32 %v4849_v7, %v5334_v45 }
 0x656   :  { %v2691_v42 = vadd.f32 %v2690_v1, %v2689_v30  ;;  %v582_v30 = vmul.f32 %v5313_v63, %v5169_v25 }
 0x658   :  { %v2693_v29 = vadd.f32 %v2692_v16, %v2691_v42  ;;  %v5348_v42 = vstv %s3508_s25 }
 0x659   :  { %v3671_v21 = vpop.eup %3670  ;;  %1317 = vrot.lane.b32.xlu1 %v1308_v0, %s3772_s20  ;;  %v787_v0 = vmul.f32 %v5079_v9, %v5194_v51  ;;  %v2080_v25 = vmul.f32 %v4965_v40, %v5348_v42 }
 0x65a   :  { %v3532_v2 = vadd.f32 -1.0, %v3671_v21 }
 0x65c   :  { %v5271_v12 = vsel %vm2668_vm8, %v2388_v47, %v3532_v2  ;;  %v1768_v47 = vmul.f32 %v4965_v40, %v5304_v39  ;;  %vm3076_vm8 = vcmask 97300  }
 0x65d   :  { %v2694_v24 = vsel %vm2439_vm13, %v5271_v12, 0.0  ;;  %1319 = vrot.lane.b32.xlu1 %v1309_v44, %s3772_s20 }
 0x65e   :  { %v2695_v46 = vadd.f32 %v2694_v24, %v2693_v29  ;;  %v686_v24 = vmul.f32 %v5313_v63, %v5179_v31 }
 0x660   :  { %2696 = vadd.xlane.f32.xlu0 %v2695_v46  ;;  %v2081_v46 = vmul.f32 %v4849_v7, %v5348_v42 }
 0x661   :  { %1463 = vrot.lane.b32.xlu1 %v1455_v15, %s3763_s28 }
 0x665   :  { %1467 = vrot.lane.b32.xlu1 %v1457_v61, %s3763_s28  ;;  %v5366_v61 = vstv %s3512_s26 }
 0x666   :  { %v2184_v31 = vmul.f32 %v4965_v40, %v5366_v61 }
 0x669   :  { %1569 = vrot.lane.b32.xlu1 %v1560_v3, %s3764_s29 }
 0x66d   :  { %1571 = vrot.lane.b32.xlu1 %v1561_v50, %s3764_s29  ;;  %v891_v50 = vmul.f32 %v5079_v9, %v5209_v10 }
 0x671   :  { %1673 = vrot.lane.b32.xlu1 %v1664_v55, %s3765_s8  ;;  %v790_v55 = vmul.f32 %v5313_v63, %v5194_v51 }
 0x675   :  { %1675 = vrot.lane.b32.xlu1 %v1665_v52, %s3765_s8 }
 0x676   :  { %379 = vrot.lane.b32.xlu0 %v371_v8, %s3763_s28  ;;  %v5379_v8 = vld [vmem:[#allocation2 + $0x19] sm:$0xff] }
 0x677   :  { %v2185_v52 = vmul.f32 %v5379_v8, %v5366_v61 }
 0x679   :  { %1777 = vrot.lane.b32.xlu1 %v1768_v47, %s3766_s3 }
 0x67a   :  { %483 = vrot.lane.b32.xlu0 %v475_v23, %s3764_s29  ;;  %v5384_v23 = vstv %s3516_s27 }
 0x67d   :  { %1779 = vrot.lane.b32.xlu1 %v1769_v20, %s3766_s3  ;;  %v2288_v20 = vmul.f32 %v4965_v40, %v5384_v23 }
 0x67e   :  { %385 = vrot.lane.b32.xlu0 %v374_v37, %s3763_s28  ;;  %v995_v37 = vmul.f32 %v5079_v9, %v5223_v13 }
 0x681   :  { %1881 = vrot.lane.b32.xlu1 %v1872_v35, %s3767_s10  ;;  %v2289_v35 = vmul.f32 %v5379_v8, %v5384_v23 }
 0x682   :  { %587 = vrot.lane.b32.xlu0 %v579_v11, %s3765_s8  ;;  %v894_v11 = vmul.f32 %v5313_v63, %v5209_v10 }
 0x685   :  { %1883 = vrot.lane.b32.xlu1 %v1873_v4, %s3767_s10 }
 0x686   :  { %489 = vrot.lane.b32.xlu0 %v478_v59, %s3764_s29  ;;  %v5398_v59 = vstv %s3520_s30 }
 0x689   :  { %1985 = vrot.lane.b32.xlu1 %v1976_v54, %s3768_s12  ;;  %v2600_v27 = vpop.xlane.xlu1 %2599  ;;  %v2392_v54 = vmul.f32 %v4965_v40, %v5398_v59 }
 0x68a   :  { %691 = vrot.lane.b32.xlu0 %v683_v34, %s3766_s3  ;;  %v2601_v18 = vrot.slane %v2600_v27, 4  ;;  %v1099_v34 = vmul.f32 %v5079_v9, %v5231_v6 }
 0x68c   :  { %v2602_v1 = vadd.f32 %v2601_v18, %v2600_v27  ;;  %v998_v27 = vmul.f32 %v5313_v63, %v5223_v13  ;;  %v2393_v18 = vmul.f32 %v5379_v8, %v5398_v59 }
 0x68d   :  { %1987 = vrot.lane.b32.xlu1 %v1977_v22, %s3768_s12  ;;  %v5351_v21 = vpop.permute.xlu1 %381  ;;  %v1203_v22 = vmul.f32 %v5079_v9, %v5241_v41 }
 0x68e   :  { %593 = vrot.lane.b32.xlu0 %v582_v30, %s3765_s8  ;;  %v2603_v2 = vrot.slane %v2602_v1, 2 }
 0x690   :  { %v2604_v16 = vadd.f32 %v2603_v2, %v2602_v1  ;;  %v1307_v2 = vmul.f32 %v5079_v9, %v5257_v5 }
 0x691   :  { %2089 = vrot.lane.b32.xlu1 %v2080_v25, %s3769_s14  ;;  %v5359_v29 = vpop.permute.xlu1 %383 }
 0x692   :  { %795 = vrot.lane.b32.xlu0 %v787_v0, %s3767_s10  ;;  %v2605_v44 = vrot.slane %v2604_v16, 1  ;;  %v1102_v0 = vmul.f32 %v5313_v63, %v5231_v6 }
 0x694   :  { %v2606_v15 = vadd.f32 %v2605_v44, %v2604_v16  ;;  %v1206_v16 = vmul.f32 %v5313_v63, %v5241_v41  ;;  %v5424_v44 = vstv %s3436_s9 }
 0x695   :  { %2091 = vrot.lane.b32.xlu1 %v2081_v46, %s3769_s14  ;;  %v5369_v3 = vpop.permute.xlu1 %485  ;;  %v284_v46 = vmul.f32 %v5147_v17, %v5424_v44 }
 0x696   :  { %697 = vrot.lane.b32.xlu0 %v686_v24, %s3766_s3  ;;  %3601 = vpush %v2606_v15  ;;  %v285_v24 = vmul.f32 %v5237_v14, %v5424_v44  ;;  %v1310_v15 = vmul.f32 %v5313_v63, %v5257_v5 }
 0x699   :  { %2193 = vrot.lane.b32.xlu1 %v2184_v31, %s3770_s16  ;;  %v488_v7 = vpop.permute.xlu1 %487 }
 0x69a   :  { %899 = vrot.lane.b32.xlu0 %v891_v50, %s3768_s12  ;;  %v5433_v50 = vstv %s3433_s4 }
 0x69b   :  { %v289_v31 = vadd.f32 %v285_v24, %v5433_v50 }
 0x69d   :  { %2195 = vrot.lane.b32.xlu1 %v2185_v52, %s3770_s16  ;;  %v590_v47 = vpop.permute.xlu1 %589  ;;  %v393_v14 = vadd.f32 %v5359_v29, %v289_v31  ;;  %v1456_v52 = vmul.f32 %v4965_v40, %v5278_v36 }
 0x69e   :  { %801 = vrot.lane.b32.xlu0 %v790_v55, %s3767_s10  ;;  %v288_v55 = vadd.f32 %v284_v46, %v5433_v50 }
 0x69f   :  { %v497_v17 = vadd.f32 %v488_v7, %v393_v14  ;;  %v5447_v7 = vld [vmem:[#allocation2 + $0x21] sm:$0xff] }
 0x6a1   :  { %2297 = vrot.lane.b32.xlu1 %v2288_v20, %s3771_s18  ;;  %v592_v51 = vpop.permute.xlu1 %591 }
 0x6a2   :  { %1003 = vrot.lane.b32.xlu0 %v995_v37, %s3769_s14  ;;  %v392_v37 = vadd.f32 %v5351_v21, %v288_v55 }
 0x6a4   :  { %v496_v20 = vadd.f32 %v5369_v3, %v392_v37 }
 0x6a5   :  { %2299 = vrot.lane.b32.xlu1 %v2289_v35, %s3771_s18  ;;  %v694_v4 = vpop.permute.xlu1 %693  ;;  %v1559_v35 = vmul.f32 %v5046_v49, %v5285_v57 }
 0x6a6   :  { %905 = vrot.lane.b32.xlu0 %v894_v11, %s3768_s12  ;;  %v601_v11 = vadd.f32 %v592_v51, %v497_v17 }
 0x6a9   :  { %2401 = vrot.lane.b32.xlu1 %v2392_v54, %s3772_s20  ;;  %v696_v10 = vpop.permute.xlu1 %695 }
 0x6aa   :  { %1107 = vrot.lane.b32.xlu0 %v1099_v34, %s3770_s16  ;;  %v600_v34 = vadd.f32 %v590_v47, %v496_v20  ;;  %v705_v54 = vadd.f32 %v696_v10, %v601_v11  ;;  %v1770_v20 = vmul.f32 %v5447_v7, %v5304_v39 }
 0x6ac   :  { %v704_v40 = vadd.f32 %v694_v4, %v600_v34  ;;  %v1874_v34 = vmul.f32 %v5447_v7, %v5320_v48 }
 0x6ad   :  { %2403 = vrot.lane.b32.xlu1 %v2393_v18, %s3772_s20  ;;  %v798_v30 = vpop.permute.xlu1 %797  ;;  %v1458_v18 = vmul.f32 %v5447_v7, %v5278_v36  ;;  %v1562_v36 = vmul.f32 %v5447_v7, %v5285_v57 }
 0x6ae   :  { %1009 = vrot.lane.b32.xlu0 %v998_v27, %s3769_s14  ;;  %v808_v3 = vadd.f32 %v798_v30, %v704_v40  ;;  %v5457_v30 = vstv %s3480_s15 }
 0x6af   :  { %v1369_v37 = vmul.f32 %v5379_v8, %v5457_v30 }
 0x6b1   :  { %v800_v1 = vpop.permute.xlu1 %799 }
 0x6b2   :  { %1211 = vrot.lane.b32.xlu0 %v1203_v22, %s3771_s18  ;;  %v809_v27 = vadd.f32 %v800_v1, %v705_v54 }
 0x6b5   :  { %v902_v13 = vpop.permute.xlu1 %901 }
 0x6b6   :  { %1113 = vrot.lane.b32.xlu0 %v1102_v0, %s3770_s16  ;;  %v912_v10 = vadd.f32 %v902_v13, %v808_v3  ;;  %v1663_v0 = vmul.f32 %v5046_v49, %v5293_v33 }
 0x6b9   :  { %v904_v25 = vpop.permute.xlu1 %903 }
 0x6ba   :  { %1315 = vrot.lane.b32.xlu0 %v1307_v2, %s3772_s20  ;;  %v913_v51 = vadd.f32 %v904_v25, %v809_v27 }
 0x6bd   :  { %v1006_v6 = vpop.permute.xlu1 %1005 }
 0x6be   :  { %1217 = vrot.lane.b32.xlu0 %v1206_v16, %s3771_s18  ;;  %v1016_v4 = vadd.f32 %v1006_v6, %v912_v10  ;;  %v3704_v6 = vld [vmem:[#allocation2 + $0x9] sm:$0xff]  ;;  %v2082_v10 = vmul.f32 %v5447_v7, %v5348_v42 }
 0x6bf   :  { %v1368_v31 = vmul.f32 %v3704_v6, %v5457_v30 }
 0x6c1   :  { %v1008_v41 = vpop.permute.xlu1 %1007 }
 0x6c2   :  { %1321 = vrot.lane.b32.xlu0 %v1310_v15, %s3772_s20  ;;  %v1017_v22 = vadd.f32 %v1008_v41, %v913_v51  ;;  %v1767_v15 = vmul.f32 %v5046_v49, %v5304_v39  ;;  %v2079_v39 = vmul.f32 %v5046_v49, %v5348_v42  ;;  %v2391_v42 = vmul.f32 %v5046_v49, %v5398_v59 }
 0x6c5   :  { %v1110_v5 = vpop.permute.xlu1 %1109 }
 0x6c6   :  { %1465 = vrot.lane.b32.xlu0 %v1456_v52, %s3763_s28  ;;  %v1120_v16 = vadd.f32 %v1110_v5, %v1016_v4  ;;  %v1666_v52 = vmul.f32 %v5447_v7, %v5293_v33  ;;  %v1871_v5 = vmul.f32 %v5046_v49, %v5320_v48  ;;  %v1975_v33 = vmul.f32 %v5046_v49, %v5334_v45 }
 0x6c7   :  { %s3602_s11 = spop %3601  ;;  %v2183_v48 = vmul.f32 %v5046_v49, %v5366_v61  ;;  %v2186_v4 = vmul.f32 %v5447_v7, %v5366_v61  ;;  %v2394_v61 = vmul.f32 %v5447_v7, %v5398_v59 }
 0x6c8   :  { %s2608_s13 = smul.f32 0.00080128206, %s3602_s11 }
 0x6c9   :  { %v1112_v29 = vpop.permute.xlu1 %1111 }
 0x6ca   :  { %1567 = vrot.lane.b32.xlu0 %v1559_v35, %s3764_s29  ;;  %v2609_v21 = vstv %s2608_s13  ;;  %v1121_v1 = vadd.f32 %v1112_v29, %v1017_v22 }
 0x6cb   :  { %3672 = vrsqrt.f32 %v2609_v21 }
 0x6cd   :  { %v1214_v47 = vpop.permute.xlu1 %1213 }
 0x6ce   :  { %1469 = vrot.lane.b32.xlu0 %v1458_v18, %s3763_s28  ;;  %v1224_v25 = vadd.f32 %v1214_v47, %v1120_v16  ;;  %v1978_v18 = vmul.f32 %v5447_v7, %v5334_v45  ;;  %v2287_v45 = vmul.f32 %v5046_v49, %v5384_v23 }
 0x6d1   :  { %v1216_v2 = vpop.permute.xlu1 %1215 }
 0x6d2   :  { %1671 = vrot.lane.b32.xlu0 %v1663_v0, %s3765_s8  ;;  %v1225_v24 = vadd.f32 %v1216_v2, %v1121_v1 }
 0x6d5   :  { %v1318_v13 = vpop.permute.xlu1 %1317 }
 0x6d6   :  { %1573 = vrot.lane.b32.xlu0 %v1562_v36, %s3764_s29  ;;  %v1328_v46 = vadd.f32 %v1318_v13, %v1224_v25  ;;  %v2290_v36 = vmul.f32 %v5447_v7, %v5384_v23  ;;  %v286_v23 = vmul.f32 %v5313_v63, %v5424_v44 }
 0x6d8   :  { %v3673_v41 = vpop.eup %3672  ;;  %v5464_v55 = vadd.f32 %v1368_v31, %v1328_v46  ;;  %v283_v31 = vmul.f32 %v5079_v9, %v5424_v44 }
 0x6d9   :  { %3603 = vpush %v3673_v41  ;;  %v1320_v57 = vpop.permute.xlu1 %1319 }
 0x6da   :  { %1775 = vrot.lane.b32.xlu0 %v1767_v15, %s3766_s3  ;;  %v1329_v14 = vadd.f32 %v1320_v57, %v1225_v24  ;;  %v287_v59 = vadd.f32 %v283_v31, %v5433_v50 }
 0x6dc   :  { %v5471_v17 = vadd.f32 %v1369_v37, %v1329_v14  ;;  %v290_v14 = vadd.f32 %v286_v23, %v5433_v50 }
 0x6dd   :  { %v5502_v2 = vpop.permute.xlu1 %1463 }
 0x6de   :  { %1677 = vrot.lane.b32.xlu0 %v1666_v52, %s3765_s8 }
 0x6e1   :  { %v5508_v24 = vpop.permute.xlu1 %1467 }
 0x6e2   :  { %1879 = vrot.lane.b32.xlu0 %v1871_v5, %s3767_s10 }
 0x6e5   :  { %v5515_v46 = vpop.permute.xlu1 %1569 }
 0x6e6   :  { %1781 = vrot.lane.b32.xlu0 %v1770_v20, %s3766_s3 }
 0x6e9   :  { %v2697_v11 = vpop.xlane.xlu0 %2696  ;;  %v5518_v15 = vpop.permute.xlu1 %1571 }
 0x6ea   :  { %v2698_v35 = vrot.slane %v2697_v11, 4  ;;  %1983 = vrot.lane.b32.xlu0 %v1975_v33, %s3768_s12 }
 0x6ec   :  { %v2699_v8 = vadd.f32 %v2698_v35, %v2697_v11 }
 0x6ed   :  { %v380_v54 = vpop.permute.xlu0 %379  ;;  %v5524_v57 = vpop.permute.xlu1 %1673 }
 0x6ee   :  { %1885 = vrot.lane.b32.xlu0 %v1874_v34, %s3767_s10  ;;  %v2700_v29 = vrot.slane %v2699_v8, 2  ;;  %v391_v52 = vadd.f32 %v380_v54, %v287_v59 }
 0x6f0   :  { %v2701_v40 = vadd.f32 %v2700_v29, %v2699_v8 }
 0x6f1   :  { %v484_v27 = vpop.permute.xlu0 %483  ;;  %v5528_v11 = vpop.permute.xlu1 %1675 }
 0x6f2   :  { %2087 = vrot.lane.b32.xlu0 %v2079_v39, %s3769_s14  ;;  %v2702_v21 = vrot.slane %v2701_v40, 1  ;;  %v495_v20 = vadd.f32 %v484_v27, %v391_v52 }
 0x6f4   :  { %v2703_v3 = vadd.f32 %v2702_v21, %v2701_v40 }
 0x6f5   :  { %v386_v51 = vpop.permute.xlu0 %385  ;;  %v5532_v54 = vpop.permute.xlu1 %1777 }
 0x6f6   :  { %1989 = vrot.lane.b32.xlu0 %v1978_v18, %s3768_s12  ;;  %3605 = vpush %v2703_v3  ;;  %v394_v37 = vadd.f32 %v386_v51, %v290_v14 }
 0x6f9   :  { %v588_v47 = vpop.permute.xlu0 %587 }
 0x6fa   :  { %2191 = vrot.lane.b32.xlu0 %v2183_v48, %s3770_s16  ;;  %v599_v35 = vadd.f32 %v588_v47, %v495_v20 }
 0x6fd   :  { %v490_v22 = vpop.permute.xlu0 %489 }
 0x6fe   :  { %2093 = vrot.lane.b32.xlu0 %v2082_v10, %s3769_s14  ;;  %v498_v33 = vadd.f32 %v490_v22, %v394_v37  ;;  %v5547_v10 = vstv %s5102_s23 }
 0x701   :  { %v692_v0 = vpop.permute.xlu0 %691 }
 0x702   :  { %2295 = vrot.lane.b32.xlu0 %v2287_v45, %s3771_s18  ;;  %v703_v34 = vadd.f32 %v692_v0, %v599_v35 }
 0x705   :  { %v594_v1 = vpop.permute.xlu0 %593 }
 0x706   :  { %2197 = vrot.lane.b32.xlu0 %v2186_v4, %s3770_s16  ;;  %v602_v8 = vadd.f32 %v594_v1, %v498_v33 }
 0x709   :  { %v796_v16 = vpop.permute.xlu0 %795 }
 0x70a   :  { %2399 = vrot.lane.b32.xlu0 %v2391_v42, %s3772_s20  ;;  %s5530_s3 = spop %3603  ;;  %v807_v44 = vadd.f32 %v796_v16, %v703_v34  ;;  %v2487_v42 = vmul.f32 %v5547_v10, %v4681_v62  ;;  %v5561_v16 = vpop.permute.xlu1 %1779  ;;  %v1370_v34 = vmul.f32 %v5447_v7, %v5457_v30 }
 0x70c   :  { %v2493_v14 = vrot.slane %v2487_v42, 1 }
 0x70d   :  { %v698_v25 = vpop.permute.xlu0 %697 }
 0x70e   :  { %2301 = vrot.lane.b32.xlu0 %v2290_v36, %s3771_s18  ;;  %v706_v63 = vadd.f32 %v698_v25, %v602_v8  ;;  %v2497_v33 = vmax.f32 %v2487_v42, %v2493_v14 }
 0x711   :  { %v900_v13 = vpop.permute.xlu0 %899 }
 0x712   :  { %2405 = vrot.lane.b32.xlu0 %v2394_v61, %s3772_s20  ;;  %v911_v39 = vadd.f32 %v900_v13, %v807_v44  ;;  %v2509_v44 = vrot.slane %v2497_v33, 3 }
 0x715   :  { %v802_v49 = vpop.permute.xlu0 %801 }
 0x716   :  { %v810_v29 = vadd.f32 %v802_v49, %v706_v63  ;;  %v3705_v49 = vld [vmem:[#allocation2 + $0x1] sm:$0xff] }
 0x719   :  { %v1004_v6 = vpop.permute.xlu0 %1003 }
 0x71a   :  { %v1015_v48 = vadd.f32 %v1004_v6, %v911_v39  ;;  %v1367_v6 = vmul.f32 %v3705_v49, %v5457_v30 }
 0x71d   :  { %v906_v41 = vpop.permute.xlu0 %905 }
 0x71e   :  { %v914_v40 = vadd.f32 %v906_v41, %v810_v29  ;;  %v2488_v41 = vmul.f32 %v5547_v10, %v4684_v60 }
 0x720   :  { %v2501_v20 = vrot.slane %v2488_v41, 1 }
 0x721   :  { %v1108_v5 = vpop.permute.xlu0 %1107 }
 0x722   :  { %v1119_v0 = vadd.f32 %v1108_v5, %v1015_v48  ;;  %v1882_v5 = vpop.permute.xlu1 %1881  ;;  %v2505_v63 = vmax.f32 %v2488_v41, %v2501_v20 }
 0x724   :  { %v2515_v39 = vrot.slane %v2505_v63, 6 }
 0x725   :  { %v1010_v9 = vpop.permute.xlu0 %1009 }
 0x726   :  { %v1018_v47 = vadd.f32 %v1010_v9, %v914_v40  ;;  %v1884_v29 = vpop.permute.xlu1 %1883  ;;  %v2524_v40 = vsel %vm2523_vm9, %v2497_v33, %v2509_v44 }
 0x727   :  { %s3606_s10 = spop %3605 }
 0x728   :  { %s2705_s12 = smul.f32 0.00080128206, %s3606_s10 }
 0x729   :  { %v1212_v50 = vpop.permute.xlu0 %1211 }
 0x72a   :  { %v2706_v27 = vstv %s2705_s12  ;;  %v1223_v36 = vadd.f32 %v1212_v50, %v1119_v0  ;;  %v1986_v48 = vpop.permute.xlu1 %1985 }
 0x72b   :  { %v5535_v21 = vsub.f32 %v5251_v53, %v2706_v27  ;;  %v5538_v18 = vsub.f32 %v5249_v32, %v2706_v27  ;;  %v5541_v3 = vsub.f32 %v5264_v56, %v2706_v27  ;;  %v5544_v51 = vsub.f32 %v5271_v12, %v2706_v27 }
 0x72d   :  { %v2711_v22 = vmul.f32 %v5535_v21, %v5535_v21  ;;  %v2712_v53 = vmul.f32 %v5538_v18, %v5538_v18  ;;  %v2713_v32 = vmul.f32 %v5541_v3, %v5541_v3  ;;  %v1114_v45 = vpop.permute.xlu0 %1113  ;;  %v2714_v12 = vmul.f32 %v5544_v51, %v5544_v51 }
 0x72e   :  { %v1122_v56 = vadd.f32 %v1114_v45, %v1018_v47  ;;  %v2527_v47 = vsel %vm2526_vm10, %v2524_v40, %v2515_v39  ;;  %v1988_v7 = vpop.permute.xlu1 %1987 }
 0x72f   :  { %v2715_v4 = vsel %vm2439_vm13, %v2711_v22, 0.0  ;;  %v2716_v1 = vsel %vm2439_vm13, %v2712_v53, 0.0  ;;  %v2718_v13 = vsel %vm2439_vm13, %v2713_v32, 0.0  ;;  %v2720_v59 = vsel %vm2439_vm13, %v2714_v12, 0.0 }
 0x730   :  { %v2717_v25 = vadd.f32 %v2716_v1, %v2715_v4  ;;  %v2519_v22 = vrot.slane %v2505_v63, 1 }
 0x731   :  { %v1316_v61 = vpop.permute.xlu0 %1315 }
 0x732   :  { %v1327_v31 = vadd.f32 %v1316_v61, %v1223_v36  ;;  %v2719_v23 = vadd.f32 %v2718_v13, %v2717_v25  ;;  %v5573_v32 = vsel %vm2529_vm11, %v2527_v47, %v2519_v22  ;;  %v2090_v0 = vpop.permute.xlu1 %2089 }
 0x734   :  { %v1371_v52 = vadd.f32 %v1367_v6, %v1327_v31  ;;  %v2721_v62 = vadd.f32 %v2720_v59, %v2719_v23 }
 0x735   :  { %v1218_v37 = vpop.permute.xlu0 %1217 }
 0x736   :  { %2722 = vadd.xlane.f32.xlu1 %v2721_v62  ;;  %v1226_v35 = vadd.f32 %v1218_v37, %v1122_v56  ;;  %v2092_v12 = vpop.permute.xlu1 %2091  ;;  %v1477_v62 = vadd.f32 %v5508_v24, %v5471_v17 }
 0x738   :  { %v1581_v37 = vadd.f32 %v5518_v15, %v1477_v62 }
 0x739   :  { %v1322_v8 = vpop.permute.xlu0 %1321 }
 0x73a   :  { %v1330_v9 = vadd.f32 %v1322_v8, %v1226_v35  ;;  %v2194_v25 = vpop.permute.xlu1 %2193  ;;  %v1685_v33 = vadd.f32 %v5528_v11, %v1581_v37 }
 0x73c   :  { %v1374_v60 = vadd.f32 %v1370_v34, %v1330_v9  ;;  %v1789_v35 = vadd.f32 %v5561_v16, %v1685_v33 }
 0x73d   :  { %v1466_v50 = vpop.permute.xlu0 %1465 }
 0x73e   :  { %v1476_v4 = vadd.f32 %v1466_v50, %v5464_v55  ;;  %v2196_v49 = vpop.permute.xlu1 %2195 }
 0x740   :  { %v1580_v42 = vadd.f32 %v5515_v46, %v1476_v4 }
 0x741   :  { %v1568_v27 = vpop.permute.xlu0 %1567 }
 0x742   :  { %v1684_v61 = vadd.f32 %v5524_v57, %v1580_v42  ;;  %v2298_v59 = vpop.permute.xlu1 %2297 }
 0x744   :  { %v1788_v6 = vadd.f32 %v5532_v54, %v1684_v61  ;;  %v1475_v54 = vadd.f32 %v5502_v2, %v1371_v52 }
 0x745   :  { %v1470_v53 = vpop.permute.xlu0 %1469 }
 0x746   :  { %v1892_v23 = vadd.f32 %v1882_v5, %v1788_v6  ;;  %v2300_v46 = vpop.permute.xlu1 %2299  ;;  %v1893_v5 = vadd.f32 %v1884_v29, %v1789_v35  ;;  %v1579_v63 = vadd.f32 %v1568_v27, %v1475_v54  ;;  %v1478_v47 = vadd.f32 %v1470_v53, %v1374_v60 }
 0x747   :  { %2534 = vrot.lane.b32.xlu1 %v5573_v32, %s3763_s28 }
 0x748   :  { %v1996_v14 = vadd.f32 %v1986_v48, %v1892_v23  ;;  %v1997_v44 = vadd.f32 %v1988_v7, %v1893_v5 }
 0x749   :  { %v1672_v30 = vpop.permute.xlu0 %1671 }
 0x74a   :  { %v2100_v20 = vadd.f32 %v2090_v0, %v1996_v14  ;;  %v2402_v34 = vpop.permute.xlu1 %2401  ;;  %v1683_v50 = vadd.f32 %v1672_v30, %v1579_v63  ;;  %v2101_v24 = vadd.f32 %v2092_v12, %v1997_v44 }
 0x74c   :  { %v2204_v8 = vadd.f32 %v2194_v25, %v2100_v20  ;;  %v2205_v40 = vadd.f32 %v2196_v49, %v2101_v24 }
 0x74d   :  { %v1574_v45 = vpop.permute.xlu0 %1573 }
 0x74e   :  { %v2308_v17 = vadd.f32 %v2298_v59, %v2204_v8  ;;  %v2404_v48 = vpop.permute.xlu1 %2403  ;;  %v2309_v0 = vadd.f32 %v2300_v46, %v2205_v40  ;;  %v1582_v4 = vadd.f32 %v1574_v45, %v1478_v47 }
 0x750   :  { %v2412_v22 = vadd.f32 %v2402_v34, %v2308_v17  ;;  %v2413_v2 = vadd.f32 %v2404_v48, %v2309_v0 }
 0x751   :  { %v1776_v56 = vpop.permute.xlu0 %1775 }
 0x752   :  { %v1787_v15 = vadd.f32 %v1776_v56, %v1683_v50  ;;  %v2793_v25 = vmin.f32 %v2412_v22, 0.0  ;;  %v2794_v61 = vmin.f32 %v2413_v2, 0.0  ;;  %vm2789_vm14 = vcmp.gt.f32.partialorder %v2412_v22, 0.0 }
 0x753   :  { %vm2790_vm15 = vcmp.gt.f32.partialorder %v2413_v2, 0.0 }
 0x754   :  { %v2798_v56 = vmul.f32 1.442695, %v2793_v25  ;;  %v2800_v53 = vmul.f32 1.442695, %v2794_v61 }
 0x755   :  { %v1678_v1 = vpop.permute.xlu0 %1677 }
 0x756   :  { %v1686_v52 = vadd.f32 %v1678_v1, %v1582_v4  ;;  %3674 = vpow2.f32 %v2798_v56 }
 0x757   :  { %3676 = vpow2.f32 %v2800_v53 }
 0x759   :  { %v1880_v36 = vpop.permute.xlu0 %1879 }
 0x75a   :  { %v1891_v11 = vadd.f32 %v1880_v36, %v1787_v15 }
 0x75d   :  { %v1782_v13 = vpop.permute.xlu0 %1781 }
 0x75e   :  { %v1790_v7 = vadd.f32 %v1782_v13, %v1686_v52 }
 0x761   :  { %v1984_v31 = vpop.permute.xlu0 %1983 }
 0x762   :  { %v1995_v42 = vadd.f32 %v1984_v31, %v1891_v11 }
 0x765   :  { %v1886_v41 = vpop.permute.xlu0 %1885 }
 0x766   :  { %v1894_v12 = vadd.f32 %v1886_v41, %v1790_v7  ;;  %v3675_v41 = vpop.eup %3674 }
 0x767   :  { %v3677_v46 = vpop.eup %3676  ;;  %v3534_v20 = vadd.f32 -1.0, %v3675_v41 }
 0x768   :  { %v3535_v35 = vadd.f32 -1.0, %v3677_v46 }
 0x769   :  { %v2088_v55 = vpop.permute.xlu0 %2087  ;;  %v2809_v54 = vsel %vm2789_vm14, %v2412_v22, %v3534_v20 }
 0x76a   :  { %v2099_v29 = vadd.f32 %v2088_v55, %v1995_v42  ;;  %v2810_v34 = vsel %vm2790_vm15, %v2413_v2, %v3535_v35 }
 0x76b   :  { %v2815_v17 = vsel %vm2439_vm13, %v2810_v34, 0.0 }
 0x76d   :  { %v1990_v57 = vpop.permute.xlu0 %1989 }
 0x76e   :  { %v1998_v23 = vadd.f32 %v1990_v57, %v1894_v12 }
 0x771   :  { %v2192_v9 = vpop.permute.xlu0 %2191 }
 0x772   :  { %v2203_v30 = vadd.f32 %v2192_v9, %v2099_v29  ;;  %v2813_v9 = vsel %vm2439_vm13, %v2809_v54, 0.0 }
 0x775   :  { %v2094_v39 = vpop.permute.xlu0 %2093 }
 0x776   :  { %v2102_v36 = vadd.f32 %v2094_v39, %v1998_v23 }
 0x779   :  { %v2296_v16 = vpop.permute.xlu0 %2295 }
 0x77a   :  { %v2307_v6 = vadd.f32 %v2296_v16, %v2203_v30 }
 0x77d   :  { %v2198_v27 = vpop.permute.xlu0 %2197 }
 0x77e   :  { %v2206_v31 = vadd.f32 %v2198_v27, %v2102_v36 }
 0x781   :  { %v2400_v49 = vpop.permute.xlu0 %2399 }
 0x782   :  { %v2411_v60 = vadd.f32 %v2400_v49, %v2307_v6 }
 0x784   :  { %v2792_v59 = vmin.f32 %v2411_v60, 0.0  ;;  %vm2788_vm12 = vcmp.gt.f32.partialorder %v2411_v60, 0.0 }
 0x785   :  { %v2302_v45 = vpop.permute.xlu0 %2301 }
 0x786   :  { %v2796_v14 = vmul.f32 1.442695, %v2792_v59  ;;  %v2310_v1 = vadd.f32 %v2302_v45, %v2206_v31 }
 0x788   :  { %3678 = vpow2.f32 %v2796_v14 }
 0x789   :  { %v2406_v62 = vpop.permute.xlu0 %2405 }
 0x78a   :  { %v2414_v13 = vadd.f32 %v2406_v62, %v2310_v1 }
 0x78c   :  { %v2795_v55 = vmin.f32 %v2414_v13, 0.0  ;;  %vm2791_vm1 = vcmp.gt.f32.partialorder %v2414_v13, 0.0 }
 0x78e   :  { %v2802_v37 = vmul.f32 1.442695, %v2795_v55 }
 0x790   :  { %3680 = vpow2.f32 %v2802_v37 }
 0x795   :  { %v3679_v33 = vpop.eup %3678 }
 0x796   :  { %v3533_v57 = vadd.f32 -1.0, %v3679_v33 }
 0x798   :  { %v2808_v8 = vsel %vm2788_vm12, %v2411_v60, %v3533_v57 }
 0x799   :  { %v2812_v5 = vsel %vm2439_vm13, %v2808_v8, 0.0 }
 0x79a   :  { %v2814_v63 = vadd.f32 %v2813_v9, %v2812_v5 }
 0x79c   :  { %v2816_v39 = vadd.f32 %v2815_v17, %v2814_v63 }
 0x79d   :  { %v3681_v44 = vpop.eup %3680 }
 0x79e   :  { %v3536_v50 = vadd.f32 -1.0, %v3681_v44 }
 0x7a0   :  { %v2811_v24 = vsel %vm2791_vm1, %v2414_v13, %v3536_v50 }
 0x7a1   :  { %v2817_v15 = vsel %vm2439_vm13, %v2811_v24, 0.0 }
 0x7a2   :  { %v2818_v40 = vadd.f32 %v2817_v15, %v2816_v39  ;;  %v2489_v15 = vmul.f32 %v5547_v10, %v4687_v28 }
 0x7a4   :  { %2819 = vadd.xlane.f32.xlu0 %v2818_v40 }
 0x7bf   :  { %v2723_v48 = vpop.xlane.xlu1 %2722 }
 0x7c0   :  { %v2724_v47 = vrot.slane %v2723_v48, 4 }
 0x7c2   :  { %v2725_v11 = vadd.f32 %v2724_v47, %v2723_v48  ;;  %v2490_v47 = vmul.f32 %v5547_v10, %v4690_v19 }
 0x7c4   :  { %v2726_v22 = vrot.slane %v2725_v11, 2 }
 0x7c6   :  { %v2727_v0 = vadd.f32 %v2726_v22, %v2725_v11 }
 0x7c8   :  { %v2728_v16 = vrot.slane %v2727_v0, 1 }
 0x7ca   :  { %v2729_v4 = vadd.f32 %v2728_v16, %v2727_v0 }
 0x7cc   :  { %3607 = vpush %v2729_v4 }
 0x7fd   :  { %s3608_s14 = spop %3607 }
 0x7fe   :  { %s2731_s16 = smul.f32 0.00080128206, %s3608_s14 }
 0x800   :  { %v2732_v42 = vstv %s2731_s16 }
 0x801   :  { %3682 = vrsqrt.f32 %v2732_v42 }
 0x80e   :  { %v3683_v2 = vpop.eup %3682 }
 0x80f   :  { %3609 = vpush %v3683_v2 }
 0x82d   :  { %v2820_v52 = vpop.xlane.xlu0 %2819 }
 0x82e   :  { %v2821_v29 = vrot.slane %v2820_v52, 4 }
 0x830   :  { %v2822_v25 = vadd.f32 %v2821_v29, %v2820_v52 }
 0x832   :  { %v2823_v27 = vrot.slane %v2822_v25, 2 }
 0x834   :  { %v2824_v7 = vadd.f32 %v2823_v27, %v2822_v25 }
 0x836   :  { %v2825_v30 = vrot.slane %v2824_v7, 1 }
 0x838   :  { %v2826_v61 = vadd.f32 %v2825_v30, %v2824_v7 }
 0x83a   :  { %3611 = vpush %v2826_v61 }
 0x840   :  { %s3610_s18 = spop %3609 }
 0x841   :  { %v5591_v12 = vstv %s3610_s18 }
 0x842   :  { %v2736_v6 = vmul.f32 %v5591_v12, %v5535_v21  ;;  %v2737_v56 = vmul.f32 %v5591_v12, %v5538_v18 }
 0x844   :  { %v2742_v49 = vrot.slane %v2736_v6, 1  ;;  %v2750_v23 = vrot.slane %v2737_v56, 1 }
 0x846   :  { %v2746_v60 = vmax.f32 %v2736_v6, %v2742_v49  ;;  %v2754_v53 = vmax.f32 %v2737_v56, %v2750_v23 }
 0x848   :  { %v2758_v36 = vrot.slane %v2746_v60, 3  ;;  %v2764_v59 = vrot.slane %v2754_v53, 6  ;;  %v2768_v45 = vrot.slane %v2754_v53, 1 }
 0x84a   :  { %v2772_v31 = vsel %vm2523_vm9, %v2746_v60, %v2758_v36 }
 0x84b   :  { %v2774_v14 = vsel %vm2526_vm10, %v2772_v31, %v2764_v59 }
 0x84c   :  { %v5600_v1 = vsel %vm2529_vm11, %v2774_v14, %v2768_v45  ;;  %v2535_v45 = vpop.permute.xlu1 %2534 }
 0x84d   :  { %2780 = vrot.lane.b32.xlu1 %v5600_v1, %s3763_s28 }
 0x86b   :  { %s3612_s20 = spop %3611 }
 0x86c   :  { %s2828_s23 = smul.f32 0.00080128206, %s3612_s20 }
 0x86e   :  { %v2829_v21 = vstv %s2828_s23 }
 0x86f   :  { %v5604_v18 = vsub.f32 %v2808_v8, %v2829_v21  ;;  %v5606_v62 = vsub.f32 %v2809_v54, %v2829_v21  ;;  %v5608_v13 = vsub.f32 %v2810_v34, %v2829_v21  ;;  %v5610_v55 = vsub.f32 %v2811_v24, %v2829_v21 }
 0x870   :  { %v2612_v54 = vstv %s5530_s3 }
 0x871   :  { %v2834_v37 = vmul.f32 %v5604_v18, %v5604_v18  ;;  %v2835_v41 = vmul.f32 %v5606_v62, %v5606_v62  ;;  %v2836_v46 = vmul.f32 %v5608_v13, %v5608_v13  ;;  %v2837_v20 = vmul.f32 %v5610_v55, %v5610_v55 }
 0x872   :  { %v2613_v63 = vmul.f32 %v2612_v54, %v5105_v38  ;;  %v2614_v44 = vmul.f32 %v2612_v54, %v5108_v26  ;;  %v2615_v50 = vmul.f32 %v2612_v54, %v5111_v43  ;;  %v2616_v24 = vmul.f32 %v2612_v54, %v5114_v58 }
 0x873   :  { %v2838_v33 = vsel %vm2439_vm13, %v2834_v37, 0.0  ;;  %v2839_v57 = vsel %vm2439_vm13, %v2835_v41, 0.0  ;;  %v2841_v8 = vsel %vm2439_vm13, %v2836_v46, 0.0  ;;  %v2843_v9 = vsel %vm2439_vm13, %v2837_v20, 0.0 }
 0x874   :  { %v2840_v35 = vadd.f32 %v2839_v57, %v2838_v33  ;;  %v2619_v17 = vrot.slane %v2613_v63, 1  ;;  %v2627_v39 = vrot.slane %v2614_v44, 1  ;;  %v2620_v40 = vrot.slane %v2615_v50, 1 }
 0x875   :  { %v2628_v11 = vrot.slane %v2616_v24, 1  ;;  %v2494_v38 = vrot.slane %v2489_v15, 1  ;;  %v2502_v26 = vrot.slane %v2490_v47, 1  ;;  %vm2923_vm13 = vcmask 1043456  }
 0x876   :  { %v2842_v5 = vadd.f32 %v2841_v8, %v2840_v35  ;;  %v2623_v48 = vmax.f32 %v2613_v63, %v2619_v17  ;;  %v2631_v22 = vmax.f32 %v2614_v44, %v2627_v39  ;;  %v2624_v0 = vmax.f32 %v2615_v50, %v2620_v40  ;;  %v5654_v44 = vld [vmem:[#allocation3] sm:$0xff] }
 0x877   :  { %v2632_v4 = vmax.f32 %v2616_v24, %v2628_v11  ;;  %v2498_v42 = vmax.f32 %v2489_v15, %v2494_v38  ;;  %v2506_v52 = vmax.f32 %v2490_v47, %v2502_v26  ;;  %v2540_v37 = vmax.f32 %v5573_v32, %v2535_v45 }
 0x878   :  { %v2844_v34 = vadd.f32 %v2843_v9, %v2842_v5  ;;  %v2635_v16 = vrot.slane %v2623_v48, 3  ;;  %v2641_v43 = vrot.slane %v2631_v22, 6  ;;  %v2636_v2 = vrot.slane %v2624_v0, 3 }
 0x879   :  { %v2642_v29 = vrot.slane %v2632_v4, 6  ;;  %v2510_v25 = vrot.slane %v2498_v42, 3  ;;  %v2645_v27 = vrot.slane %v2631_v22, 1  ;;  %v2516_v7 = vrot.slane %v2506_v52, 6 }
 0x87a   :  { %2845 = vadd.xlane.f32.xlu0 %v2844_v34  ;;  %v2649_v58 = vsel %vm2523_vm9, %v2623_v48, %v2635_v16  ;;  %v2650_v19 = vsel %vm2523_vm9, %v2624_v0, %v2636_v2  ;;  %v2646_v61 = vrot.slane %v2632_v4, 1  ;;  %v2520_v23 = vrot.slane %v2506_v52, 1 }
 0x87b   :  { %v2651_v28 = vsel %vm2526_vm10, %v2649_v58, %v2641_v43  ;;  %v2652_v30 = vsel %vm2526_vm10, %v2650_v19, %v2642_v29  ;;  %v2525_v6 = vsel %vm2523_vm9, %v2498_v42, %v2510_v25  ;;  %v2928_v35 = vlaneseq }
 0x87c   :  { %v2653_v10 = vsel %vm2529_vm11, %v2651_v28, %v2645_v27  ;;  %v5641_v56 = vsel %vm2529_vm11, %v2652_v30, %v2646_v61  ;;  %v2528_v49 = vsel %vm2526_vm10, %v2525_v6, %v2516_v7  ;;  %v3773_v50 = vmov 1.0  }
 0x87d   :  { %v5647_v60 = vsel %vm2529_vm11, %v2528_v49, %v2520_v23  ;;  %v2929_v8 = vshrl.u32 %v2928_v35, 7  ;;  %v2935_v54 = vand.u32 127, %v2928_v35  ;;  %v2738_v39 = vmul.f32 %v5591_v12, %v5541_v3 }
 0x87e   :  { %v2739_v15 = vmul.f32 %v5591_v12, %v5544_v51 }
 0x87f   :  { %v2933_v5 = vadd.s32 32, %v2929_v8  ;;  %v2936_v9 = vmul.u32 4, %v2935_v54  ;;  %v2932_v34 = vadd.s32 24, %v2929_v8  ;;  %v2931_v63 = vadd.s32 16, %v2929_v8 }
 0x880   :  { %v2743_v40 = vrot.slane %v2738_v39, 1  ;;  %v2930_v0 = vadd.s32 8, %v2929_v8  ;;  %v2751_v42 = vrot.slane %v2739_v15, 1 }
 0x881   :  { %vm2941_vm3 = vcmp.eq.s32.totalorder %v2933_v5, %v2936_v9  ;;  %vm2940_vm4 = vcmp.eq.s32.totalorder %v2932_v34, %v2936_v9  ;;  %vm2939_vm5 = vcmp.eq.s32.totalorder %v2931_v63, %v2936_v9  ;;  %vm2937_vm6 = vcmp.eq.s32.totalorder %v2929_v8, %v2936_v9 }
 0x882   :  { %v3541_v32 = vsel %vm2941_vm3, 1.0, %v5654_v44  ;;  %v2747_v3 = vmax.f32 %v2738_v39, %v2743_v40 }
 0x883   :  { %3577 = vmatprep.subr.msk.mxu1 %vm77_vm0, %v3541_v32 }
 0x884   :  { %3578 = vmatpush3.msk.msra.mxu1 %vm77_vm0, %v3541_v32  ;;  %vm2938_vm0 = vcmp.eq.s32.totalorder %v2930_v0, %v2936_v9  ;;  %v2759_v29 = vrot.slane %v2747_v3, 3 }
 0x885   :  { %3579 = vmatprep.subr.msk.mxu1 %vm2940_vm4, %v3773_v50 }
 0x886   :  { %3580 = vmatpush3.msk.msra.mxu1 %vm2940_vm4, %v3773_v50  ;;  %v2773_v6 = vsel %vm2523_vm9, %v2747_v3, %v2759_v29 }
 0x887   :  { %3581 = vmatprep.subr.msk.mxu1 %vm2939_vm5, %v3773_v50 }
 0x888   :  { %3582 = vmatpush3.msk.msra.mxu1 %vm2939_vm5, %v3773_v50 }
 0x889   :  { %3583 = vmatprep.subr.msk.mxu1 %vm2938_vm0, %v3773_v50 }
 0x88a   :  { %3584 = vmatpush3.msk.msra.mxu1 %vm2938_vm0, %v3773_v50 }
 0x88b   :  { %3585 = vmatprep.subr.msk.mxu1 %vm2937_vm6, %v3773_v50 }
 0x88c   :  { %3586 = vmatpush3.msk.msra.mxu1 %vm2937_vm6, %v3773_v50 }
 0x88d   :  { %3325 = vmatprep.subr.mxu1 %v5654_v44 }
 0x890   :  { %2657 = vrot.lane.b32.xlu0 %v2653_v10, %s3763_s28 }
 0x894   :  { %2659 = vrot.lane.b32.xlu0 %v5641_v56, %s3763_s28 }
 0x898   :  { %2536 = vrot.lane.b32.xlu0 %v5647_v60, %s3763_s28 }
 0x8bf   :  { %v2781_v45 = vpop.permute.xlu1 %2780 }
 0x903   :  { %v2846_v53 = vpop.xlane.xlu0 %2845 }
 0x904   :  { %v2847_v36 = vrot.slane %v2846_v53, 4 }
 0x906   :  { %v2848_v59 = vadd.f32 %v2847_v36, %v2846_v53 }
 0x907   :  { %v2658_v31 = vpop.permute.xlu0 %2657 }
 0x908   :  { %v2849_v14 = vrot.slane %v2848_v59, 2  ;;  %v2663_v21 = vmax.f32 %v2653_v10, %v2658_v31 }
 0x90a   :  { %v2913_v41 = vrot.slane %v2663_v21, 4  ;;  %v2850_v46 = vadd.f32 %v2849_v14, %v2848_v59 }
 0x90b   :  { %v2660_v59 = vpop.permute.xlu0 %2659 }
 0x90c   :  { %v2924_v20 = vsel %vm2923_vm13, %v2540_v37, %v2913_v41  ;;  %v2851_v33 = vrot.slane %v2850_v46, 1  ;;  %v2664_v14 = vmax.f32 %v5641_v56, %v2660_v59 }
 0x90d   :  { %3587 = vmatprep.mubr.msk.f32.mxu1 %vm2952_vm2, %v2924_v20 }
 0x90e   :  { %v2852_v57 = vadd.f32 %v2851_v33, %v2850_v46  ;;  %v2786_v46 = vmax.f32 %v5600_v1, %v2781_v45  ;;  %v2914_v33 = vrot.slane %v2664_v14, 4 }
 0x90f   :  { %v2537_v31 = vpop.permute.xlu0 %2536 }
 0x910   :  { %3613 = vpush %v2852_v57  ;;  %v2541_v41 = vmax.f32 %v5647_v60, %v2537_v31 }
 0x912   :  { %v2925_v54 = vsel %vm2923_vm13, %v2541_v41, %v2914_v33 }
 0x941   :  { %s3614_s17 = spop %3613 }
 0x942   :  { %s2854_s19 = smul.f32 0.00080128206, %s3614_s17 }
 0x944   :  { %v2855_v17 = vstv %s2854_s19 }
 0x945   :  { %3684 = vrsqrt.f32 %v2855_v17 }
 0x952   :  { %v3685_v24 = vpop.eup %3684 }
 0x953   :  { %3615 = vpush %v3685_v24 }
 0x984   :  { %s3616_s21 = spop %3615 }
 0x985   :  { %v2858_v48 = vstv %s3616_s21 }
 0x986   :  { %v2859_v47 = vmul.f32 %v2858_v48, %v5604_v18  ;;  %v2860_v11 = vmul.f32 %v2858_v48, %v5606_v62  ;;  %v2861_v22 = vmul.f32 %v2858_v48, %v5608_v13  ;;  %v2862_v38 = vmul.f32 %v2858_v48, %v5610_v55 }
 0x987   :  { %v2755_v55 = vmax.f32 %v2739_v15, %v2751_v42 }
 0x988   :  { %v2865_v16 = vrot.slane %v2859_v47, 1  ;;  %v2866_v26 = vrot.slane %v2861_v22, 1  ;;  %v2873_v4 = vrot.slane %v2860_v11, 1  ;;  %v2874_v43 = vrot.slane %v2862_v38, 1 }
 0x989   :  { %v2765_v7 = vrot.slane %v2755_v55, 6  ;;  %v2769_v53 = vrot.slane %v2755_v55, 1 }
 0x98a   :  { %v2869_v51 = vmax.f32 %v2859_v47, %v2865_v16  ;;  %v2870_v12 = vmax.f32 %v2861_v22, %v2866_v26  ;;  %v2877_v2 = vmax.f32 %v2860_v11, %v2873_v4  ;;  %v2878_v58 = vmax.f32 %v2862_v38, %v2874_v43 }
 0x98b   :  { %v2775_v23 = vsel %vm2526_vm10, %v2773_v6, %v2765_v7 }
 0x98c   :  { %v2881_v18 = vrot.slane %v2869_v51, 3  ;;  %v2882_v62 = vrot.slane %v2870_v12, 3  ;;  %v2887_v13 = vrot.slane %v2877_v2, 6  ;;  %v2888_v52 = vrot.slane %v2878_v58, 6 }
 0x98d   :  { %v2891_v28 = vrot.slane %v2877_v2, 1  ;;  %v2892_v61 = vrot.slane %v2878_v58, 1  ;;  %v2777_v36 = vsel %vm2529_vm11, %v2775_v23, %v2769_v53  ;;  %v5777_v23 = vld [vmem:[%s5862_s5] sm:$0xff] }
 0x98e   :  { %v2895_v25 = vsel %vm2523_vm9, %v2869_v51, %v2881_v18  ;;  %v2896_v27 = vsel %vm2523_vm9, %v2870_v12, %v2882_v62  ;;  %v3251_v53 = vcombine.high %v5777_v23, %v5777_v23  ;;  %vm3252_vm9 = vcmask 392192  }
 0x98f   :  { %v2897_v19 = vsel %vm2526_vm10, %v2895_v25, %v2887_v13  ;;  %v2898_v30 = vsel %vm2526_vm10, %v2896_v27, %v2888_v52  ;;  %vm3408_vm10 = vcmask 80896  }
 0x990   :  { %v2899_v10 = vsel %vm2529_vm11, %v2897_v19, %v2891_v28  ;;  %v2900_v49 = vsel %vm2529_vm11, %v2898_v30, %v2892_v61  ;;  %3551 = vmatprep.mubr.msk.f32.mxu0 %vm3252_vm9, %v3251_v53 }
 0x991   :  { %2903 = vrot.lane.b32.xlu1 %v2899_v10, %s3763_s28 }
 0x995   :  { %2905 = vrot.lane.b32.xlu1 %v2900_v49, %s3763_s28 }
 0x999   :  { %2782 = vrot.lane.b32.xlu1 %v2777_v36, %s3763_s28 }
 0xa03   :  { %v2904_v21 = vpop.permute.xlu1 %2903 }
 0xa04   :  { %v2909_v37 = vmax.f32 %v2899_v10, %v2904_v21 }
 0xa06   :  { %v2919_v20 = vrot.slane %v2909_v37, 4 }
 0xa07   :  { %v2906_v57 = vpop.permute.xlu1 %2905 }
 0xa08   :  { %v2910_v35 = vmax.f32 %v2900_v49, %v2906_v57  ;;  %v2926_v8 = vsel %vm2923_vm13, %v2786_v46, %v2919_v20 }
 0xa09   :  { %3588 = vmatmul.mubr.msk.f32.vlgmr.msra.gmra.mxu1 %vm2952_vm2, %v2926_v8 }
 0xa0a   :  { %3590 = vmatprep.mubr.msk.f32.mxu1 %vm2952_vm2, %v2925_v54  ;;  %v2920_v56 = vrot.slane %v2910_v35, 4 }
 0xa0b   :  { %v2783_v5 = vpop.permute.xlu1 %2782 }
 0xa0c   :  { %v2787_v9 = vmax.f32 %v2777_v36, %v2783_v5 }
 0xa0e   :  { %v2927_v34 = vsel %vm2923_vm13, %v2787_v9, %v2920_v56 }
 0xa0f   :  { %3591 = vmatmul.mubr.msk.f32.gmra.mxu1 %vm2952_vm2, %v2927_v34 }
 0xa10   :  { %3552 = vmatprep.mubr.msk.f32.mxu1 %vm3252_vm9, %v3251_v53 }
 0xac9   :  { %v3589_v1 = vpop.f32.mrf.mxu1 }
 0xaca   :  { %3081 = vrot.lane.b32.xlu1 %v3589_v1, %s3774_s22 }
 0xacb   :  { %v3034_v60 = vpop.f32.mrf.mxu1 }
 0xace   :  { %3067 = vrot.lane.b32.xlu1 %v3034_v60, %s3774_s22 }
 0xacf   :  { %v3592_v63 = vpop.f32.mrf.mxu1 }
 0xad0   :  { %3083 = vrot.lane.b32.xlu0 %v3592_v63, %s3774_s22 }
 0xad1   :  { %v3044_v32 = vpop.f32.mrf.mxu1 }
 0xad4   :  { %3069 = vrot.lane.b32.xlu0 %v3044_v32, %s3774_s22 }
 0xb3c   :  { %v3082_v50 = vpop.permute.xlu1 %3081 }
 0xb3d   :  { %3087 = vst.msk [vmem:[#allocation3 + $0x1a] sm:$0xf] %vm3073_vm7, %v3082_v50 }
 0xb3e   :  { %3089 = vst.msk [vmem:[#allocation3 + $0x21] sm:$0xf0] %vm3076_vm8, %v3082_v50 }
 0xb40   :  { %v3068_v17 = vpop.permute.xlu1 %3067 }
 0xb41   :  { %3074 = vst.msk [vmem:[#allocation3 + $0x4] sm:$0xf] %vm3073_vm7, %v3068_v17 }
 0xb42   :  { %3077 = vst.msk [vmem:[#allocation3 + $0xb] sm:$0xf0] %vm3076_vm8, %v3068_v17  ;;  %v3084_v24 = vpop.permute.xlu0 %3083 }
 0xb43   :  { %3088 = vst.msk [vmem:[#allocation3 + $0x4a] sm:$0xf] %vm3073_vm7, %v3084_v24 }
 0xb44   :  { %3090 = vst.msk [vmem:[#allocation3 + $0x51] sm:$0xf0] %vm3076_vm8, %v3084_v24  ;;  %v5693_v40 = vld [vmem:[#allocation3 + $0x18] sm:$0xff] }
 0xb45   :  { %v5689_v39 = vld [vmem:[#allocation3 + $0x20] sm:$0xff]  ;;  %v5711_v38 = vld [vmem:[#allocation3 + $0x28] sm:$0xf]  ;;  %v3120_v3 = vrot.slane %v5693_v40, 4 }
 0xb46   :  { %3181 = vrot.lane.b32.xlu1 %v5689_v39, %s3764_s29  ;;  %v3070_v15 = vpop.permute.xlu0 %3069  ;;  %v3122_v0 = vrot.slane %v5689_v39, 4  ;;  %v3124_v43 = vrot.slane %v5711_v38, 4 }
 0xb47   :  { %3075 = vst.msk [vmem:[#allocation3 + $0x34] sm:$0xf] %vm3073_vm7, %v3070_v15 }
 0xb48   :  { %3078 = vst.msk [vmem:[#allocation3 + $0x3b] sm:$0xf0] %vm3076_vm8, %v3070_v15  ;;  %v5695_v48 = vld [vmem:[#allocation3] sm:$0xff]  ;;  %v3125_v42 = vsel %vm2923_vm13, %v3122_v0, %v3124_v43  ;;  %v3123_v2 = vsel %vm2923_vm13, %v3120_v3, %v3122_v0 }
 0xb49   :  { %3173 = vrot.lane.b32.xlu0 %v5695_v48, %s3764_s29  ;;  %v5701_v47 = vld [vmem:[#allocation3 + $0x10] sm:$0xff]  ;;  %v5709_v22 = vld [vmem:[#allocation3 + $0x8] sm:$0xff]  ;;  %v3115_v16 = vrot.slane %v5695_v48, 4 }
 0xb4a   :  { %3179 = vrot.lane.b32.xlu1 %v5693_v40, %s3764_s29  ;;  %v3116_v26 = vrot.slane %v5709_v22, 4  ;;  %v5716_v4 = vld [vmem:[#allocation3 + $0x48] sm:$0xff]  ;;  %v3118_v12 = vrot.slane %v5701_v47, 4 }
 0xb4b   :  { %v5703_v11 = vld [vmem:[#allocation3 + $0x50] sm:$0xff]  ;;  %v5741_v13 = vld [vmem:[#allocation3 + $0x58] sm:$0xf]  ;;  %v3131_v52 = vrot.slane %v5716_v4, 4 }
 0xb4c   :  { %v3117_v51 = vsel %vm2923_vm13, %v3115_v16, %v3116_v26  ;;  %v3121_v18 = vsel %vm2923_vm13, %v3118_v12, %v3120_v3  ;;  %v3133_v55 = vrot.slane %v5703_v11, 4  ;;  %v3119_v29 = vsel %vm2923_vm13, %v3116_v26, %v3118_v12 }
 0xb4d   :  { %3193 = vrot.lane.b32.xlu0 %v5703_v11, %s3764_s29  ;;  %v3135_v25 = vrot.slane %v5741_v13, 4 }
 0xb4e   :  { %3177 = vrot.lane.b32.xlu1 %v5701_v47, %s3764_s29  ;;  %v5746_v28 = vld [vmem:[#allocation3 + $0x30] sm:$0xff]  ;;  %v3134_v10 = vsel %vm2923_vm13, %v3131_v52, %v3133_v55 }
 0xb4f   :  { %v5730_v58 = vld [vmem:[#allocation3 + $0x40] sm:$0xff]  ;;  %v5736_v62 = vld [vmem:[#allocation3 + $0x38] sm:$0xff]  ;;  %v3136_v19 = vsel %vm2923_vm13, %v3133_v55, %v3135_v25  ;;  %v3126_v61 = vrot.slane %v5746_v28, 4 }
 0xb50   :  { %v3129_v27 = vrot.slane %v5730_v58, 4  ;;  %v3127_v7 = vrot.slane %v5736_v62, 4 }
 0xb51   :  { %3191 = vrot.lane.b32.xlu0 %v5716_v4, %s3764_s29 }
 0xb52   :  { %3175 = vrot.lane.b32.xlu1 %v5709_v22, %s3764_s29  ;;  %v3132_v30 = vsel %vm2923_vm13, %v3129_v27, %v3131_v52  ;;  %v3130_v6 = vsel %vm2923_vm13, %v3127_v7, %v3129_v27  ;;  %v3128_v49 = vsel %vm2923_vm13, %v3126_v61, %v3127_v7 }
 0xb55   :  { %3139 = vrot.lane.b32.xlu0 %v3117_v51, %s3763_s28 }
 0xb56   :  { %3147 = vrot.lane.b32.xlu1 %v3125_v42, %s3763_s28 }
 0xb59   :  { %3189 = vrot.lane.b32.xlu0 %v5730_v58, %s3764_s29 }
 0xb5a   :  { %3145 = vrot.lane.b32.xlu1 %v3123_v2, %s3763_s28 }
 0xb5d   :  { %3187 = vrot.lane.b32.xlu0 %v5736_v62, %s3764_s29 }
 0xb5e   :  { %3143 = vrot.lane.b32.xlu1 %v3121_v18, %s3763_s28 }
 0xb61   :  { %3185 = vrot.lane.b32.xlu0 %v5746_v28, %s3764_s29 }
 0xb62   :  { %3141 = vrot.lane.b32.xlu1 %v3119_v29, %s3763_s28 }
 0xb65   :  { %3157 = vrot.lane.b32.xlu0 %v3134_v10, %s3763_s28 }
 0xb66   :  { %3159 = vrot.lane.b32.xlu1 %v3136_v19, %s3763_s28 }
 0xb69   :  { %3155 = vrot.lane.b32.xlu0 %v3132_v30, %s3763_s28 }
 0xb6a   :  { %3137 = vrot.lane.b32.xlu1 %v3115_v16, %s3763_s28 }
 0xb6d   :  { %3153 = vrot.lane.b32.xlu0 %v3130_v6, %s3763_s28 }
 0xb6e   :  { %3149 = vrot.lane.b32.xlu1 %v3126_v61, %s3763_s28 }
 0xb71   :  { %3151 = vrot.lane.b32.xlu0 %v3128_v49, %s3763_s28 }
 0xb72   :  { %3219 = vrot.lane.b32.xlu1 %v3125_v42, %s3765_s8 }
 0xb75   :  { %3231 = vrot.lane.b32.xlu0 %v3136_v19, %s3765_s8 }
 0xb76   :  { %3217 = vrot.lane.b32.xlu1 %v3123_v2, %s3765_s8  ;;  %v3400_v2 = vstv %s5863_s6 }
 0xb79   :  { %3229 = vrot.lane.b32.xlu0 %v3134_v10, %s3765_s8 }
 0xb7a   :  { %3215 = vrot.lane.b32.xlu1 %v3121_v18, %s3765_s8 }
 0xb7d   :  { %3221 = vrot.lane.b32.xlu0 %v3126_v61, %s3765_s8 }
 0xb7e   :  { %3213 = vrot.lane.b32.xlu1 %v3119_v29, %s3765_s8 }
 0xb81   :  { %3227 = vrot.lane.b32.xlu0 %v3132_v30, %s3765_s8 }
 0xb82   :  { %3195 = vrot.lane.b32.xlu1 %v5741_v13, %s3764_s29 }
 0xb85   :  { %3225 = vrot.lane.b32.xlu0 %v3130_v6, %s3765_s8 }
 0xb86   :  { %3211 = vrot.lane.b32.xlu1 %v3117_v51, %s3765_s8 }
 0xb89   :  { %3223 = vrot.lane.b32.xlu0 %v3128_v49, %s3765_s8 }
 0xb8a   :  { %3209 = vrot.lane.b32.xlu1 %v3115_v16, %s3765_s8 }
 0xb8d   :  { %3183 = vrot.lane.b32.xlu0 %v5711_v38, %s3764_s29  ;;  %s3775_s29 = smov [#allocation10]  }
 0xb8e   :  { %s3416_s8 = sshll.u32 %s3775_s29, 4  ;;  %s3417_s8 = int_to_ptr.vmem [resolvable:$true] %s3416_s8 }
 0xb8f   :  { %s3731_s2 = scalar_lea.vmem %s3417_s8, 128  ;;  %p3736_p11 = scmp.lt.s32.totalorder %s3417_s8, %s3417_s8 }
 0xb90   :  { %p3732_p10 = scmp.ne.s32.totalorder %s3417_s8, %s3731_s2  ;;  %p3737_p12 = scmp.lt.s32.totalorder %s3731_s2, %s3731_s2 }
 0xb92   :  { %p3738_p13 = por %p3737_p12, %p3736_p11 }
 0xb94   :  { %p3739_p0 = pnand %p3738_p13, %p3732_p10 }
 0xbb8   :  { %v3182_v36 = vpop.permute.xlu1 %3181 }
 0xbb9   :  { %3256 = vmatpush1.msra.mxu0 %v3182_v36 }
 0xbba   :  { %3257 = vmatprep.subr.mxu0 %v5654_v44 }
 0xbbb   :  { %v3174_v59 = vpop.permute.xlu0 %3173 }
 0xbbc   :  { %v3180_v45 = vpop.permute.xlu1 %3179 }
 0xbbd   :  { %3258 = vmatpush1.msra.mxu0 %v3180_v45 }
 0xbbe   :  { %3259 = vmatprep.subr.mxu0 %v5654_v44 }
 0xbbf   :  { %v3194_v31 = vpop.permute.xlu0 %3193 }
 0xbc0   :  { %v3178_v14 = vpop.permute.xlu1 %3177  ;;  %3326 = vmatpush1.msra.mxu1 %v3194_v31 }
 0xbc1   :  { %3260 = vmatpush1.msra.mxu0 %v3178_v14  ;;  %3327 = vmatprep.subr.mxu1 %v5654_v44 }
 0xbc2   :  { %3261 = vmatprep.subr.mxu0 %v5654_v44 }
 0xbc3   :  { %v3192_v21 = vpop.permute.xlu0 %3191 }
 0xbc4   :  { %v3176_v37 = vpop.permute.xlu1 %3175  ;;  %3328 = vmatpush1.msra.mxu1 %v3192_v21 }
 0xbc5   :  { %3262 = vmatpush1.msra.mxu0 %v3176_v37  ;;  %3329 = vmatprep.subr.mxu1 %v5654_v44 }
 0xbc6   :  { %3263 = vmatprep.subr.mxu0 %v5654_v44 }
 0xbc7   :  { %3264 = vmatpush1.msra.mxu0 %v3174_v59  ;;  %v3140_v41 = vpop.permute.xlu0 %3139 }
 0xbc8   :  { %3265 = vmatprep.subr.mxu0 %v5654_v44  ;;  %v3148_v46 = vpop.permute.xlu1 %3147 }
 0xbc9   :  { %3266 = vmatpush1.msra.mxu0 %v3148_v46 }
 0xbca   :  { %3267 = vmatprep.subr.mxu0 %v5654_v44 }
 0xbcb   :  { %v3190_v20 = vpop.permute.xlu0 %3189 }
 0xbcc   :  { %v3146_v33 = vpop.permute.xlu1 %3145  ;;  %3330 = vmatpush1.msra.mxu1 %v3190_v20 }
 0xbcd   :  { %3268 = vmatpush1.msra.mxu0 %v3146_v33  ;;  %3331 = vmatprep.subr.mxu1 %v5654_v44 }
 0xbce   :  { %3269 = vmatprep.subr.mxu0 %v5654_v44 }
 0xbcf   :  { %v3188_v57 = vpop.permute.xlu0 %3187 }
 0xbd0   :  { %v3144_v35 = vpop.permute.xlu1 %3143  ;;  %3332 = vmatpush1.msra.mxu1 %v3188_v57 }
 0xbd1   :  { %3270 = vmatpush1.msra.mxu0 %v3144_v35  ;;  %3333 = vmatprep.subr.mxu1 %v5654_v44 }
 0xbd2   :  { %3271 = vmatprep.subr.mxu0 %v5654_v44 }
 0xbd3   :  { %v3186_v8 = vpop.permute.xlu0 %3185 }
 0xbd4   :  { %v3142_v54 = vpop.permute.xlu1 %3141  ;;  %3334 = vmatpush1.msra.mxu1 %v3186_v8 }
 0xbd5   :  { %3272 = vmatpush1.msra.mxu0 %v3142_v54  ;;  %3335 = vmatprep.subr.mxu1 %v5654_v44 }
 0xbd6   :  { %3273 = vmatprep.subr.mxu0 %v5654_v44 }
 0xbd7   :  { %3274 = vmatpush1.msra.mxu0 %v3140_v41  ;;  %v3158_v5 = vpop.permute.xlu0 %3157 }
 0xbd8   :  { %v3160_v56 = vpop.permute.xlu1 %3159  ;;  %3275 = vmatprep.subr.mxu0 %v5654_v44 }
 0xbd9   :  { %3336 = vmatpush1.msra.mxu1 %v3160_v56 }
 0xbda   :  { %3337 = vmatprep.subr.mxu1 %v5654_v44 }
 0xbdb   :  { %3338 = vmatpush1.msra.mxu1 %v3158_v5  ;;  %v3156_v9 = vpop.permute.xlu0 %3155 }
 0xbdc   :  { %3339 = vmatprep.subr.mxu1 %v5654_v44  ;;  %v3138_v34 = vpop.permute.xlu1 %3137 }
 0xbdd   :  { %v3245_v1 = vsel %vm2923_vm13, %v5711_v38, %v3138_v34  ;;  %3340 = vmatpush1.msra.mxu1 %v3156_v9 }
 0xbde   :  { %3276 = vmatpush1.msra.mxu0 %v3245_v1  ;;  %3341 = vmatprep.subr.mxu1 %v5654_v44 }
 0xbdf   :  { %3277 = vmatprep.subr.mxu0 %v5654_v44  ;;  %v3154_v60 = vpop.permute.xlu0 %3153 }
 0xbe0   :  { %3278 = vmatpush1.msra.mxu0 %v5689_v39  ;;  %v3150_v63 = vpop.permute.xlu1 %3149  ;;  %3342 = vmatpush1.msra.mxu1 %v3154_v60 }
 0xbe1   :  { %3279 = vmatprep.subr.mxu0 %v5654_v44  ;;  %3343 = vmatprep.subr.mxu1 %v5654_v44  ;;  %v3246_v17 = vsel %vm2923_vm13, %v5741_v13, %v3150_v63 }
 0xbe2   :  { %3280 = vmatpush1.msra.mxu0 %v5693_v40 }
 0xbe3   :  { %3281 = vmatprep.subr.mxu0 %v5654_v44  ;;  %v3152_v32 = vpop.permute.xlu0 %3151 }
 0xbe4   :  { %3282 = vmatpush1.msra.mxu0 %v5701_v47  ;;  %v3220_v50 = vpop.permute.xlu1 %3219  ;;  %3344 = vmatpush1.msra.mxu1 %v3152_v32 }
 0xbe5   :  { %3283 = vmatprep.subr.mxu0 %v5654_v44  ;;  %3345 = vmatprep.subr.mxu1 %v5654_v44 }
 0xbe6   :  { %3284 = vmatpush1.msra.mxu0 %v5709_v22  ;;  %3346 = vmatpush1.msra.mxu1 %v3246_v17 }
 0xbe7   :  { %3285 = vmatprep.subr.mxu0 %v5654_v44  ;;  %v3232_v24 = vpop.permute.xlu0 %3231  ;;  %3347 = vmatprep.subr.mxu1 %v5654_v44 }
 0xbe8   :  { %3286 = vmatpush1.msra.mxu0 %v5695_v48  ;;  %v3218_v39 = vpop.permute.xlu1 %3217  ;;  %3348 = vmatpush1.msra.mxu1 %v5703_v11 }
 0xbe9   :  { %3307 = vmatprep.subr.mxu0 %v5654_v44  ;;  %3349 = vmatprep.subr.mxu1 %v5654_v44 }
 0xbea   :  { %3308 = vmatpush2.msra.mxu0 %v3220_v50  ;;  %3350 = vmatpush1.msra.mxu1 %v5716_v4 }
 0xbeb   :  { %3309 = vmatprep.subr.mxu0 %v5654_v44  ;;  %v3230_v15 = vpop.permute.xlu0 %3229  ;;  %3351 = vmatprep.subr.mxu1 %v5654_v44 }
 0xbec   :  { %3310 = vmatpush2.msra.mxu0 %v3218_v39  ;;  %v3216_v40 = vpop.permute.xlu1 %3215  ;;  %3352 = vmatpush1.msra.mxu1 %v5730_v58 }
 0xbed   :  { %3311 = vmatprep.subr.mxu0 %v5654_v44  ;;  %3353 = vmatprep.subr.mxu1 %v5654_v44 }
 0xbee   :  { %3312 = vmatpush2.msra.mxu0 %v3216_v40  ;;  %3354 = vmatpush1.msra.mxu1 %v5736_v62 }
 0xbef   :  { %3313 = vmatprep.subr.mxu0 %v5654_v44  ;;  %v3222_v48 = vpop.permute.xlu0 %3221  ;;  %3355 = vmatprep.subr.mxu1 %v5654_v44 }
 0xbf0   :  { %v3214_v47 = vpop.permute.xlu1 %3213  ;;  %3356 = vmatpush1.msra.mxu1 %v5746_v28 }
 0xbf1   :  { %3314 = vmatpush2.msra.mxu0 %v3214_v47  ;;  %3377 = vmatprep.subr.mxu1 %v5654_v44 }
 0xbf2   :  { %3315 = vmatprep.subr.mxu0 %v5654_v44  ;;  %3378 = vmatpush2.msra.mxu1 %v3232_v24 }
 0xbf3   :  { %v3228_v11 = vpop.permute.xlu0 %3227  ;;  %3379 = vmatprep.subr.mxu1 %v5654_v44 }
 0xbf4   :  { %v3196_v22 = vpop.permute.xlu1 %3195  ;;  %3380 = vmatpush2.msra.mxu1 %v3230_v15 }
 0xbf5   :  { %3381 = vmatprep.subr.mxu1 %v5654_v44  ;;  %v3248_v26 = vsel %vm2923_vm13, %v3196_v22, %v3222_v48 }
 0xbf6   :  { %3382 = vmatpush2.msra.mxu1 %v3228_v11 }
 0xbf7   :  { %v3226_v38 = vpop.permute.xlu0 %3225  ;;  %3383 = vmatprep.subr.mxu1 %v5654_v44 }
 0xbf8   :  { %v3212_v0 = vpop.permute.xlu1 %3211  ;;  %3384 = vmatpush2.msra.mxu1 %v3226_v38 }
 0xbf9   :  { %3316 = vmatpush2.msra.mxu0 %v3212_v0  ;;  %3385 = vmatprep.subr.mxu1 %v5654_v44 }
 0xbfa   :  { %3317 = vmatprep.subr.mxu0 %v5654_v44 }
 0xbfb   :  { %v3224_v16 = vpop.permute.xlu0 %3223 }
 0xbfc   :  { %3386 = vmatpush2.msra.mxu1 %v3224_v16  ;;  %v3210_v4 = vpop.permute.xlu1 %3209 }
 0xbfd   :  { %3387 = vmatprep.subr.mxu1 %v5654_v44 }
 0xbfe   :  { %3388 = vmatpush2.msra.mxu1 %v3248_v26 }
 0xbff   :  { %v3184_v43 = vpop.permute.xlu0 %3183  ;;  %3390 = vmatmul.mubr.f32.vlgmr.msra.gmra.mxu1 %v5777_v23 }
 0xc00   :  { %v3247_v3 = vsel %vm2923_vm13, %v3184_v43, %v3210_v4 }
 0xc01   :  { %3318 = vmatpush2.msra.mxu0 %v3247_v3 }
 0xc02   :  { %3320 = vmatmul.mubr.f32.vlgmr.msra.gmra.mxu0 %v5777_v23 }
 0xcbf   :  { %v3391_v42 = vpop.f32.mrf.mxu1 }
 0xcc0   :  { %v3396_v51 = vrot.slane %v3391_v42, 4 }
 0xcc1   :  { %v3393_v12 = vpop.f32.mrf.mxu1 }
 0xcc2   :  { %v3321_v58 = vpop.f32.mrf.mxu0 }
 0xcc3   :  { %v3398_v44 = vsel %vm2923_vm13, %v3321_v58, %v3396_v51 }
 0xcc4   :  { %v3401_v18 = vadd.f32 %v3400_v2, %v3398_v44  ;;  %v3323_v62 = vpop.f32.mrf.mxu0 }
 0xcc6   :  { %v3403_v13 = vmin.f32 %v3401_v18, 0.0  ;;  %vm3402_vm11 = vcmp.gt.f32.partialorder %v3401_v18, 0.0 }
 0xcc8   :  { %v3404_v55 = vmul.f32 1.442695, %v3403_v13 }
 0xcca   :  { %3686 = vpow2.f32 %v3404_v55 }
 0xcd7   :  { %v3687_v52 = vpop.eup %3686 }
 0xcd8   :  { %v3553_v29 = vadd.f32 -1.0, %v3687_v52 }
 0xcda   :  { %v3407_v28 = vsel %vm3402_vm11, %v3401_v18, %v3553_v29 }
 0xcdb   :  { %3409 = vst.msk [vmem:[#allocation10] sm:$0xff] %vm3408_vm10, %v3407_v28 }
 0xcdc   :  { %3742 = shalt.err (!%p3739_p0)
}
 0xcdd   :  { %3419 = dma.vmem_to_hbm [thread:$0]  %s3417_s8, 128, %s5864_s7, [#allocation6]  }
 0xcde   :  { %3755 = dma.done.wait [#allocation6], 128  }
 0xcdf   :  { %3756 = vsyncadd [#allocation6], 4294967168 }
 0xce0   :  { %3423 = vsyncpa [#allocation6], 1 }
 0xce1   :  { %3424 = vsyncpa [#allocation7], 1 }
 0xce2   :  { %3425 = vsyncpa [#allocation9], 1 }

</bundles_post_ra>
